<compile_context>
chip_gen: v7x
topology: tpu7x:2x2x1
jax: 0.10.0
libtpu: 0.0.40
codegen_flags: <defaults>
</compile_context>

<pallas_src>
import functools

import jax
import jax.numpy as jnp
from jax import lax
from jax.experimental import pallas as pl
from jax.experimental.pallas import tpu as pltpu


# ---------------------------------------------------------------------------
# Fused kernel: all four conv layers + biases + ReLUs + residual in one body.
# Input / output blocks are channels-first flattened: (1, C, H*W).
# ---------------------------------------------------------------------------
def _lowfreq_fused_kernel(x_ref, w1_ref, b1_ref, w2_ref, b2_ref,
                          w3_ref, b3_ref, w4_ref, b4_ref, out_ref, *, H, W):
    HW = H * W
    cdt = jnp.bfloat16

    xin = x_ref[0]                                       # (Cin0, HW) f32
    x_hwc = jnp.transpose(xin, (1, 0)).reshape(H, W, xin.shape[0])

    def pad_same(a):
        # Zero-pad H and W by 1 on each side, entirely in VMEM (no HBM pad op).
        c = a.shape[-1]
        zc = jnp.zeros((H, 1, c), a.dtype)
        zr = jnp.zeros((1, W + 2, c), a.dtype)
        a = jnp.concatenate([zc, a, zc], axis=1)         # (H, W+2, c)
        return jnp.concatenate([zr, a, zr], axis=0)      # (H+2, W+2, c)

    def conv3x3(a_hwc, w_ref, b_ref, relu):
        # a_hwc: (H, W, Cin) bf16 ; w_ref: (9*Cin, Cout) bf16 ; b_ref: (1, Cout) f32
        cin = a_hwc.shape[-1]
        xp = pad_same(a_hwc)                             # (H+2, W+2, Cin)
        # im2col: fold the 9 taps into the contraction dim -> one deep-K matmul.
        taps = [xp[kh:kh + H, kw:kw + W, :]
                for kh in range(3) for kw in range(3)]   # each (H, W, Cin)
        patch = jnp.concatenate(taps, axis=-1).reshape(HW, 9 * cin)
        acc = jnp.dot(patch, w_ref[...],
                      preferred_element_type=jnp.float32)    # (HW, Cout) f32
        acc = acc + b_ref[...]                           # broadcast (1, Cout)
        if relu:
            acc = jnp.maximum(acc, 0.0)
        return acc

    h = conv3x3(x_hwc.astype(cdt), w1_ref, b1_ref, relu=True)                 # (HW, 32)
    h = conv3x3(h.astype(cdt).reshape(H, W, -1), w2_ref, b2_ref, relu=True)   # (HW, 64)
    h = conv3x3(h.astype(cdt).reshape(H, W, -1), w3_ref, b3_ref, relu=True)   # (HW, 64)
    h = conv3x3(h.astype(cdt).reshape(H, W, -1), w4_ref, b4_ref, relu=False)  # (HW, 3)

    out = xin + jnp.transpose(h, (1, 0))                 # f32 residual, (Cout, HW)
    out_ref[...] = out[None].astype(out_ref.dtype)


# ---------------------------------------------------------------------------
# Wrapper: NCHW in / NCHW out, matching the PyTorch module.
# ---------------------------------------------------------------------------
def lowfreqnet_forward(x_nchw, params):
    B, C, H, W = x_nchw.shape
    HW = H * W
    # NCHW -> (B, C, H*W) is a free reshape; the kernel works on this layout so
    # the trailing HBM dim is lane-dense and no separate transpose ops are needed.
    x_flat = x_nchw.reshape(B, C, HW)

    wb_args, wb_specs = [], []
    for i in range(1, 5):
        w = params[f"w{i}"]                               # (3, 3, Cin, Cout) HWIO
        cout = w.shape[-1]
        wf = w.reshape(-1, cout).astype(jnp.bfloat16)     # (9*Cin, Cout) bf16
        bf = params[f"b{i}"].reshape(1, cout)             # (1, Cout) f32
        wb_args += [wf, bf]
        wb_specs += [pl.BlockSpec(wf.shape, lambda b: (0, 0)),
                     pl.BlockSpec(bf.shape, lambda b: (0, 0))]

    cout_last = params["w4"].shape[-1]
    out_flat = pl.pallas_call(
        functools.partial(_lowfreq_fused_kernel, H=H, W=W),
        out_shape=jax.ShapeDtypeStruct((B, cout_last, HW), x_nchw.dtype),
        grid=(B,),
        in_specs=[pl.BlockSpec((1, C, HW), lambda b: (b, 0, 0))] + wb_specs,
        out_specs=pl.BlockSpec((1, cout_last, HW), lambda b: (b, 0, 0)),
        compiler_params=pltpu.CompilerParams(
            dimension_semantics=("parallel",)),           # one image per TC on v7x
    )(x_flat, *wb_args)
    return out_flat.reshape(B, cout_last, H, W)


def init_params(key):
    """Deterministic init; weights stored as HWIO (3, 3, Cin, Cout), f32 master."""
    dims = [(3, 32), (32, 64), (64, 64), (64, 3)]
    params = {}
    for i, (cin, cout) in enumerate(dims, start=1):
        key, kw, kb = jax.random.split(key, 3)
        fan_in = cin * 9
        scale = (2.0 / fan_in) ** 0.5
        params[f"w{i}"] = scale * jax.random.normal(kw, (3, 3, cin, cout), jnp.float32)
        params[f"b{i}"] = 0.01 * jax.random.normal(kb, (cout,), jnp.float32)
    return params


# Pure-JAX reference with the SAME numerics as the kernel (bf16 operands,
# f32 accumulation, f32 bias/ReLU/residual) so only summation order differs.
def _reference_forward(x_nchw, params):
    dn = ("NHWC", "HWIO", "NHWC")
    x = jnp.transpose(x_nchw, (0, 2, 3, 1))

    def conv(h, w, b):
        y = lax.conv_general_dilated(
            h.astype(jnp.bfloat16), w.astype(jnp.bfloat16), (1, 1), "SAME",
            dimension_numbers=dn, preferred_element_type=jnp.float32)
        return y + b

    h = jax.nn.relu(conv(x, params["w1"], params["b1"]))
    h = jax.nn.relu(conv(h, params["w2"], params["b2"]))
    h = jax.nn.relu(conv(h, params["w3"], params["b3"]))
    out = x + conv(h, params["w4"], params["b4"])
    return jnp.transpose(out, (0, 3, 1, 2))


if __name__ == "__main__":
    key = jax.random.PRNGKey(0)
    key, kx = jax.random.split(key)
    B, C, H, W = 2, 3, 16, 16
    x = jax.random.normal(kx, (B, C, H, W), jnp.float32)
    params = init_params(key)

    out = jax.jit(lowfreqnet_forward)(x, params)
    out = jax.block_until_ready(out)

    ref = _reference_forward(x, params)
    assert out.shape == (B, C, H, W)
    if not jnp.allclose(out, ref, atol=1e-2, rtol=1e-2):
        err = float(jnp.max(jnp.abs(out - ref)))
        raise AssertionError(f"Pallas LowFreqNet does not match reference (max err {err})")

    print("KERNEL_OK")
</pallas_src>

<mosaic_0001>
module attributes {stable_mosaic.version = 11 : i64} {
  func.func @_lowfreq_fused_kernel(%arg0: i32, %arg1: memref<1x3x256xf32, #tpu.memory_space<vmem>>, %arg2: memref<27x32xbf16, #tpu.memory_space<vmem>>, %arg3: memref<1x32xf32, #tpu.memory_space<vmem>>, %arg4: memref<288x64xbf16, #tpu.memory_space<vmem>>, %arg5: memref<1x64xf32, #tpu.memory_space<vmem>>, %arg6: memref<576x64xbf16, #tpu.memory_space<vmem>>, %arg7: memref<1x64xf32, #tpu.memory_space<vmem>>, %arg8: memref<576x3xbf16, #tpu.memory_space<vmem>>, %arg9: memref<1x3xf32, #tpu.memory_space<vmem>>, %arg10: memref<1x3x256xf32, #tpu.memory_space<vmem>>) attributes {dimension_semantics = [#tpu.dimension_semantics<parallel>], iteration_bounds = array<i64: 2>, scalar_prefetch = 0 : i64, scratch_operands = 0 : i64, tpu.core_type = #tpu.core_type<tc>, window_params = [{transform_indices = @transform_0, window_bounds = array<i64: 1, 3, 256>}, {pipeline_mode = #tpu.pipeline_mode<synchronous>, transform_indices = @transform_1, window_bounds = array<i64: 27, 32>}, {pipeline_mode = #tpu.pipeline_mode<synchronous>, transform_indices = @transform_2, window_bounds = array<i64: 1, 32>}, {pipeline_mode = #tpu.pipeline_mode<synchronous>, transform_indices = @transform_3, window_bounds = array<i64: 288, 64>}, {pipeline_mode = #tpu.pipeline_mode<synchronous>, transform_indices = @transform_4, window_bounds = array<i64: 1, 64>}, {pipeline_mode = #tpu.pipeline_mode<synchronous>, transform_indices = @transform_5, window_bounds = array<i64: 576, 64>}, {pipeline_mode = #tpu.pipeline_mode<synchronous>, transform_indices = @transform_6, window_bounds = array<i64: 1, 64>}, {pipeline_mode = #tpu.pipeline_mode<synchronous>, transform_indices = @transform_7, window_bounds = array<i64: 576, 3>}, {pipeline_mode = #tpu.pipeline_mode<synchronous>, transform_indices = @transform_8, window_bounds = array<i64: 1, 3>}, {transform_indices = @transform_9, window_bounds = array<i64: 1, 3, 256>}]} {
    %c0 = arith.constant 0 : index
    %c0_0 = arith.constant 0 : index
    %c0_1 = arith.constant 0 : index
    %0 = vector.load %arg1[%c0, %c0_0, %c0_1] : memref<1x3x256xf32, #tpu.memory_space<vmem>>, vector<1x3x256xf32>
    %1 = vector.shape_cast %0 : vector<1x3x256xf32> to vector<3x256xf32>
    %2 = tpu.transpose %1, [1, 0] : vector<3x256xf32> -> vector<256x3xf32>
    %3 = vector.shape_cast %2 : vector<256x3xf32> to vector<16x16x3xf32>
    %4 = arith.truncf %3 : vector<16x16x3xf32> to vector<16x16x3xbf16>
    %cst = arith.constant 0.000000e+00 : bf16
    %5 = vector.broadcast %cst : bf16 to vector<16x1x3xbf16>
    %cst_2 = arith.constant 0.000000e+00 : bf16
    %6 = vector.broadcast %cst_2 : bf16 to vector<1x18x3xbf16>
    %7 = tpu.concatenate %5, %4, %5 in 1 : vector<16x1x3xbf16>, vector<16x16x3xbf16>, vector<16x1x3xbf16> -> vector<16x18x3xbf16>
    %8 = tpu.concatenate %6, %7, %6 in 0 : vector<1x18x3xbf16>, vector<16x18x3xbf16>, vector<1x18x3xbf16> -> vector<18x18x3xbf16>
    %9 = vector.extract_strided_slice %8 {offsets = [0, 0, 0], sizes = [16, 16, 3], strides = [1, 1, 1]} : vector<18x18x3xbf16> to vector<16x16x3xbf16>
    %10 = vector.extract_strided_slice %8 {offsets = [0, 1, 0], sizes = [16, 16, 3], strides = [1, 1, 1]} : vector<18x18x3xbf16> to vector<16x16x3xbf16>
    %11 = vector.extract_strided_slice %8 {offsets = [0, 2, 0], sizes = [16, 16, 3], strides = [1, 1, 1]} : vector<18x18x3xbf16> to vector<16x16x3xbf16>
    %12 = vector.extract_strided_slice %8 {offsets = [1, 0, 0], sizes = [16, 16, 3], strides = [1, 1, 1]} : vector<18x18x3xbf16> to vector<16x16x3xbf16>
    %13 = vector.extract_strided_slice %8 {offsets = [1, 1, 0], sizes = [16, 16, 3], strides = [1, 1, 1]} : vector<18x18x3xbf16> to vector<16x16x3xbf16>
    %14 = vector.extract_strided_slice %8 {offsets = [1, 2, 0], sizes = [16, 16, 3], strides = [1, 1, 1]} : vector<18x18x3xbf16> to vector<16x16x3xbf16>
    %15 = vector.extract_strided_slice %8 {offsets = [2, 0, 0], sizes = [16, 16, 3], strides = [1, 1, 1]} : vector<18x18x3xbf16> to vector<16x16x3xbf16>
    %16 = vector.extract_strided_slice %8 {offsets = [2, 1, 0], sizes = [16, 16, 3], strides = [1, 1, 1]} : vector<18x18x3xbf16> to vector<16x16x3xbf16>
    %17 = vector.extract_strided_slice %8 {offsets = [2, 2, 0], sizes = [16, 16, 3], strides = [1, 1, 1]} : vector<18x18x3xbf16> to vector<16x16x3xbf16>
    %18 = tpu.concatenate %9, %10, %11, %12, %13, %14, %15, %16, %17 in 2 : vector<16x16x3xbf16>, vector<16x16x3xbf16>, vector<16x16x3xbf16>, vector<16x16x3xbf16>, vector<16x16x3xbf16>, vector<16x16x3xbf16>, vector<16x16x3xbf16>, vector<16x16x3xbf16>, vector<16x16x3xbf16> -> vector<16x16x27xbf16>
    %19 = vector.shape_cast %18 : vector<16x16x27xbf16> to vector<256x27xbf16>
    %c0_3 = arith.constant 0 : index
    %c0_4 = arith.constant 0 : index
    %20 = vector.load %arg2[%c0_3, %c0_4] : memref<27x32xbf16, #tpu.memory_space<vmem>>, vector<27x32xbf16>
    %cst_5 = arith.constant dense<0.000000e+00> : vector<256x32xf32>
    %21 = tpu.matmul %19, %20, %cst_5 {dimension_numbers = #tpu.dot_dimension_numbers<[1], [0], [0], [1], [0, 0, 1, 1], [], []>} : vector<256x27xbf16>, vector<27x32xbf16>, vector<256x32xf32> -> vector<256x32xf32>
    %c0_6 = arith.constant 0 : index
    %c0_7 = arith.constant 0 : index
    %22 = vector.load %arg3[%c0_6, %c0_7] : memref<1x32xf32, #tpu.memory_space<vmem>>, vector<1x32xf32>
    %23 = vector.broadcast %22 : vector<1x32xf32> to vector<256x32xf32>
    %24 = arith.addf %21, %23 : vector<256x32xf32>
    %cst_8 = arith.constant 0.000000e+00 : f32
    %25 = vector.broadcast %cst_8 : f32 to vector<256x32xf32>
    %26 = arith.maximumf %24, %25 : vector<256x32xf32>
    %27 = arith.truncf %26 : vector<256x32xf32> to vector<256x32xbf16>
    %28 = vector.shape_cast %27 : vector<256x32xbf16> to vector<16x16x32xbf16>
    %cst_9 = arith.constant 0.000000e+00 : bf16
    %29 = vector.broadcast %cst_9 : bf16 to vector<16x1x32xbf16>
    %cst_10 = arith.constant 0.000000e+00 : bf16
    %30 = vector.broadcast %cst_10 : bf16 to vector<1x18x32xbf16>
    %31 = tpu.concatenate %29, %28, %29 in 1 : vector<16x1x32xbf16>, vector<16x16x32xbf16>, vector<16x1x32xbf16> -> vector<16x18x32xbf16>
    %32 = tpu.concatenate %30, %31, %30 in 0 : vector<1x18x32xbf16>, vector<16x18x32xbf16>, vector<1x18x32xbf16> -> vector<18x18x32xbf16>
    %33 = vector.extract_strided_slice %32 {offsets = [0, 0, 0], sizes = [16, 16, 32], strides = [1, 1, 1]} : vector<18x18x32xbf16> to vector<16x16x32xbf16>
    %34 = vector.extract_strided_slice %32 {offsets = [0, 1, 0], sizes = [16, 16, 32], strides = [1, 1, 1]} : vector<18x18x32xbf16> to vector<16x16x32xbf16>
    %35 = vector.extract_strided_slice %32 {offsets = [0, 2, 0], sizes = [16, 16, 32], strides = [1, 1, 1]} : vector<18x18x32xbf16> to vector<16x16x32xbf16>
    %36 = vector.extract_strided_slice %32 {offsets = [1, 0, 0], sizes = [16, 16, 32], strides = [1, 1, 1]} : vector<18x18x32xbf16> to vector<16x16x32xbf16>
    %37 = vector.extract_strided_slice %32 {offsets = [1, 1, 0], sizes = [16, 16, 32], strides = [1, 1, 1]} : vector<18x18x32xbf16> to vector<16x16x32xbf16>
    %38 = vector.extract_strided_slice %32 {offsets = [1, 2, 0], sizes = [16, 16, 32], strides = [1, 1, 1]} : vector<18x18x32xbf16> to vector<16x16x32xbf16>
    %39 = vector.extract_strided_slice %32 {offsets = [2, 0, 0], sizes = [16, 16, 32], strides = [1, 1, 1]} : vector<18x18x32xbf16> to vector<16x16x32xbf16>
    %40 = vector.extract_strided_slice %32 {offsets = [2, 1, 0], sizes = [16, 16, 32], strides = [1, 1, 1]} : vector<18x18x32xbf16> to vector<16x16x32xbf16>
    %41 = vector.extract_strided_slice %32 {offsets = [2, 2, 0], sizes = [16, 16, 32], strides = [1, 1, 1]} : vector<18x18x32xbf16> to vector<16x16x32xbf16>
    %42 = tpu.concatenate %33, %34, %35, %36, %37, %38, %39, %40, %41 in 2 : vector<16x16x32xbf16>, vector<16x16x32xbf16>, vector<16x16x32xbf16>, vector<16x16x32xbf16>, vector<16x16x32xbf16>, vector<16x16x32xbf16>, vector<16x16x32xbf16>, vector<16x16x32xbf16>, vector<16x16x32xbf16> -> vector<16x16x288xbf16>
    %43 = vector.shape_cast %42 : vector<16x16x288xbf16> to vector<256x288xbf16>
    %c0_11 = arith.constant 0 : index
    %c0_12 = arith.constant 0 : index
    %44 = vector.load %arg4[%c0_11, %c0_12] : memref<288x64xbf16, #tpu.memory_space<vmem>>, vector<288x64xbf16>
    %cst_13 = arith.constant dense<0.000000e+00> : vector<256x64xf32>
    %45 = tpu.matmul %43, %44, %cst_13 {dimension_numbers = #tpu.dot_dimension_numbers<[1], [0], [0], [1], [0, 0, 1, 1], [], []>} : vector<256x288xbf16>, vector<288x64xbf16>, vector<256x64xf32> -> vector<256x64xf32>
    %c0_14 = arith.constant 0 : index
    %c0_15 = arith.constant 0 : index
    %46 = vector.load %arg5[%c0_14, %c0_15] : memref<1x64xf32, #tpu.memory_space<vmem>>, vector<1x64xf32>
    %47 = vector.broadcast %46 : vector<1x64xf32> to vector<256x64xf32>
    %48 = arith.addf %45, %47 : vector<256x64xf32>
    %cst_16 = arith.constant 0.000000e+00 : f32
    %49 = vector.broadcast %cst_16 : f32 to vector<256x64xf32>
    %50 = arith.maximumf %48, %49 : vector<256x64xf32>
    %51 = arith.truncf %50 : vector<256x64xf32> to vector<256x64xbf16>
    %52 = vector.shape_cast %51 : vector<256x64xbf16> to vector<16x16x64xbf16>
    %cst_17 = arith.constant 0.000000e+00 : bf16
    %53 = vector.broadcast %cst_17 : bf16 to vector<16x1x64xbf16>
    %cst_18 = arith.constant 0.000000e+00 : bf16
    %54 = vector.broadcast %cst_18 : bf16 to vector<1x18x64xbf16>
    %55 = tpu.concatenate %53, %52, %53 in 1 : vector<16x1x64xbf16>, vector<16x16x64xbf16>, vector<16x1x64xbf16> -> vector<16x18x64xbf16>
    %56 = tpu.concatenate %54, %55, %54 in 0 : vector<1x18x64xbf16>, vector<16x18x64xbf16>, vector<1x18x64xbf16> -> vector<18x18x64xbf16>
    %57 = vector.extract_strided_slice %56 {offsets = [0, 0, 0], sizes = [16, 16, 64], strides = [1, 1, 1]} : vector<18x18x64xbf16> to vector<16x16x64xbf16>
    %58 = vector.extract_strided_slice %56 {offsets = [0, 1, 0], sizes = [16, 16, 64], strides = [1, 1, 1]} : vector<18x18x64xbf16> to vector<16x16x64xbf16>
    %59 = vector.extract_strided_slice %56 {offsets = [0, 2, 0], sizes = [16, 16, 64], strides = [1, 1, 1]} : vector<18x18x64xbf16> to vector<16x16x64xbf16>
    %60 = vector.extract_strided_slice %56 {offsets = [1, 0, 0], sizes = [16, 16, 64], strides = [1, 1, 1]} : vector<18x18x64xbf16> to vector<16x16x64xbf16>
    %61 = vector.extract_strided_slice %56 {offsets = [1, 1, 0], sizes = [16, 16, 64], strides = [1, 1, 1]} : vector<18x18x64xbf16> to vector<16x16x64xbf16>
    %62 = vector.extract_strided_slice %56 {offsets = [1, 2, 0], sizes = [16, 16, 64], strides = [1, 1, 1]} : vector<18x18x64xbf16> to vector<16x16x64xbf16>
    %63 = vector.extract_strided_slice %56 {offsets = [2, 0, 0], sizes = [16, 16, 64], strides = [1, 1, 1]} : vector<18x18x64xbf16> to vector<16x16x64xbf16>
    %64 = vector.extract_strided_slice %56 {offsets = [2, 1, 0], sizes = [16, 16, 64], strides = [1, 1, 1]} : vector<18x18x64xbf16> to vector<16x16x64xbf16>
    %65 = vector.extract_strided_slice %56 {offsets = [2, 2, 0], sizes = [16, 16, 64], strides = [1, 1, 1]} : vector<18x18x64xbf16> to vector<16x16x64xbf16>
    %66 = tpu.concatenate %57, %58, %59, %60, %61, %62, %63, %64, %65 in 2 : vector<16x16x64xbf16>, vector<16x16x64xbf16>, vector<16x16x64xbf16>, vector<16x16x64xbf16>, vector<16x16x64xbf16>, vector<16x16x64xbf16>, vector<16x16x64xbf16>, vector<16x16x64xbf16>, vector<16x16x64xbf16> -> vector<16x16x576xbf16>
    %67 = vector.shape_cast %66 : vector<16x16x576xbf16> to vector<256x576xbf16>
    %c0_19 = arith.constant 0 : index
    %c0_20 = arith.constant 0 : index
    %68 = vector.load %arg6[%c0_19, %c0_20] : memref<576x64xbf16, #tpu.memory_space<vmem>>, vector<576x64xbf16>
    %cst_21 = arith.constant dense<0.000000e+00> : vector<256x64xf32>
    %69 = tpu.matmul %67, %68, %cst_21 {dimension_numbers = #tpu.dot_dimension_numbers<[1], [0], [0], [1], [0, 0, 1, 1], [], []>} : vector<256x576xbf16>, vector<576x64xbf16>, vector<256x64xf32> -> vector<256x64xf32>
    %c0_22 = arith.constant 0 : index
    %c0_23 = arith.constant 0 : index
    %70 = vector.load %arg7[%c0_22, %c0_23] : memref<1x64xf32, #tpu.memory_space<vmem>>, vector<1x64xf32>
    %71 = vector.broadcast %70 : vector<1x64xf32> to vector<256x64xf32>
    %72 = arith.addf %69, %71 : vector<256x64xf32>
    %cst_24 = arith.constant 0.000000e+00 : f32
    %73 = vector.broadcast %cst_24 : f32 to vector<256x64xf32>
    %74 = arith.maximumf %72, %73 : vector<256x64xf32>
    %75 = arith.truncf %74 : vector<256x64xf32> to vector<256x64xbf16>
    %76 = vector.shape_cast %75 : vector<256x64xbf16> to vector<16x16x64xbf16>
    %cst_25 = arith.constant 0.000000e+00 : bf16
    %77 = vector.broadcast %cst_25 : bf16 to vector<16x1x64xbf16>
    %cst_26 = arith.constant 0.000000e+00 : bf16
    %78 = vector.broadcast %cst_26 : bf16 to vector<1x18x64xbf16>
    %79 = tpu.concatenate %77, %76, %77 in 1 : vector<16x1x64xbf16>, vector<16x16x64xbf16>, vector<16x1x64xbf16> -> vector<16x18x64xbf16>
    %80 = tpu.concatenate %78, %79, %78 in 0 : vector<1x18x64xbf16>, vector<16x18x64xbf16>, vector<1x18x64xbf16> -> vector<18x18x64xbf16>
    %81 = vector.extract_strided_slice %80 {offsets = [0, 0, 0], sizes = [16, 16, 64], strides = [1, 1, 1]} : vector<18x18x64xbf16> to vector<16x16x64xbf16>
    %82 = vector.extract_strided_slice %80 {offsets = [0, 1, 0], sizes = [16, 16, 64], strides = [1, 1, 1]} : vector<18x18x64xbf16> to vector<16x16x64xbf16>
    %83 = vector.extract_strided_slice %80 {offsets = [0, 2, 0], sizes = [16, 16, 64], strides = [1, 1, 1]} : vector<18x18x64xbf16> to vector<16x16x64xbf16>
    %84 = vector.extract_strided_slice %80 {offsets = [1, 0, 0], sizes = [16, 16, 64], strides = [1, 1, 1]} : vector<18x18x64xbf16> to vector<16x16x64xbf16>
    %85 = vector.extract_strided_slice %80 {offsets = [1, 1, 0], sizes = [16, 16, 64], strides = [1, 1, 1]} : vector<18x18x64xbf16> to vector<16x16x64xbf16>
    %86 = vector.extract_strided_slice %80 {offsets = [1, 2, 0], sizes = [16, 16, 64], strides = [1, 1, 1]} : vector<18x18x64xbf16> to vector<16x16x64xbf16>
    %87 = vector.extract_strided_slice %80 {offsets = [2, 0, 0], sizes = [16, 16, 64], strides = [1, 1, 1]} : vector<18x18x64xbf16> to vector<16x16x64xbf16>
    %88 = vector.extract_strided_slice %80 {offsets = [2, 1, 0], sizes = [16, 16, 64], strides = [1, 1, 1]} : vector<18x18x64xbf16> to vector<16x16x64xbf16>
    %89 = vector.extract_strided_slice %80 {offsets = [2, 2, 0], sizes = [16, 16, 64], strides = [1, 1, 1]} : vector<18x18x64xbf16> to vector<16x16x64xbf16>
    %90 = tpu.concatenate %81, %82, %83, %84, %85, %86, %87, %88, %89 in 2 : vector<16x16x64xbf16>, vector<16x16x64xbf16>, vector<16x16x64xbf16>, vector<16x16x64xbf16>, vector<16x16x64xbf16>, vector<16x16x64xbf16>, vector<16x16x64xbf16>, vector<16x16x64xbf16>, vector<16x16x64xbf16> -> vector<16x16x576xbf16>
    %91 = vector.shape_cast %90 : vector<16x16x576xbf16> to vector<256x576xbf16>
    %c0_27 = arith.constant 0 : index
    %c0_28 = arith.constant 0 : index
    %92 = vector.load %arg8[%c0_27, %c0_28] : memref<576x3xbf16, #tpu.memory_space<vmem>>, vector<576x3xbf16>
    %cst_29 = arith.constant dense<0.000000e+00> : vector<256x3xf32>
    %93 = tpu.matmul %91, %92, %cst_29 {dimension_numbers = #tpu.dot_dimension_numbers<[1], [0], [0], [1], [0, 0, 1, 1], [], []>} : vector<256x576xbf16>, vector<576x3xbf16>, vector<256x3xf32> -> vector<256x3xf32>
    %c0_30 = arith.constant 0 : index
    %c0_31 = arith.constant 0 : index
    %94 = vector.load %arg9[%c0_30, %c0_31] : memref<1x3xf32, #tpu.memory_space<vmem>>, vector<1x3xf32>
    %95 = vector.broadcast %94 : vector<1x3xf32> to vector<256x3xf32>
    %96 = arith.addf %93, %95 : vector<256x3xf32>
    %97 = tpu.transpose %96, [1, 0] : vector<256x3xf32> -> vector<3x256xf32>
    %98 = arith.addf %1, %97 : vector<3x256xf32>
    %99 = vector.shape_cast %98 : vector<3x256xf32> to vector<1x3x256xf32>
    %c0_32 = arith.constant 0 : index
    %c0_33 = arith.constant 0 : index
    %c0_34 = arith.constant 0 : index
    %100 = vector.load %arg10[%c0_32, %c0_33, %c0_34] : memref<1x3x256xf32, #tpu.memory_space<vmem>>, vector<1x3x256xf32>
    tpu.vector_store %arg10[%c0_32, %c0_33, %c0_34], %99 {strides = array<i32>} : memref<1x3x256xf32, #tpu.memory_space<vmem>>, vector<1x3x256xf32>,
    return
  }
  func.func @transform_0(%arg0: i32) -> (i32, i32, i32) {
    %c0_i32 = arith.constant 0 : i32
    %c0_i32_0 = arith.constant 0 : i32
    %c0_i32_1 = arith.constant 0 : i32
    return %arg0, %c0_i32, %c0_i32_0 : i32, i32, i32
  }
  func.func @transform_1(%arg0: i32) -> (i32, i32) {
    %c0_i32 = arith.constant 0 : i32
    %c0_i32_0 = arith.constant 0 : i32
    %c0_i32_1 = arith.constant 0 : i32
    return %c0_i32, %c0_i32_0 : i32, i32
  }
  func.func @transform_2(%arg0: i32) -> (i32, i32) {
    %c0_i32 = arith.constant 0 : i32
    %c0_i32_0 = arith.constant 0 : i32
    %c0_i32_1 = arith.constant 0 : i32
    return %c0_i32, %c0_i32_0 : i32, i32
  }
  func.func @transform_3(%arg0: i32) -> (i32, i32) {
    %c0_i32 = arith.constant 0 : i32
    %c0_i32_0 = arith.constant 0 : i32
    %c0_i32_1 = arith.constant 0 : i32
    return %c0_i32, %c0_i32_0 : i32, i32
  }
  func.func @transform_4(%arg0: i32) -> (i32, i32) {
    %c0_i32 = arith.constant 0 : i32
    %c0_i32_0 = arith.constant 0 : i32
    %c0_i32_1 = arith.constant 0 : i32
    return %c0_i32, %c0_i32_0 : i32, i32
  }
  func.func @transform_5(%arg0: i32) -> (i32, i32) {
    %c0_i32 = arith.constant 0 : i32
    %c0_i32_0 = arith.constant 0 : i32
    %c0_i32_1 = arith.constant 0 : i32
    return %c0_i32, %c0_i32_0 : i32, i32
  }
  func.func @transform_6(%arg0: i32) -> (i32, i32) {
    %c0_i32 = arith.constant 0 : i32
    %c0_i32_0 = arith.constant 0 : i32
    %c0_i32_1 = arith.constant 0 : i32
    return %c0_i32, %c0_i32_0 : i32, i32
  }
  func.func @transform_7(%arg0: i32) -> (i32, i32) {
    %c0_i32 = arith.constant 0 : i32
    %c0_i32_0 = arith.constant 0 : i32
    %c0_i32_1 = arith.constant 0 : i32
    return %c0_i32, %c0_i32_0 : i32, i32
  }
  func.func @transform_8(%arg0: i32) -> (i32, i32) {
    %c0_i32 = arith.constant 0 : i32
    %c0_i32_0 = arith.constant 0 : i32
    %c0_i32_1 = arith.constant 0 : i32
    return %c0_i32, %c0_i32_0 : i32, i32
  }
  func.func @transform_9(%arg0: i32) -> (i32, i32, i32) {
    %c0_i32 = arith.constant 0 : i32
    %c0_i32_0 = arith.constant 0 : i32
    %c0_i32_1 = arith.constant 0 : i32
    return %arg0, %c0_i32, %c0_i32_0 : i32, i32, i32
  }
}

</mosaic_0001>

<bundles_post_ra>
// kernel: lowfreqnet_forward.1
= control target key start
LH: loop header
LB: loop body
LE: loop exit
PB: predicated region body
PF: predicated region fallthrough
CT: control target
= control target key end

     0   :  { %s7619_s30 = smov 0   ;;  %s11065_s0 = inlined_call_operand.vmem [shape: f32[2,3,256], index: 0, kind: input, shape index: {}]   ;;  %s11066_s1 = inlined_call_operand.vmem [shape: bf16[27,32], index: 1, kind: input, shape index: {}]   ;;  %s11067_s2 = inlined_call_operand.vmem [shape: f32[1,32], index: 2, kind: input, shape index: {}]   ;;  %s11068_s3 = inlined_call_operand.vmem [shape: bf16[288,64], index: 3, kind: input, shape index: {}]   ;;  %s11069_s4 = inlined_call_operand.vmem [shape: f32[1,64], index: 4, kind: input, shape index: {}]   ;;  %s11070_s5 = inlined_call_operand.vmem [shape: bf16[576,64], index: 5, kind: input, shape index: {}]   ;;  %s11071_s6 = inlined_call_operand.vmem [shape: f32[1,64], index: 6, kind: input, shape index: {}]   ;;  %s11072_s7 = inlined_call_operand.vmem [shape: bf16[576,3], index: 7, kind: input, shape index: {}]   ;;  %s11073_s8 = inlined_call_operand.vmem [shape: f32[1,3], index: 8, kind: input, shape index: {}]   ;;  %s11074_s9 = inlined_call_operand.vmem [shape: f32[2,3,256], index: 9, kind: output, shape index: {}]  }
   0x1 LB: > { %s6361_s10 = sadd.s32 4294967295, %s7554_s30   ;;  %p6365_p0 = scmp.ge.s32.totalorder %s7554_s30, 1  ;;  %s7554_s30 = sphi %s7619_s30, %s19_s30  }
   0x2   : > { %p287_p1 = scmp.lt.s32.totalorder %s7554_s30, 3 }
   0x4   : > { %p288_p2 = pnand %p6365_p0, %p287_p1 }
   0x6   : > { %291 = sbr.rel (%p288_p2) target bundleno = 2167 (0x877), region = 56 }
   0xd   : > { %p323_p3 = scmp.lt.s32.totalorder %s6361_s10, 1  ;;  %v7556_v3 = vmov 0   ;;  %s7557_s15 = smov 6   ;;  %vm562_vm0 = vcmask 1040384   ;;  %vm563_vm1 = vsmask.f32 256 }
   0xe   : > { %v7639_v4 = vrot.slane %v7556_v3, 1  ;;  %s7558_s16 = smov 3   ;;  %vm7655_vm2 = vmand %vm562_vm0, %vm563_vm1  ;;  %s7559_s17 = smov 9   ;;  %vm849_vm3 = vcmask 1046528   ;;  %vm597_vm4 = vsmask.f32 7424 }
   0xf   : > { %s11122_s10 = smov (!%p323_p3, %s6361_s10), 1  ;;  %s7560_s18 = smov 15   ;;  %vm1457_vm5 = vcmask 1044480   ;;  %vm1458_vm6 = vcmask 1045504   ;;  %vm1138_vm7 = vcmask 23552   ;;  %vm1171_vm8 = vcmask 48128  }
  0x10   : > { %s6540_s11 = sshll.u32 %s11122_s10, 3  ;;  %11089 = vst [vmem:[#allocation2_spill] sm:$0xff] %v7639_v4  ;;  %897 = vrot.lane.b32.xlu1 %v7639_v4, %s7557_s15  ;;  %s7561_s19 = smov 12   ;;  %vm1204_vm9 = vcmask 72704   ;;  %vm1237_vm10 = vcmask 97280   ;;  %vm1270_vm11 = vcmask 121856  }
  0x11   : > { %s7635_s14 = scalar_lea.vmem %s11065_s0, %s6540_s11  ;;  %s7562_s20 = smov 18   ;;  %vm1303_vm12 = vcmask 146432   ;;  %vm1336_vm13 = vcmask 171008   ;;  %vm1369_vm14 = vcmask 195584   ;;  %vm1424_vm15 = vcmask 220160  }
  0x12   : > { %v334_v0 = vld [vmem:[%s7635_s14] sm:$0x77]  ;;  %s7563_s21 = smov 24   ;;  %s7564_s22 = smov 21   ;;  %vm2313_vm0 = vcmask 261120   ;;  %vm2346_vm1 = vcmask 523264  }
  0x13   : > { %v336_v1 = vcombine.high %v334_v0, %v334_v0  ;;  %s7566_s27 = smov 32   ;;  %s7567_s28 = smov 64  }
  0x15   : > { %v7368_v2 = vpack.i.bf16 %v336_v1, %v334_v0 }
  0x17   : > { %7369 = vxpose.xlu0.b32.start.end [1/1] (short) %v7368_v2, 128 }
  0x7c   : > { %786 = vrot.lane.b32.xlu0 %v7639_v4, %s7558_s16 }
  0x97   : > { %v7645_v5 = vpop.trf.xlu0 }
  0x98   : > { %v7371_v7 = vunpack.i.l.bf16 %v7645_v5 }
  0x9b   : > { %v7647_v6 = vpop.trf.xlu0 }
  0x9c   : > { %v7376_v8 = vunpack.i.l.bf16 %v7647_v6 }
  0x9e   : > { %v402_v9 = vpack.c.bf16 %v7376_v8, %v7371_v7 }
  0x9f   : > { %v7651_v10 = vpop.trf.xlu0 }
  0xa0   : > { %v419_v11 = vshrl.u32 %v402_v9, 16  ;;  %v422_v14 = vshll.u32 %v402_v9, 16  ;;  %v7381_v18 = vunpack.i.l.bf16 %v7651_v10 }
  0xa2   : > { %v421_v13 = vrot.slane %v419_v11, 7 }
  0xa3   : > { %v7653_v12 = vpop.trf.xlu0 }
  0xa4   : > { %v424_v16 = vor.u32 %v422_v14, %v421_v13  ;;  %v581_v17 = vsel %vm7655_vm2, %v421_v13, 0  ;;  %v7386_v19 = vunpack.i.l.bf16 %v7653_v12 }
  0xa5   : > { %v853_v23 = vrot.slane %v581_v17, 1  ;;  %v614_v30 = vshll.u32 %v581_v17, 16 }
  0xa6   : > { %v7667_v21 = vsel %vm7655_vm2, 0, %v424_v16  ;;  %v403_v25 = vpack.c.bf16 %v7386_v19, %v7381_v18 }
  0xa7   : > { %v7663_v20 = vpop.trf.xlu0  ;;  %930 = vrot.lane.b32.xlu1 %v7667_v21, %s7559_s17  ;;  %v852_v22 = vrot.slane %v7667_v21, 1  ;;  %v609_v24 = vshll.u32 %v7667_v21, 16  ;;  %v607_v28 = vshrl.u32 %v7667_v21, 16  ;;  %v616_v34 = vrot.slane %v614_v30, 1 }
  0xa8   : > { %v426_v31 = vshrl.u32 %v403_v25, 16  ;;  %v429_v39 = vshll.u32 %v403_v25, 16 }
  0xa9   : > { %v854_v27 = vsel %vm849_vm3, %v852_v22, %v853_v23  ;;  %v611_v29 = vrot.slane %v609_v24, 1  ;;  %v7391_v22 = vunpack.i.l.bf16 %v7663_v20 }
  0xaa   : > { %v428_v38 = vrot.slane %v426_v31, 7 }
  0xab   : > { %v7673_v26 = vpop.trf.xlu0  ;;  %899 = vrot.lane.b32.xlu1 %v854_v27, %s7557_s15  ;;  %v612_v33 = vor.u32 %v611_v29, %v607_v28 }
  0xac   : > { %v431_v42 = vor.u32 %v429_v39, %v428_v38  ;;  %v582_v51 = vsel %vm7655_vm2, %v428_v38, 0  ;;  %v7396_v23 = vunpack.i.l.bf16 %v7673_v26 }
  0xad   : > { %v617_v37 = vsel %vm597_vm4, %v612_v33, %v616_v34  ;;  %v856_v58 = vrot.slane %v582_v51, 1  ;;  %v626_v28 = vshll.u32 %v582_v51, 16 }
  0xae   : > { %v7693_v47 = vsel %vm7655_vm2, 0, %v431_v42  ;;  %v404_v39 = vpack.c.bf16 %v7396_v23, %v7391_v22 }
  0xaf   : > { %v7678_v32 = vpop.trf.xlu0  ;;  %1010 = vrot.lane.b32.xlu1 %v854_v27, %s7560_s18  ;;  %v855_v57 = vrot.slane %v7693_v47, 1  ;;  %v621_v13 = vshll.u32 %v7693_v47, 16  ;;  %v619_v25 = vshrl.u32 %v7693_v47, 16 }
  0xb0   : > { %v7401_v35 = vunpack.i.l.bf16 %v7678_v32 }
  0xb1   : > { %v857_v8 = vsel %vm849_vm3, %v855_v57, %v856_v58  ;;  %v623_v27 = vrot.slane %v621_v13, 1 }
  0xb3   : > { %v7682_v36 = vpop.trf.xlu0  ;;  %788 = vrot.lane.b32.xlu1 %v617_v37, %s7558_s16 }
  0xb4   : > { %v7406_v40 = vunpack.i.l.bf16 %v7682_v36 }
  0xb6   : > { %v405_v41 = vpack.c.bf16 %v7406_v40, %v7401_v35  ;;  %v624_v40 = vor.u32 %v623_v27, %v619_v25  ;;  %v7451_v27 = vld [vmem:[%s11066_s1] sm:$0xff]  }
  0xb7   : > { %v7687_v43 = vpop.trf.xlu0  ;;  %974 = vrot.lane.b32.xlu1 %v617_v37, %s7561_s19  ;;  %7178 = vmatprep.subr.bf16.mxu0 %v7451_v27 }
  0xb8   : > { %v443_v44 = vshll.u32 %v405_v41, 16  ;;  %v440_v45 = vshrl.u32 %v405_v41, 16  ;;  %v7411_v46 = vunpack.i.l.bf16 %v7687_v43  ;;  %v628_v41 = vrot.slane %v626_v28, 1  ;;  %7179 = vmatpush3.bf16.msra.mxu0 %v7451_v27 }
  0xba   : > { %v442_v48 = vrot.slane %v440_v45, 7  ;;  %v629_v51 = vsel %vm597_vm4, %v624_v40, %v628_v41 }
  0xbb   : > { %v7695_v49 = vpop.trf.xlu0  ;;  %932 = vrot.lane.b32.xlu1 %v7693_v47, %s7559_s17 }
  0xbc   : > { %v7416_v50 = vunpack.i.l.bf16 %v7695_v49  ;;  %v445_v52 = vor.u32 %v443_v44, %v442_v48  ;;  %v584_v53 = vsel %vm7655_vm2, %v442_v48, 0 }
  0xbd   : > { %v862_v54 = vrot.slane %v584_v53, 1  ;;  %v650_v62 = vshll.u32 %v584_v53, 16 }
  0xbe   : > { %v406_v55 = vpack.c.bf16 %v7416_v50, %v7411_v46  ;;  %v7706_v56 = vsel %vm7655_vm2, 0, %v445_v52  ;;  %v433_v50 = vshrl.u32 %v404_v39, 16 }
  0xbf   : > { %v7709_v59 = vpop.trf.xlu0  ;;  %1042 = vrot.lane.b32.xlu1 %v7693_v47, %s7562_s20  ;;  %v861_v60 = vrot.slane %v7706_v56, 1  ;;  %v643_v63 = vshrl.u32 %v7706_v56, 16  ;;  %v645_v0 = vshll.u32 %v7706_v56, 16  ;;  %v652_v16 = vrot.slane %v650_v62, 1 }
  0xc0   : > { %v447_v61 = vshrl.u32 %v406_v55, 16  ;;  %v7421_v2 = vunpack.i.l.bf16 %v7709_v59  ;;  %v450_v14 = vshll.u32 %v406_v55, 16  ;;  %v435_v62 = vrot.slane %v433_v50, 7 }
  0xc1   : > { %v7717_v1 = vsel %vm849_vm3, %v861_v60, %v862_v54  ;;  %v647_v9 = vrot.slane %v645_v0, 1 }
  0xc2   : > { %v449_v7 = vrot.slane %v447_v61, 7  ;;  %1110 = vrot.lane.b32.xlu0 %v7717_v1, %s7563_s21  ;;  %v583_v25 = vsel %vm7655_vm2, %v435_v62, 0 }
  0xc3   : > { %v7723_v11 = vpop.trf.xlu0  ;;  %1012 = vrot.lane.b32.xlu1 %v857_v8, %s7560_s18  ;;  %v648_v18 = vor.u32 %v647_v9, %v643_v63  ;;  %v436_v63 = vshll.u32 %v404_v39, 16 }
  0xc4   : > { %v7426_v17 = vunpack.i.l.bf16 %v7723_v11  ;;  %v452_v19 = vor.u32 %v450_v14, %v449_v7  ;;  %v585_v35 = vsel %vm7655_vm2, %v449_v7, 0 }
  0xc5   : > { %v7741_v31 = vsel %vm597_vm4, %v648_v18, %v652_v16  ;;  %v662_v46 = vshll.u32 %v585_v35, 16  ;;  %v865_v61 = vrot.slane %v585_v35, 1  ;;  %v438_v13 = vor.u32 %v436_v63, %v435_v62 }
  0xc6   : > { %v407_v24 = vpack.c.bf16 %v7426_v17, %v7421_v2  ;;  %905 = vrot.lane.b32.xlu0 %v7717_v1, %s7557_s15  ;;  %v7735_v29 = vsel %vm7655_vm2, 0, %v452_v19 }
  0xc7   : > { %v7737_v30 = vpop.trf.xlu0  ;;  %1106 = vrot.lane.b32.xlu1 %v857_v8, %s7563_s21  ;;  %v657_v34 = vshll.u32 %v7735_v29, 16  ;;  %v655_v44 = vshrl.u32 %v7735_v29, 16  ;;  %v664_v54 = vrot.slane %v662_v46, 1  ;;  %v864_v60 = vrot.slane %v7735_v29, 1 }
  0xc8   : > { %v454_v33 = vshrl.u32 %v407_v24, 16  ;;  %v457_v37 = vshll.u32 %v407_v24, 16  ;;  %v7431_v57 = vunpack.i.l.bf16 %v7737_v30  ;;  %v7787_v22 = vsel %vm7655_vm2, 0, %v438_v13 }
  0xc9   : > { %v659_v45 = vrot.slane %v657_v34, 1  ;;  %v7780_v14 = vsel %vm849_vm3, %v864_v60, %v865_v61  ;;  %v7452_v61 = vld [vmem:[%s11066_s1 + $0x8] sm:$0x3f]  }
  0xca   : > { %v456_v38 = vrot.slane %v454_v33, 7  ;;  %1078 = vrot.lane.b32.xlu0 %v7741_v31, %s7564_s22 }
  0xcb   : > { %v7748_v42 = vpop.trf.xlu0  ;;  %901 = vrot.lane.b32.xlu1 %v857_v8, %s7557_s15  ;;  %v660_v53 = vor.u32 %v659_v45, %v655_v44 }
  0xcc   : > { %v459_v48 = vor.u32 %v457_v37, %v456_v38  ;;  %v7436_v58 = vunpack.i.l.bf16 %v7748_v42  ;;  %v586_v8 = vsel %vm7655_vm2, %v456_v38, 0  ;;  %v858_v37 = vrot.slane %v7787_v22, 1 }
  0xcd   : > { %v7771_v2 = vsel %vm597_vm4, %v660_v53, %v664_v54  ;;  %v674_v18 = vshll.u32 %v586_v8, 16  ;;  %v859_v38 = vrot.slane %v583_v25, 1  ;;  %v868_v41 = vrot.slane %v586_v8, 1 }
  0xce   : > { %794 = vrot.lane.b32.xlu0 %v7741_v31, %s7558_s16  ;;  %v7760_v55 = vsel %vm7655_vm2, 0, %v459_v48  ;;  %v408_v9 = vpack.c.bf16 %v7436_v58, %v7431_v57  ;;  %v633_v48 = vshll.u32 %v7787_v22, 16  ;;  %v631_v54 = vshrl.u32 %v7787_v22, 16 }
  0xcf   : > { %v7755_v52 = vpop.trf.xlu0  ;;  %976 = vrot.lane.b32.xlu1 %v629_v51, %s7561_s19  ;;  %v669_v7 = vshll.u32 %v7760_v55, 16  ;;  %v667_v16 = vshrl.u32 %v7760_v55, 16  ;;  %v676_v24 = vrot.slane %v674_v18, 1  ;;  %v867_v40 = vrot.slane %v7760_v55, 1 }
  0xd0   : > { %v461_v19 = vshrl.u32 %v408_v9, 16  ;;  %v7441_v28 = vunpack.i.l.bf16 %v7755_v52  ;;  %v464_v35 = vshll.u32 %v408_v9, 16  ;;  %v860_v46 = vsel %vm849_vm3, %v858_v37, %v859_v38 }
  0xd1   : > { %v671_v17 = vrot.slane %v669_v7, 1  ;;  %v7813_v50 = vsel %vm849_vm3, %v867_v40, %v868_v41  ;;  %v635_v57 = vrot.slane %v633_v48, 1  ;;  %v638_v58 = vshll.u32 %v583_v25, 16 }
  0xd2   : > { %938 = vrot.lane.b32.xlu0 %v7735_v29, %s7559_s17  ;;  %v463_v34 = vrot.slane %v461_v19, 7  ;;  %v7565_v8 = vmov 65535  }
  0xd3   : > { %v7767_v0 = vpop.trf.xlu0  ;;  %1074 = vrot.lane.b32.xlu1 %v629_v51, %s7564_s22  ;;  %v672_v23 = vor.u32 %v671_v17, %v667_v16  ;;  %v1459_v9 = vsel %vm1457_vm5, 4294967295, %v7565_v8  ;;  %v636_v13 = vor.u32 %v635_v57, %v631_v54  ;;  %v640_v16 = vrot.slane %v638_v58, 1 }
  0xd4   : > { %v7446_v33 = vunpack.i.l.bf16 %v7767_v0  ;;  %v466_v45 = vor.u32 %v464_v35, %v463_v34  ;;  %v587_v62 = vsel %vm7655_vm2, %v463_v34, 0  ;;  %v1460_v17 = vsel %vm1458_vm6, %v1459_v9, 0  ;;  %vm9444_vm6 = vmneg %vm2346_vm1 }
  0xd5   : > { %v7804_v39 = vsel %vm597_vm4, %v672_v23, %v676_v24  ;;  %v686_v23 = vshll.u32 %v587_v62, 16  ;;  %v1462_v24 = vand.u32 %v7452_v61, %v1460_v17  ;;  %v641_v27 = vsel %vm597_vm4, %v636_v13, %v640_v16 }
  0xd6   : > { %982 = vrot.lane.b32.xlu0 %v7771_v2, %s7561_s19  ;;  %v409_v44 = vpack.c.bf16 %v7446_v33, %v7441_v28  ;;  %v7817_v53 = vsel %vm7655_vm2, 0, %v466_v45  ;;  %v7379_v35 = vunpack.i.h.bf16 %v7647_v6  ;;  %v871_v40 = vrot.slane %v587_v62, 1 }
  0xd7   : > { %790 = vrot.lane.b32.xlu1 %v629_v51, %s7558_s16  ;;  %v681_v60 = vshll.u32 %v7817_v53, 16  ;;  %v679_v18 = vshrl.u32 %v7817_v53, 16  ;;  %7180 = vmatprep.subr.bf16.mxu0 %v1462_v24  ;;  %v688_v33 = vrot.slane %v686_v23, 1  ;;  %v870_v38 = vrot.slane %v7817_v53, 1 }
  0xd8   : > { %v468_v51 = vshrl.u32 %v409_v44, 16  ;;  %v471_v7 = vshll.u32 %v409_v44, 16  ;;  %7181 = vmatpush3.bf16.msra.mxu0 %v1462_v24  ;;  %v7374_v44 = vunpack.i.h.bf16 %v7645_v5  ;;  %v7389_v61 = vunpack.i.h.bf16 %v7653_v12 }
  0xd9   : > { %v683_v19 = vrot.slane %v681_v60, 1  ;;  %v7857_v6 = vsel %vm849_vm3, %v870_v38, %v871_v40  ;;  %v7384_v60 = vunpack.i.h.bf16 %v7651_v10  ;;  %v7911_v40 = vpop.permute.xlu1 %897  ;;  %vm2379_vm5 = vcmask 785408  }
  0xda   : > { %1018 = vrot.lane.b32.xlu0 %v7780_v14, %s7560_s18  ;;  %v470_v63 = vrot.slane %v468_v51, 7 }
  0xdb   : > { %1044 = vrot.lane.b32.xlu1 %v7787_v22, %s7562_s20  ;;  %v684_v28 = vor.u32 %v683_v19, %v679_v18  ;;  %v411_v13 = vpack.c.bf16 %v7389_v61, %v7384_v60 }
  0xdc   : > { %v473_v25 = vor.u32 %v471_v7, %v470_v63  ;;  %v588_v45 = vsel %vm7655_vm2, %v470_v63, 0 }
  0xdd   : > { %v7846_v37 = vsel %vm597_vm4, %v684_v28, %v688_v33  ;;  %v698_v54 = vshll.u32 %v588_v45, 16  ;;  %v874_v8 = vrot.slane %v588_v45, 1  ;;  %v482_v16 = vshrl.u32 %v411_v13, 16 }
  0xde   : > { %1050 = vrot.lane.b32.xlu0 %v7760_v55, %s7562_s20  ;;  %v7839_v34 = vsel %vm7655_vm2, 0, %v473_v25  ;;  %v485_v19 = vshll.u32 %v411_v13, 16  ;;  %v7394_v33 = vunpack.i.h.bf16 %v7663_v20 }
  0xdf   : > { %934 = vrot.lane.b32.xlu1 %v7787_v22, %s7559_s17  ;;  %v693_v41 = vshll.u32 %v7839_v34, 16  ;;  %v691_v48 = vshrl.u32 %v7839_v34, 16  ;;  %v700_v58 = vrot.slane %v698_v54, 1  ;;  %v873_v7 = vrot.slane %v7839_v34, 1 }
  0xe1   : > { %v695_v51 = vrot.slane %v693_v41, 1  ;;  %v7879_v12 = vsel %vm849_vm3, %v873_v7, %v874_v8  ;;  %v7404_v7 = vunpack.i.h.bf16 %v7678_v32  ;;  %v7409_v8 = vunpack.i.h.bf16 %v7682_v36 }
  0xe2   : > { %1082 = vrot.lane.b32.xlu0 %v7804_v39, %s7564_s22 }
  0xe3   : > { %1108 = vrot.lane.b32.xlu1 %v860_v46, %s7563_s21  ;;  %v696_v5 = vor.u32 %v695_v51, %v691_v48 }
  0xe5   : > { %v7871_v63 = vsel %vm597_vm4, %v696_v5, %v700_v58 }
  0xe6   : > { %1114 = vrot.lane.b32.xlu0 %v7813_v50, %s7563_s21 }
  0xe7   : > { %903 = vrot.lane.b32.xlu1 %v860_v46, %s7557_s15 }
  0xea   : > { %798 = vrot.lane.b32.xlu0 %v7804_v39, %s7558_s16 }
  0xeb   : > { %1014 = vrot.lane.b32.xlu1 %v860_v46, %s7560_s18  ;;  %v410_v46 = vpack.c.bf16 %v7379_v35, %v7374_v44  ;;  %v7399_v35 = vunpack.i.h.bf16 %v7673_v26 }
  0xed   : > { %v475_v57 = vshrl.u32 %v410_v46, 16  ;;  %v478_v9 = vshll.u32 %v410_v46, 16  ;;  %v412_v45 = vpack.c.bf16 %v7399_v35, %v7394_v33 }
  0xee   : > { %909 = vrot.lane.b32.xlu0 %v7813_v50, %s7557_s15 }
  0xef   : > { %1076 = vrot.lane.b32.xlu1 %v641_v27, %s7564_s22  ;;  %v477_v62 = vrot.slane %v475_v57, 7  ;;  %v489_v58 = vshrl.u32 %v412_v45, 16  ;;  %v492_v13 = vshll.u32 %v412_v45, 16 }
  0xf1   : > { %v480_v10 = vor.u32 %v478_v9, %v477_v62  ;;  %v589_v23 = vsel %vm7655_vm2, %v477_v62, 0  ;;  %v491_v9 = vrot.slane %v489_v58, 7 }
  0xf2   : > { %942 = vrot.lane.b32.xlu0 %v7817_v53, %s7559_s17 }
  0xf3   : > { %792 = vrot.lane.b32.xlu1 %v641_v27, %s7558_s16  ;;  %v7885_v17 = vsel %vm7655_vm2, 0, %v480_v10  ;;  %v494_v32 = vor.u32 %v492_v13, %v491_v9 }
  0xf4   : > { %v705_v18 = vshll.u32 %v7885_v17, 16  ;;  %v876_v20 = vrot.slane %v7885_v17, 1 }
  0xf6   : > { %986 = vrot.lane.b32.xlu0 %v7846_v37, %s7561_s19  ;;  %v707_v24 = vrot.slane %v705_v18, 1 }
  0xf7   : > { %978 = vrot.lane.b32.xlu1 %v641_v27, %s7561_s19  ;;  %v710_v27 = vshll.u32 %v589_v23, 16 }
  0xf9   : > { %v712_v41 = vrot.slane %v710_v27, 1 }
  0xfa   : > { %1022 = vrot.lane.b32.xlu0 %v7857_v6, %s7560_s18 }
  0xfb   : > { %936 = vrot.lane.b32.xlu1 %v7706_v56, %s7559_s17 }
  0xfe   : > { %1054 = vrot.lane.b32.xlu0 %v7839_v34, %s7562_s20 }
  0xff   : > { %1046 = vrot.lane.b32.xlu1 %v7706_v56, %s7562_s20 }
 0x102   : > { %1086 = vrot.lane.b32.xlu0 %v7871_v63, %s7564_s22 }
 0x103   : > { %1016 = vrot.lane.b32.xlu1 %v7717_v1, %s7560_s18  ;;  %v484_v1 = vrot.slane %v482_v16, 7 }
 0x105   : > { %v487_v25 = vor.u32 %v485_v19, %v484_v1  ;;  %v590_v46 = vsel %vm7655_vm2, %v484_v1, 0  ;;  %v413_v1 = vpack.c.bf16 %v7409_v8, %v7404_v7 }
 0x106   : > { %1118 = vrot.lane.b32.xlu0 %v7879_v12, %s7563_s21  ;;  %v722_v5 = vshll.u32 %v590_v46, 16  ;;  %v880_v18 = vrot.slane %v590_v46, 1 }
 0x107   : > { %980 = vrot.lane.b32.xlu1 %v7741_v31, %s7561_s19  ;;  %v703_v31 = vshrl.u32 %v7885_v17, 16  ;;  %v7907_v38 = vsel %vm7655_vm2, 0, %v487_v25 }
 0x108   : > { %v717_v26 = vshll.u32 %v7907_v38, 16  ;;  %v715_v54 = vshrl.u32 %v7907_v38, 16  ;;  %v724_v62 = vrot.slane %v722_v5, 1  ;;  %v879_v16 = vrot.slane %v7907_v38, 1 }
 0x109   : > { %v708_v28 = vor.u32 %v707_v24, %v703_v31  ;;  %v7961_v24 = vsel %vm7655_vm2, 0, %v494_v32 }
 0x10a   : > { %802 = vrot.lane.b32.xlu0 %v7871_v63, %s7558_s16  ;;  %v719_v57 = vrot.slane %v717_v26, 1  ;;  %v7955_v19 = vsel %vm849_vm3, %v879_v16, %v880_v18  ;;  %v729_v31 = vshll.u32 %v7961_v24, 16  ;;  %v727_v35 = vshrl.u32 %v7961_v24, 16  ;;  %v787_v26 = vpop.permute.xlu0 %786 }
 0x10b   : > { %1048 = vrot.lane.b32.xlu1 %v7735_v29, %s7562_s20  ;;  %v7914_v44 = vsel %vm597_vm4, %v708_v28, %v712_v41  ;;  %v499_v28 = vshll.u32 %v413_v1, 16 }
 0x10c   : > { %v720_v61 = vor.u32 %v719_v57, %v715_v54  ;;  %v731_v41 = vrot.slane %v729_v31, 1  ;;  %v7414_v54 = vunpack.i.h.bf16 %v7687_v43  ;;  %v7419_v57 = vunpack.i.h.bf16 %v7695_v49 }
 0x10d   : > { %v882_v43 = vrot.slane %v7961_v24, 1 }
 0x10e   : > { %913 = vrot.lane.b32.xlu0 %v7879_v12, %s7557_s15  ;;  %v732_v46 = vor.u32 %v731_v41, %v727_v35  ;;  %v414_v8 = vpack.c.bf16 %v7419_v57, %v7414_v54 }
 0x10f   : > { %1112 = vrot.lane.b32.xlu1 %v7780_v14, %s7563_s21 }
 0x110   : > { %v503_v31 = vshrl.u32 %v414_v8, 16 }
 0x112   : > { %946 = vrot.lane.b32.xlu0 %v7885_v17, %s7559_s17 }
 0x113   : > { %907 = vrot.lane.b32.xlu1 %v7780_v14, %s7557_s15  ;;  %v877_v14 = vrot.slane %v589_v23, 1  ;;  %v496_v23 = vshrl.u32 %v413_v1, 16 }
 0x115   : > { %v7927_v51 = vsel %vm849_vm3, %v876_v20, %v877_v14  ;;  %v498_v27 = vrot.slane %v496_v23, 7 }
 0x116   : > { %990 = vrot.lane.b32.xlu0 %v7914_v44, %s7561_s19 }
 0x117   : > { %1080 = vrot.lane.b32.xlu1 %v7771_v2, %s7564_s22  ;;  %v501_v20 = vor.u32 %v499_v28, %v498_v27 }
 0x119   : > { %v7924_v48 = vpop.permute.xlu1 %930  ;;  %v7985_v5 = vsel %vm7655_vm2, 0, %v501_v20  ;;  %v505_v20 = vrot.slane %v503_v31, 7 }
 0x11a   : > { %1026 = vrot.lane.b32.xlu0 %v7927_v51, %s7560_s18  ;;  %v741_v7 = vshll.u32 %v7985_v5, 16  ;;  %v739_v1 = vshrl.u32 %v7985_v5, 16  ;;  %v885_v57 = vrot.slane %v7985_v5, 1 }
 0x11b   : > { %796 = vrot.lane.b32.xlu1 %v7771_v2, %s7558_s16  ;;  %v7945_v2 = vsel %vm597_vm4, %v720_v61, %v724_v62 }
 0x11c   : > { %v743_v32 = vrot.slane %v741_v7, 1 }
 0x11d   : > { %v7934_v60 = vpop.permute.xlu1 %899 }
 0x11e   : > { %1058 = vrot.lane.b32.xlu0 %v7907_v38, %s7562_s20  ;;  %v744_v35 = vor.u32 %v743_v32, %v739_v1 }
 0x11f   : > { %940 = vrot.lane.b32.xlu1 %v7760_v55, %s7559_s17 }
 0x121   : > { %v7942_v10 = vpop.permute.xlu1 %1010 }
 0x122   : > { %1090 = vrot.lane.b32.xlu0 %v7945_v2, %s7564_s22 }
 0x123   : > { %1020 = vrot.lane.b32.xlu1 %v7813_v50, %s7560_s18  ;;  %v591_v50 = vsel %vm7655_vm2, %v491_v9, 0  ;;  %v592_v9 = vsel %vm7655_vm2, %v498_v27, 0  ;;  %v7424_v27 = vunpack.i.h.bf16 %v7709_v59 }
 0x124   : > { %v883_v49 = vrot.slane %v591_v50, 1  ;;  %v746_v23 = vshll.u32 %v592_v9, 16 }
 0x125   : > { %v7952_v36 = vpop.permute.xlu1 %788 }
 0x126   : > { %1122 = vrot.lane.b32.xlu0 %v7955_v19, %s7563_s21  ;;  %v8007_v18 = vsel %vm849_vm3, %v882_v43, %v883_v49  ;;  %v748_v41 = vrot.slane %v746_v23, 1  ;;  %v886_v43 = vrot.slane %v592_v9, 1 }
 0x127   : > { %984 = vrot.lane.b32.xlu1 %v7804_v39, %s7561_s19  ;;  %v734_v39 = vshll.u32 %v591_v50, 16 }
 0x128   : > { %v8035_v54 = vsel %vm597_vm4, %v744_v35, %v748_v41  ;;  %v8048_v9 = vsel %vm849_vm3, %v885_v57, %v886_v43  ;;  %v7434_v43 = vunpack.i.h.bf16 %v7737_v30 }
 0x129   : > { %v975_v25 = vpop.permute.xlu1 %974  ;;  %v736_v14 = vrot.slane %v734_v39, 1  ;;  %v7429_v39 = vunpack.i.h.bf16 %v7723_v11 }
 0x12a   : > { %806 = vrot.lane.b32.xlu0 %v7945_v2, %s7558_s16 }
 0x12b   : > { %1052 = vrot.lane.b32.xlu1 %v7817_v53, %s7562_s20  ;;  %v7994_v62 = vsel %vm597_vm4, %v732_v46, %v736_v14 }
 0x12d   : > { %v7972_v33 = vpop.permute.xlu1 %932 }
 0x12e   : > { %917 = vrot.lane.b32.xlu0 %v7955_v19, %s7557_s15 }
 0x12f   : > { %1116 = vrot.lane.b32.xlu1 %v7857_v6, %s7563_s21 }
 0x131   : > { %v1043_v45 = vpop.permute.xlu1 %1042 }
 0x132   : > { %950 = vrot.lane.b32.xlu0 %v7961_v24, %s7559_s17 }
 0x133   : > { %1084 = vrot.lane.b32.xlu1 %v7846_v37, %s7564_s22 }
 0x134   : > { %v7989_v58 = vpop.permute.xlu0 %1110 }
 0x135   : > { %v7991_v61 = vpop.permute.xlu1 %1012 }
 0x136   : > { %994 = vrot.lane.b32.xlu0 %v7994_v62, %s7561_s19 }
 0x137   : > { %800 = vrot.lane.b32.xlu1 %v7846_v37, %s7558_s16  ;;  %v1140_v37 = vsel %vm1138_vm7, 0, %v787_v26 }
 0x138   : > { %v8004_v13 = vpop.permute.xlu0 %905  ;;  %v1173_v26 = vsel %vm1171_vm8, %v1140_v37, %v7911_v40  ;;  %v415_v40 = vpack.c.bf16 %v7429_v39, %v7424_v27  ;;  %v593_v37 = vsel %vm7655_vm2, %v505_v20, 0 }
 0x139   : > { %v1107_v16 = vpop.permute.xlu1 %1106  ;;  %v1206_v59 = vsel %vm1204_vm9, %v1173_v26, %v7924_v48 }
 0x13a   : > { %1030 = vrot.lane.b32.xlu0 %v8007_v18, %s7560_s18  ;;  %v1239_v11 = vsel %vm1237_vm10, %v1206_v59, %v975_v25  ;;  %v510_v1 = vshrl.u32 %v415_v40, 16  ;;  %v513_v35 = vshll.u32 %v415_v40, 16  ;;  %v7439_v40 = vunpack.i.h.bf16 %v7748_v42 }
 0x13b   : > { %911 = vrot.lane.b32.xlu1 %v7857_v6, %s7557_s15  ;;  %v506_v6 = vshll.u32 %v414_v8, 16  ;;  %v1272_v48 = vsel %vm1270_vm11, %v1239_v11, %v7942_v10 }
 0x13c   : > { %v8015_v50 = vpop.permute.xlu0 %1078  ;;  %v1305_v7 = vsel %vm1303_vm12, %v1272_v48, %v1043_v45  ;;  %v512_v27 = vrot.slane %v510_v1, 7  ;;  %v889_v1 = vrot.slane %v593_v37, 1 }
 0x13d   : > { %v8018_v28 = vpop.permute.xlu1 %901  ;;  %v508_v49 = vor.u32 %v506_v6, %v505_v20  ;;  %v758_v6 = vshll.u32 %v593_v37, 16 }
 0x13e   : > { %1062 = vrot.lane.b32.xlu0 %v7985_v5, %s7562_s20  ;;  %v515_v26 = vor.u32 %v513_v35, %v512_v27 }
 0x13f   : > { %944 = vrot.lane.b32.xlu1 %v7839_v34, %s7559_s17  ;;  %v760_v57 = vrot.slane %v758_v6, 1 }
 0x140   : > { %v8029_v46 = vpop.permute.xlu0 %794 }
 0x141   : > { %v8032_v14 = vpop.permute.xlu1 %976 }
 0x142   : > { %1094 = vrot.lane.b32.xlu0 %v8035_v54, %s7564_s22 }
 0x143   : > { %988 = vrot.lane.b32.xlu1 %v7871_v63, %s7561_s19  ;;  %v8055_v63 = vsel %vm7655_vm2, 0, %v508_v49  ;;  %v8089_v49 = vsel %vm7655_vm2, 0, %v515_v26 }
 0x144   : > { %v8044_v25 = vpop.permute.xlu0 %938  ;;  %v753_v31 = vshll.u32 %v8055_v63, 16  ;;  %v751_v41 = vshrl.u32 %v8055_v63, 16  ;;  %v888_v30 = vrot.slane %v8055_v63, 1  ;;  %v765_v42 = vshll.u32 %v8089_v49, 16 }
 0x145   : > { %v1075_v8 = vpop.permute.xlu1 %1074 }
 0x146   : > { %v1338_v32 = vsel %vm1336_vm13, %v1305_v7, %v1075_v8  ;;  %1126 = vrot.lane.b32.xlu0 %v8048_v9, %s7563_s21  ;;  %v755_v39 = vrot.slane %v753_v31, 1  ;;  %v1142_v31 = vsel %vm1138_vm7, %v7667_v21, %v7952_v36  ;;  %v8114_v37 = vsel %vm849_vm3, %v888_v30, %v889_v1 }
 0x147   : > { %1024 = vrot.lane.b32.xlu1 %v7879_v12, %s7560_s18  ;;  %v1371_v10 = vsel %vm1369_vm14, %v1338_v32, %v1107_v16  ;;  %v416_v32 = vpack.c.bf16 %v7439_v40, %v7434_v43  ;;  %v767_v6 = vrot.slane %v765_v42, 1  ;;  %v7444_v30 = vunpack.i.h.bf16 %v7755_v52 }
 0x148   : > { %v8060_v45 = vpop.permute.xlu0 %982  ;;  %7182 = vmatprep.mubr.msk.bf16.mxu0 %vm1424_vm15, %v1371_v10  ;;  %v756_v11 = vor.u32 %v755_v39, %v751_v41  ;;  %v594_v10 = vsel %vm7655_vm2, %v512_v27, 0  ;;  %v763_v39 = vshrl.u32 %v8089_v49, 16  ;;  %v7449_v1 = vunpack.i.h.bf16 %v7767_v0 }
 0x149   : > { %v8063_v23 = vpop.permute.xlu1 %790  ;;  %v770_v26 = vshll.u32 %v594_v10, 16  ;;  %v891_v0 = vrot.slane %v8089_v49, 1 }
 0x14a   : > { %810 = vrot.lane.b32.xlu0 %v8035_v54, %s7558_s16  ;;  %v8096_v8 = vsel %vm597_vm4, %v756_v11, %v760_v57  ;;  %v517_v11 = vshrl.u32 %v416_v32, 16  ;;  %v768_v43 = vor.u32 %v767_v6, %v763_v39  ;;  %v892_v39 = vrot.slane %v594_v10, 1 }
 0x14b   : > { %1056 = vrot.lane.b32.xlu1 %v7885_v17, %s7562_s20  ;;  %v772_v40 = vrot.slane %v770_v26, 1  ;;  %v417_v6 = vpack.c.bf16 %v7449_v1, %v7444_v30 }
 0x14c   : > { %v8072_v12 = vpop.permute.xlu0 %1018 }
 0x14d   : > { %v1045_v16 = vpop.permute.xlu1 %1044  ;;  %v8141_v52 = vsel %vm597_vm4, %v768_v43, %v772_v40  ;;  %v527_v1 = vshll.u32 %v417_v6, 16 }
 0x14e   : > { %921 = vrot.lane.b32.xlu0 %v8048_v9, %s7557_s15 }
 0x14f   : > { %1088 = vrot.lane.b32.xlu1 %v7914_v44, %s7564_s22 }
 0x150   : > { %v8079_v20 = vpop.permute.xlu0 %1050 }
 0x151   : > { %v8081_v59 = vpop.permute.xlu1 %934 }
 0x152   : > { %954 = vrot.lane.b32.xlu0 %v8055_v63, %s7559_s17 }
 0x153   : > { %1120 = vrot.lane.b32.xlu1 %v7927_v51, %s7563_s21 }
 0x154   : > { %v8093_v48 = vpop.permute.xlu0 %1082 }
 0x155   : > { %v1109_v7 = vpop.permute.xlu1 %1108 }
 0x156   : > { %998 = vrot.lane.b32.xlu0 %v8096_v8, %s7561_s19 }
 0x157   : > { %804 = vrot.lane.b32.xlu1 %v7914_v44, %s7558_s16  ;;  %v1175_v44 = vsel %vm1171_vm8, %v1142_v31, %v7934_v60  ;;  %v519_v60 = vrot.slane %v517_v11, 7 }
 0x158   : > { %v8109_v35 = vpop.permute.xlu0 %1114  ;;  %v1208_v21 = vsel %vm1204_vm9, %v1175_v44, %v7972_v33  ;;  %v8154_v44 = vsel %vm849_vm3, %v891_v0, %v892_v39 }
 0x159   : > { %v8111_v41 = vpop.permute.xlu1 %903  ;;  %v1241_v27 = vsel %vm1237_vm10, %v1208_v21, %v8032_v14  ;;  %v524_v21 = vshrl.u32 %v417_v6, 16  ;;  %v595_v40 = vsel %vm7655_vm2, %v519_v60, 0 }
 0x15a   : > { %1034 = vrot.lane.b32.xlu0 %v8114_v37, %s7560_s18  ;;  %v1274_v33 = vsel %vm1270_vm11, %v1241_v27, %v7991_v61 }
 0x15b   : > { %915 = vrot.lane.b32.xlu1 %v7927_v51, %s7557_s15  ;;  %v520_v51 = vshll.u32 %v416_v32, 16  ;;  %v1307_v14 = vsel %vm1303_vm12, %v1274_v33, %v1045_v16  ;;  %v526_v30 = vrot.slane %v524_v21, 7 }
 0x15c   : > { %v8125_v36 = vpop.permute.xlu0 %798 }
 0x15d   : > { %v1015_v57 = vpop.permute.xlu1 %1014  ;;  %v522_v26 = vor.u32 %v520_v51, %v519_v60  ;;  %v529_v0 = vor.u32 %v527_v1, %v526_v30 }
 0x15e   : > { %1066 = vrot.lane.b32.xlu0 %v8089_v49, %s7562_s20 }
 0x15f   : > { %948 = vrot.lane.b32.xlu1 %v7907_v38, %s7559_s17  ;;  %v8160_v10 = vsel %vm7655_vm2, 0, %v522_v26 }
 0x160   : > { %v8137_v42 = vpop.permute.xlu0 %909  ;;  %v777_v43 = vshll.u32 %v8160_v10, 16  ;;  %v775_v33 = vshrl.u32 %v8160_v10, 16  ;;  %v894_v1 = vrot.slane %v8160_v10, 1 }
 0x161   : > { %v1077_v31 = vpop.permute.xlu1 %1076 }
 0x162   : > { %v1340_v32 = vsel %vm1336_vm13, %v1307_v14, %v1077_v31  ;;  %1098 = vrot.lane.b32.xlu0 %v8141_v52, %s7564_s22  ;;  %v779_v14 = vrot.slane %v777_v43, 1  ;;  %v782_v31 = vshll.u32 %v595_v40, 16 }
 0x163   : > { %992 = vrot.lane.b32.xlu1 %v7945_v2, %s7561_s19  ;;  %v1373_v61 = vsel %vm1369_vm14, %v1340_v32, %v1109_v7  ;;  %v1144_v7 = vsel %vm1138_vm7, %v7693_v47, %v8063_v23 }
 0x164   : > { %v8150_v16 = vpop.permute.xlu0 %942  ;;  %7183 = vmatmul.mubr.msk.bf16.vlgmr.msra.gmra.mrb[0].mxu0 %vm1424_vm15, %v1373_v61  ;;  %v784_v32 = vrot.slane %v782_v31, 1  ;;  %v8196_v61 = vsel %vm7655_vm2, 0, %v529_v0 }
 0x165   : > { %v793_v11 = vpop.permute.xlu1 %792  ;;  %v963_v31 = vshrl.u32 %v8196_v61, 16 }
 0x166   : > { %1130 = vrot.lane.b32.xlu0 %v8154_v44, %s7563_s21 }
 0x167   : > { %1028 = vrot.lane.b32.xlu1 %v7955_v19, %s7560_s18  ;;  %v1177_v19 = vsel %vm1171_vm8, %v1144_v7, %v8018_v28 }
 0x168   : > { %v8164_v2 = vpop.permute.xlu0 %986  ;;  %v1210_v47 = vsel %vm1204_vm9, %v1177_v19, %v8081_v59  ;;  %v780_v59 = vor.u32 %v779_v14, %v775_v33  ;;  %v895_v19 = vrot.slane %v595_v40, 1 }
 0x169   : > { %v979_v27 = vpop.permute.xlu1 %978 }
 0x16a   : > { %814 = vrot.lane.b32.xlu0 %v8141_v52, %s7558_s16  ;;  %v1243_v60 = vsel %vm1237_vm10, %v1210_v47, %v979_v27  ;;  %v8208_v43 = vsel %vm597_vm4, %v780_v59, %v784_v32  ;;  %v965_v47 = vshll.u32 %v8196_v61, 16  ;;  %v8221_v14 = vsel %vm849_vm3, %v894_v1, %v895_v19 }
 0x16b   : > { %1060 = vrot.lane.b32.xlu1 %v7961_v24, %s7562_s20  ;;  %v1276_v39 = vsel %vm1270_vm11, %v1243_v60, %v1015_v57 }
 0x16c   : > { %v8178_v51 = vpop.permute.xlu0 %1022  ;;  %v967_v40 = vrot.slane %v965_v47, 1 }
 0x16d   : > { %v937_v23 = vpop.permute.xlu1 %936 }
 0x16e   : > { %925 = vrot.lane.b32.xlu0 %v8154_v44, %s7557_s15 }
 0x16f   : > { %1092 = vrot.lane.b32.xlu1 %v7994_v62, %s7564_s22 }
 0x170   : > { %v8188_v28 = vpop.permute.xlu0 %1054 }
 0x171   : > { %v1047_v6 = vpop.permute.xlu1 %1046 }
 0x172   : > { %v1309_v26 = vsel %vm1303_vm12, %v1276_v39, %v1047_v6  ;;  %958 = vrot.lane.b32.xlu0 %v8160_v10, %s7559_s17  ;;  %v1146_v6 = vsel %vm1138_vm7, %v7787_v22, %v793_v11 }
 0x173   : > { %v1342_v21 = vsel %vm1336_vm13, %v1309_v26, %v8015_v50  ;;  %1124 = vrot.lane.b32.xlu1 %v8007_v18, %s7563_s21  ;;  %v596_v50 = vsel %vm7655_vm2, %v526_v30, 0  ;;  %v1179_v1 = vsel %vm1171_vm8, %v1146_v6, %v8111_v41 }
 0x174   : > { %v8202_v7 = vpop.permute.xlu0 %1086  ;;  %v1375_v57 = vsel %vm1369_vm14, %v1342_v21, %v7989_v58  ;;  %v970_v60 = vshll.u32 %v596_v50, 16  ;;  %v1008_v21 = vrot.slane %v596_v50, 1  ;;  %v1212_v22 = vsel %vm1204_vm9, %v1179_v1, %v937_v23 }
 0x175   : > { %7186 = vmatprep.mubr.msk.bf16.mxu0 %vm1424_vm15, %v1375_v57  ;;  %v1017_v27 = vpop.permute.xlu1 %1016  ;;  %v1148_v57 = vsel %vm1138_vm7, %v7706_v56, %v8029_v46  ;;  %v1152_v1 = vsel %vm1138_vm7, %v7760_v55, %v8125_v36 }
 0x176   : > { %1002 = vrot.lane.b32.xlu0 %v8208_v43, %s7561_s19  ;;  %v972_v39 = vrot.slane %v970_v60, 1 }
 0x177   : > { %808 = vrot.lane.b32.xlu1 %v7994_v62, %s7558_s16  ;;  %v968_v62 = vor.u32 %v967_v40, %v963_v31  ;;  %v1181_v31 = vsel %vm1171_vm8, %v1148_v57, %v8004_v13 }
 0x178   : > { %v8218_v58 = vpop.permute.xlu0 %1118  ;;  %v1214_v56 = vsel %vm1204_vm9, %v1181_v31, %v8044_v25 }
 0x179   : > { %v981_v33 = vpop.permute.xlu1 %980  ;;  %v8239_v26 = vsel %vm597_vm4, %v968_v62, %v972_v39  ;;  %v1247_v46 = vsel %vm1237_vm10, %v1214_v56, %v8060_v45 }
 0x17a   : > { %1038 = vrot.lane.b32.xlu0 %v8221_v14, %s7560_s18  ;;  %v1245_v19 = vsel %vm1237_vm10, %v1212_v22, %v981_v33  ;;  %v1280_v23 = vsel %vm1270_vm11, %v1247_v46, %v8072_v12 }
 0x17b   : > { %919 = vrot.lane.b32.xlu1 %v8007_v18, %s7557_s15  ;;  %v1007_v18 = vrot.slane %v8196_v61, 1  ;;  %v1313_v40 = vsel %vm1303_vm12, %v1280_v23, %v8079_v20 }
 0x17c   : > { %v8228_v30 = vpop.permute.xlu0 %802 }
 0x17d   : > { %v1049_v0 = vpop.permute.xlu1 %1048  ;;  %v8256_v50 = vsel %vm849_vm3, %v1007_v18, %v1008_v21 }
 0x17e   : > { %1070 = vrot.lane.b32.xlu0 %v8196_v61, %s7562_s20 }
 0x17f   : > { %952 = vrot.lane.b32.xlu1 %v7985_v5, %s7559_s17 }
 0x180   : > { %v8236_v59 = vpop.permute.xlu0 %913 }
 0x181   : > { %v1113_v32 = vpop.permute.xlu1 %1112 }
 0x182   : > { %1102 = vrot.lane.b32.xlu0 %v8239_v26, %s7564_s22 }
 0x183   : > { %996 = vrot.lane.b32.xlu1 %v8035_v54, %s7561_s19  ;;  %v1278_v54 = vsel %vm1270_vm11, %v1245_v19, %v1017_v27 }
 0x184   : > { %v8252_v11 = vpop.permute.xlu0 %946  ;;  %v1311_v13 = vsel %vm1303_vm12, %v1278_v54, %v1049_v0 }
 0x185   : > { %v908_v47 = vpop.permute.xlu1 %907 }
 0x186   : > { %1134 = vrot.lane.b32.xlu0 %v8256_v50, %s7563_s21 }
 0x187   : > { %1032 = vrot.lane.b32.xlu1 %v8048_v9, %s7560_s18  ;;  %v1346_v9 = vsel %vm1336_vm13, %v1313_v40, %v8093_v48 }
 0x188   : > { %v8269_v41 = vpop.permute.xlu0 %990  ;;  %v1379_v27 = vsel %vm1369_vm14, %v1346_v9, %v8109_v35 }
 0x189   : > { %v1081_v33 = vpop.permute.xlu1 %1080 }
 0x18a   : > { %v1344_v25 = vsel %vm1336_vm13, %v1311_v13, %v1081_v33 }
 0x18b   : > { %1064 = vrot.lane.b32.xlu1 %v8055_v63, %s7562_s20  ;;  %v1377_v45 = vsel %vm1369_vm14, %v1344_v25, %v1113_v32 }
 0x18c   : > { %v8284_v12 = vpop.permute.xlu0 %1026  ;;  %7187 = vmatmul.mubr.msk.bf16.gmra.mrb[4].mxu0 %vm1424_vm15, %v1377_v45  ;;  %v1156_v45 = vsel %vm1138_vm7, %v7839_v34, %v8228_v30 }
 0x18d   : > { %7190 = vmatprep.mubr.msk.bf16.mxu0 %vm1424_vm15, %v1379_v27  ;;  %v797_v20 = vpop.permute.xlu1 %796 }
 0x18e   : > { %v1150_v6 = vsel %vm1138_vm7, %v7735_v29, %v797_v20  ;;  %v1185_v29 = vsel %vm1171_vm8, %v1152_v1, %v8137_v42 }
 0x18f   : > { %1096 = vrot.lane.b32.xlu1 %v8096_v8, %s7564_s22  ;;  %v1183_v21 = vsel %vm1171_vm8, %v1150_v6, %v908_v47  ;;  %v1218_v19 = vsel %vm1204_vm9, %v1185_v29, %v8150_v16 }
 0x190   : > { %v8290_v60 = vpop.permute.xlu0 %1058  ;;  %v1251_v47 = vsel %vm1237_vm10, %v1218_v19, %v8164_v2 }
 0x191   : > { %v941_v48 = vpop.permute.xlu1 %940  ;;  %v1284_v55 = vsel %vm1270_vm11, %v1251_v47, %v8178_v51 }
 0x192   : > { %v1216_v57 = vsel %vm1204_vm9, %v1183_v21, %v941_v48  ;;  %v1317_v42 = vsel %vm1303_vm12, %v1284_v55, %v8188_v28 }
 0x193   : > { %1128 = vrot.lane.b32.xlu1 %v8114_v37, %s7563_s21 }
 0x194   : > { %v8294_v0 = vpop.permute.xlu0 %1090 }
 0x195   : > { %v1021_v62 = vpop.permute.xlu1 %1020 }
 0x197   : > { %812 = vrot.lane.b32.xlu1 %v8096_v8, %s7558_s16 }
 0x198   : > { %v8298_v35 = vpop.permute.xlu0 %1122 }
 0x199   : > { %v985_v39 = vpop.permute.xlu1 %984 }
 0x19b   : > { %923 = vrot.lane.b32.xlu1 %v8114_v37, %s7557_s15  ;;  %v1249_v37 = vsel %vm1237_vm10, %v1216_v57, %v985_v39 }
 0x19c   : > { %v8304_v32 = vpop.permute.xlu0 %806  ;;  %v1282_v31 = vsel %vm1270_vm11, %v1249_v37, %v1021_v62 }
 0x19d   : > { %v1053_v18 = vpop.permute.xlu1 %1052  ;;  %v1160_v19 = vsel %vm1138_vm7, %v7907_v38, %v8304_v32 }
 0x19e   : > { %v1315_v36 = vsel %vm1303_vm12, %v1282_v31, %v1053_v18 }
 0x19f   : > { %956 = vrot.lane.b32.xlu1 %v8089_v49, %s7559_s17 }
 0x1a0   : > { %v8310_v8 = vpop.permute.xlu0 %917 }
 0x1a1   : > { %v1117_v22 = vpop.permute.xlu1 %1116  ;;  %v1193_v31 = vsel %vm1171_vm8, %v1160_v19, %v8310_v8 }
 0x1a3   : > { %1000 = vrot.lane.b32.xlu1 %v8141_v52, %s7561_s19  ;;  %v1350_v52 = vsel %vm1336_vm13, %v1317_v42, %v8202_v7 }
 0x1a4   : > { %v8330_v46 = vpop.permute.xlu0 %950  ;;  %v1383_v51 = vsel %vm1369_vm14, %v1350_v52, %v8218_v58 }
 0x1a5   : > { %v1085_v56 = vpop.permute.xlu1 %1084 }
 0x1a6   : > { %v1348_v16 = vsel %vm1336_vm13, %v1315_v36, %v1085_v56  ;;  %v1226_v56 = vsel %vm1204_vm9, %v1193_v31, %v8330_v46 }
 0x1a7   : > { %1036 = vrot.lane.b32.xlu1 %v8154_v44, %s7560_s18  ;;  %v1381_v2 = vsel %vm1369_vm14, %v1348_v16, %v1117_v22 }
 0x1a8   : > { %7191 = vmatmul.mubr.msk.bf16.gmra.mrb[8].mxu0 %vm1424_vm15, %v1381_v2  ;;  %v8344_v54 = vpop.permute.xlu0 %994 }
 0x1a9   : > { %7194 = vmatprep.mubr.msk.bf16.mxu0 %vm1424_vm15, %v1383_v51  ;;  %v801_v28 = vpop.permute.xlu1 %800 }
 0x1aa   : > { %v1154_v9 = vsel %vm1138_vm7, %v7817_v53, %v801_v28 }
 0x1ab   : > { %1068 = vrot.lane.b32.xlu1 %v8160_v10, %s7562_s20 }
 0x1ac   : > { %v1031_v7 = vpop.permute.xlu0 %1030 }
 0x1ad   : > { %v912_v23 = vpop.permute.xlu1 %911 }
 0x1ae   : > { %v1187_v27 = vsel %vm1171_vm8, %v1154_v9, %v912_v23 }
 0x1af   : > { %1100 = vrot.lane.b32.xlu1 %v8208_v43, %s7564_s22 }
 0x1b0   : > { %v1063_v13 = vpop.permute.xlu0 %1062 }
 0x1b1   : > { %v945_v44 = vpop.permute.xlu1 %944 }
 0x1b2   : > { %v1220_v20 = vsel %vm1204_vm9, %v1187_v27, %v945_v44 }
 0x1b3   : > { %1132 = vrot.lane.b32.xlu1 %v8221_v14, %s7563_s21 }
 0x1b4   : > { %v1095_v25 = vpop.permute.xlu0 %1094 }
 0x1b5   : > { %v989_v58 = vpop.permute.xlu1 %988 }
 0x1b6   : > { %v1253_v53 = vsel %vm1237_vm10, %v1220_v20, %v989_v58 }
 0x1b7   : > { %816 = vrot.lane.b32.xlu1 %v8208_v43, %s7558_s16  ;;  %v1189_v43 = vsel %vm1171_vm8, %v1156_v45, %v8236_v59 }
 0x1b8   : > { %v1222_v48 = vsel %vm1204_vm9, %v1189_v43, %v8252_v11  ;;  %v1127_v30 = vpop.permute.xlu0 %1126 }
 0x1b9   : > { %v1025_v33 = vpop.permute.xlu1 %1024 }
 0x1ba   : > { %v1286_v62 = vsel %vm1270_vm11, %v1253_v53, %v1025_v33 }
 0x1bb   : > { %927 = vrot.lane.b32.xlu1 %v8221_v14, %s7557_s15 }
 0x1bd   : > { %v1057_v40 = vpop.permute.xlu1 %1056 }
 0x1be   : > { %v1319_v59 = vsel %vm1303_vm12, %v1286_v62, %v1057_v40 }
 0x1bf   : > { %960 = vrot.lane.b32.xlu1 %v8196_v61, %s7559_s17  ;;  %v1255_v61 = vsel %vm1237_vm10, %v1222_v48, %v8269_v41 }
 0x1c0   : > { %v1288_v34 = vsel %vm1270_vm11, %v1255_v61, %v8284_v12 }
 0x1c1   : > { %v1089_v14 = vpop.permute.xlu1 %1088  ;;  %v1321_v39 = vsel %vm1303_vm12, %v1288_v34, %v8290_v60  ;;  %v811_v60 = vpop.permute.xlu0 %810 }
 0x1c2   : > { %v1352_v11 = vsel %vm1336_vm13, %v1319_v59, %v1089_v14  ;;  %v1354_v41 = vsel %vm1336_vm13, %v1321_v39, %v8294_v0  ;;  %v1164_v43 = vsel %vm1138_vm7, %v7985_v5, %v811_v60 }
 0x1c3   : > { %1004 = vrot.lane.b32.xlu1 %v8239_v26, %s7561_s19  ;;  %v1387_v26 = vsel %vm1369_vm14, %v1354_v41, %v8298_v35  ;;  %s7568_s19 = smov 96  }
 0x1c5   : > { %v1121_v6 = vpop.permute.xlu1 %1120  ;;  %v922_v0 = vpop.permute.xlu0 %921 }
 0x1c6   : > { %v1385_v18 = vsel %vm1369_vm14, %v1352_v11, %v1121_v6  ;;  %v1197_v48 = vsel %vm1171_vm8, %v1164_v43, %v922_v0  ;;  %v8489_v43 = vld [vmem:[%s11067_s2] ss:$0 sm:$0xff] }
 0x1c7   : > { %1040 = vrot.lane.b32.xlu1 %v8256_v50, %s7560_s18  ;;  %7195 = vmatmul.mubr.msk.bf16.gmra.mrb[12].mxu0 %vm1424_vm15, %v1385_v18 }
 0x1c8   : > { %7198 = vmatprep.mubr.msk.bf16.mxu0 %vm1424_vm15, %v1387_v26 }
 0x1c9   : > { %v805_v12 = vpop.permute.xlu1 %804  ;;  %v955_v50 = vpop.permute.xlu0 %954 }
 0x1ca   : > { %v1158_v29 = vsel %vm1138_vm7, %v7885_v17, %v805_v12  ;;  %v1259_v17 = vsel %vm1237_vm10, %v1226_v56, %v8344_v54  ;;  %v1230_v62 = vsel %vm1204_vm9, %v1197_v48, %v955_v50  ;;  %v7462_v48 = vld [vmem:[%s11068_s3 + $0x20] sm:$0xff]  }
 0x1cb   : > { %1072 = vrot.lane.b32.xlu1 %v7556_v3, %s7562_s20  ;;  %v1292_v38 = vsel %vm1270_vm11, %v1259_v17, %v1031_v7 }
 0x1cc   : > { %v1325_v8 = vsel %vm1303_vm12, %v1292_v38, %v1063_v13 }
 0x1cd   : > { %v916_v21 = vpop.permute.xlu1 %915  ;;  %v999_v37 = vpop.permute.xlu0 %998  ;;  %v1358_v28 = vsel %vm1336_vm13, %v1325_v8, %v1095_v25 }
 0x1ce   : > { %v1191_v47 = vsel %vm1171_vm8, %v1158_v29, %v916_v21  ;;  %v1391_v23 = vsel %vm1369_vm14, %v1358_v28, %v1127_v30  ;;  %v1263_v30 = vsel %vm1237_vm10, %v1230_v62, %v999_v37 }
 0x1cf   : > { %1104 = vrot.lane.b32.xlu1 %v7639_v4, %s7564_s22 }
 0x1d1   : > { %v949_v57 = vpop.permute.xlu1 %948  ;;  %v1035_v42 = vpop.permute.xlu0 %1034 }
 0x1d2   : > { %v1224_v55 = vsel %vm1204_vm9, %v1191_v47, %v949_v57 }
 0x1d3   : > { %1136 = vrot.lane.b32.xlu1 %v7639_v4, %s7563_s21  ;;  %s332_s21 = scalar_lea.vmem %s11074_s9, %s6540_s11 }
 0x1d5   : > { %v993_v35 = vpop.permute.xlu1 %992  ;;  %v1067_v54 = vpop.permute.xlu0 %1066 }
 0x1d6   : > { %v1257_v16 = vsel %vm1237_vm10, %v1224_v55, %v993_v35 }
 0x1d7   : > { %2029 = vrot.lane.b32.xlu1 %v7639_v4, %s7566_s27 }
 0x1d9   : > { %v1029_v1 = vpop.permute.xlu1 %1028  ;;  %v1099_v58 = vpop.permute.xlu0 %1098 }
 0x1da   : > { %v1290_v52 = vsel %vm1270_vm11, %v1257_v16, %v1029_v1 }
 0x1db   : > { %2136 = vrot.lane.b32.xlu1 %v7639_v4, %s7567_s28 }
 0x1dd   : > { %v1061_v22 = vpop.permute.xlu1 %1060  ;;  %v1131_v40 = vpop.permute.xlu0 %1130 }
 0x1de   : > { %v1323_v32 = vsel %vm1303_vm12, %v1290_v52, %v1061_v22 }
 0x1e1   : > { %v1093_v36 = vpop.permute.xlu1 %1092  ;;  %v815_v45 = vpop.permute.xlu0 %814 }
 0x1e2   : > { %v1356_v2 = vsel %vm1336_vm13, %v1323_v32, %v1093_v36  ;;  %v1168_v47 = vsel %vm1138_vm7, %v8089_v49, %v815_v45  ;;  %v7459_v45 = vld [vmem:[%s11068_s3 + $0x58] sm:$0xff]  }
 0x1e5   : > { %v1125_v51 = vpop.permute.xlu1 %1124  ;;  %v926_v20 = vpop.permute.xlu0 %925 }
 0x1e6   : > { %v1389_v46 = vsel %vm1369_vm14, %v1356_v2, %v1125_v51  ;;  %v1201_v55 = vsel %vm1171_vm8, %v1168_v47, %v926_v20  ;;  %v7461_v20 = vld [vmem:[%s11068_s3 + $0x60] sm:$0xff]  }
 0x1e7   : > { %7199 = vmatmul.mubr.msk.bf16.gmra.mrb[16].mxu0 %vm1424_vm15, %v1389_v46 }
 0x1e8   : > { %7202 = vmatprep.mubr.msk.bf16.mxu0 %vm1424_vm15, %v1391_v23  ;;  %v7453_v23 = vld [vmem:[%s11068_s3 + $0x40] sm:$0xff]  }
 0x1e9   : > { %v809_v44 = vpop.permute.xlu1 %808  ;;  %v959_v18 = vpop.permute.xlu0 %958  ;;  %6560 = vmatprep.subr.bf16.mxu0 %v7453_v23  ;;  %7330 = vmatprep.subr.bf16.mxu1 %v7453_v23 }
 0x1ea   : > { %v1162_v25 = vsel %vm1138_vm7, %v7961_v24, %v809_v44  ;;  %v1296_v24 = vsel %vm1270_vm11, %v1263_v30, %v1035_v42  ;;  %v1234_v42 = vsel %vm1204_vm9, %v1201_v55, %v959_v18 }
 0x1eb   : > { %v1329_v39 = vsel %vm1303_vm12, %v1296_v24, %v1067_v54  ;;  %v7454_v54 = vld [vmem:[%s11068_s3] sm:$0xff]  }
 0x1ec   : > { %v1362_v41 = vsel %vm1336_vm13, %v1329_v39, %v1099_v58  ;;  %6561 = vmatpush3.bf16.msra.mxu0 %v7454_v54  ;;  %v7456_v58 = vld [vmem:[%s11068_s3 + $0x8] sm:$0xff]   ;;  %7338 = vmatpush3.bf16.msra.mxu1 %v7454_v54  ;;  %v7466_v54 = vld [vmem:[%s11068_s3 + $0x30] sm:$0xff]  }
 0x1ed   : > { %v920_v7 = vpop.permute.xlu1 %919  ;;  %v1395_v12 = vsel %vm1369_vm14, %v1362_v41, %v1131_v40  ;;  %v1003_v21 = vpop.permute.xlu0 %1002  ;;  %v7457_v40 = vld [vmem:[%s11068_s3 + $0x50] sm:$0xff]  }
 0x1ee   : > { %v1195_v14 = vsel %vm1171_vm8, %v1162_v25, %v920_v7  ;;  %v1267_v17 = vsel %vm1237_vm10, %v1234_v42, %v1003_v21  ;;  %v7455_v7 = vld [vmem:[%s11068_s3 + $0x48] sm:$0xff]  }
 0x1ef   : > { %6562 = vmatprep.subr.bf16.mxu0 %v7455_v7  ;;  %7331 = vmatprep.subr.bf16.mxu1 %v7455_v7 }
 0x1f0   : > { %6563 = vmatpush3.bf16.msra.mxu0 %v7456_v58  ;;  %7339 = vmatpush3.bf16.msra.mxu1 %v7456_v58 }
 0x1f1   : > { %v953_v33 = vpop.permute.xlu1 %952  ;;  %v1039_v35 = vpop.permute.xlu0 %1038  ;;  %6564 = vmatprep.subr.bf16.mxu0 %v7457_v40  ;;  %7332 = vmatprep.subr.bf16.mxu1 %v7457_v40 }
 0x1f2   : > { %v1228_v53 = vsel %vm1204_vm9, %v1195_v14, %v953_v33 }
 0x1f5   : > { %v997_v13 = vpop.permute.xlu1 %996  ;;  %v1071_v1 = vpop.permute.xlu0 %1070 }
 0x1f6   : > { %v1261_v34 = vsel %vm1237_vm10, %v1228_v53, %v997_v13  ;;  %v7458_v13 = vld [vmem:[%s11068_s3 + $0x10] sm:$0xff]  }
 0x1f7   : > { %6565 = vmatpush3.bf16.msra.mxu0 %v7458_v13  ;;  %7340 = vmatpush3.bf16.msra.mxu1 %v7458_v13 }
 0x1f8   : > { %6566 = vmatprep.subr.bf16.mxu0 %v7459_v45  ;;  %7333 = vmatprep.subr.bf16.mxu1 %v7459_v45  ;;  %v7468_v45 = vld [vmem:[%s11068_s3 + $0x38] sm:$0xff]  }
 0x1f9   : > { %v1033_v9 = vpop.permute.xlu1 %1032  ;;  %v1103_v29 = vpop.permute.xlu0 %1102 }
 0x1fa   : > { %v1294_v59 = vsel %vm1270_vm11, %v1261_v34, %v1033_v9 }
 0x1fd   : > { %v1065_v27 = vpop.permute.xlu1 %1064  ;;  %v1135_v38 = vpop.permute.xlu0 %1134 }
 0x1fe   : > { %v1327_v5 = vsel %vm1303_vm12, %v1294_v59, %v1065_v27  ;;  %v7460_v27 = vld [vmem:[%s11068_s3 + $0x18] sm:$0xff]  }
 0x1ff   : > { %6567 = vmatpush3.bf16.msra.mxu0 %v7460_v27  ;;  %7341 = vmatpush3.bf16.msra.mxu1 %v7460_v27 }
 0x200   : > { %6568 = vmatprep.subr.bf16.mxu0 %v7461_v20  ;;  %7334 = vmatprep.subr.bf16.mxu1 %v7461_v20 }
 0x201   : > { %v1097_v61 = vpop.permute.xlu1 %1096 }
 0x202   : > { %v1360_v11 = vsel %vm1336_vm13, %v1327_v5, %v1097_v61 }
 0x203   : > { %6569 = vmatpush3.bf16.msra.mxu0 %v7462_v48  ;;  %7342 = vmatpush3.bf16.msra.mxu1 %v7462_v48 }
 0x205   : > { %v1129_v6 = vpop.permute.xlu1 %1128 }
 0x206   : > { %v1393_v26 = vsel %vm1369_vm14, %v1360_v11, %v1129_v6 }
 0x207   : > { %7203 = vmatmul.mubr.msk.bf16.gmra.mrb[20].mxu0 %vm1424_vm15, %v1393_v26 }
 0x208   : > { %7206 = vmatprep.mubr.msk.bf16.mxu0 %vm1424_vm15, %v1395_v12 }
 0x209   : > { %v813_v60 = vpop.permute.xlu1 %812 }
 0x20a   : > { %v1166_v19 = vsel %vm1138_vm7, %v8055_v63, %v813_v60  ;;  %v1300_v63 = vsel %vm1270_vm11, %v1267_v17, %v1039_v35 }
 0x20b   : > { %v1333_v32 = vsel %vm1303_vm12, %v1300_v63, %v1071_v1 }
 0x20c   : > { %v1366_v51 = vsel %vm1336_vm13, %v1333_v32, %v1103_v29  ;;  %v7463_v32 = vld [vmem:[%s11068_s3 + $0x68] sm:$0xff]  }
 0x20d   : > { %v924_v0 = vpop.permute.xlu1 %923  ;;  %v1399_v46 = vsel %vm1369_vm14, %v1366_v51, %v1135_v38  ;;  %6570 = vmatprep.subr.bf16.mxu0 %v7463_v32  ;;  %7335 = vmatprep.subr.bf16.mxu1 %v7463_v32 }
 0x20e   : > { %v1199_v31 = vsel %vm1171_vm8, %v1166_v19, %v924_v0 }
 0x211   : > { %v957_v57 = vpop.permute.xlu1 %956 }
 0x212   : > { %v1232_v36 = vsel %vm1204_vm9, %v1199_v31, %v957_v57 }
 0x215   : > { %v1001_v50 = vpop.permute.xlu1 %1000 }
 0x216   : > { %v1265_v16 = vsel %vm1237_vm10, %v1232_v36, %v1001_v50 }
 0x219   : > { %v1037_v37 = vpop.permute.xlu1 %1036 }
 0x21a   : > { %v1298_v52 = vsel %vm1270_vm11, %v1265_v16, %v1037_v37 }
 0x21d   : > { %v1069_v22 = vpop.permute.xlu1 %1068 }
 0x21e   : > { %v1331_v49 = vsel %vm1303_vm12, %v1298_v52, %v1069_v22 }
 0x221   : > { %v1101_v56 = vpop.permute.xlu1 %1100 }
 0x222   : > { %v1364_v8 = vsel %vm1336_vm13, %v1331_v49, %v1101_v56 }
 0x225   : > { %v1133_v2 = vpop.permute.xlu1 %1132 }
 0x226   : > { %v1397_v28 = vsel %vm1369_vm14, %v1364_v8, %v1133_v2  ;;  %v7464_v8 = vld [vmem:[%s11068_s3 + $0x28] sm:$0xff]   ;;  %v7465_v2 = vld [vmem:[%s11068_s3 + $0x70] sm:$0xff]  }
 0x227   : > { %7207 = vmatmul.mubr.msk.bf16.gmra.mrb[24].mxu0 %vm1424_vm15, %v1397_v28  ;;  %7343 = vmatpush3.bf16.msra.mxu1 %v7464_v8 }
 0x228   : > { %7210 = vmatprep.mubr.msk.bf16.mxu0 %vm1424_vm15, %v1399_v46  ;;  %6571 = vmatpush3.bf16.msra.mxu0 %v7464_v8 }
 0x229   : > { %v817_v44 = vpop.permute.xlu1 %816  ;;  %6572 = vmatprep.subr.bf16.mxu0 %v7465_v2  ;;  %7336 = vmatprep.subr.bf16.mxu1 %v7465_v2 }
 0x22a   : > { %v1170_v12 = vsel %vm1138_vm7, %v8160_v10, %v817_v44 }
 0x22b   : > { %7344 = vmatpush3.bf16.msra.mxu1 %v7466_v54 }
 0x22c   : > { %6573 = vmatpush3.bf16.msra.mxu0 %v7466_v54 }
 0x22d   : > { %v928_v33 = vpop.permute.xlu1 %927 }
 0x22e   : > { %v1203_v21 = vsel %vm1171_vm8, %v1170_v12, %v928_v33  ;;  %v7467_v33 = vld [vmem:[%s11068_s3 + $0x78] sm:$0xff]  }
 0x22f   : > { %6574 = vmatprep.subr.bf16.mxu0 %v7467_v33  ;;  %7337 = vmatprep.subr.bf16.mxu1 %v7467_v33 }
 0x230   : > { %6575 = vmatpush3.bf16.msra.mxu0 %v7468_v45  ;;  %7345 = vmatpush3.bf16.msra.mxu1 %v7468_v45 }
 0x231   : > { %v961_v9 = vpop.permute.xlu1 %960 }
 0x232   : > { %v1236_v57 = vsel %vm1204_vm9, %v1203_v21, %v961_v9 }
 0x235   : > { %v1005_v25 = vpop.permute.xlu1 %1004 }
 0x236   : > { %v1269_v1 = vsel %vm1237_vm10, %v1236_v57, %v1005_v25  ;;  %v8564_v25 = vld [vmem:[%s11068_s3 + $0x80] sm:$0xff]  }
 0x237   : > { %v7184_v14 = vpop.f32.mrb[0].mxu0  ;;  %7214 = vmatprep.subr.bf16.mxu0 %v8564_v25 }
 0x238   : > { %v1507_v53 = vadd.f32 %v7184_v14, %v8489_v43  ;;  %v1498_v61 = vpop.f32.mrb[1].mxu0 }
 0x239   : > { %v1499_v62 = vadd.f32 %v8489_v43, %v1498_v61  ;;  %v7185_v34 = vpop.f32.mrb[2].mxu0  ;;  %v1041_v30 = vpop.permute.xlu1 %1040 }
 0x23a   : > { %v1510_v59 = vadd.f32 %v7185_v34, %v8489_v43  ;;  %v1501_v24 = vpop.f32.mrb[3].mxu0  ;;  %v1627_v39 = vmax.f32 %v1507_v53, 0.0  ;;  %v1302_v29 = vsel %vm1270_vm11, %v1269_v1, %v1041_v30 }
 0x23b   : > { %v1502_v5 = vadd.f32 %v8489_v43, %v1501_v24  ;;  %v1625_v6 = vmax.f32 %v1499_v62, 0.0 }
 0x23c   : > { %v1628_v11 = vmax.f32 %v1510_v59, 0.0 }
 0x23d   : > { %v1626_v41 = vmax.f32 %v1502_v5, 0.0  ;;  %v1073_v18 = vpop.permute.xlu1 %1072 }
 0x23e   : > { %v1658_v26 = vpack.c.bf16 %v1628_v11, %v1627_v39  ;;  %v1335_v55 = vsel %vm1303_vm12, %v1302_v29, %v1073_v18 }
 0x23f   : > { %v1657_v60 = vpack.c.bf16 %v1626_v41, %v1625_v6 }
 0x240   : > { %v1681_v0 = vshrl.u32 %v1658_v26, 16  ;;  %v1684_v22 = vshll.u32 %v1658_v26, 16 }
 0x241   : > { %v1674_v35 = vshrl.u32 %v1657_v60, 16  ;;  %v1105_v50 = vpop.permute.xlu1 %1104  ;;  %v1677_v47 = vshll.u32 %v1657_v60, 16 }
 0x242   : > { %v1683_v37 = vrot.slane %v1681_v0, 7  ;;  %v1368_v56 = vsel %vm1336_vm13, %v1335_v55, %v1105_v50 }
 0x243   : > { %v1676_v19 = vrot.slane %v1674_v35, 7 }
 0x244   : > { %v1686_v31 = vor.u32 %v1684_v22, %v1683_v37  ;;  %v1834_v10 = vsel %vm7655_vm2, %v1683_v37, 0 }
 0x245   : > { %v1679_v36 = vor.u32 %v1677_v47, %v1676_v19  ;;  %v1137_v42 = vpop.permute.xlu1 %1136  ;;  %v2095_v63 = vrot.slane %v1834_v10, 1  ;;  %v1833_v51 = vsel %vm7655_vm2, %v1676_v19, 0  ;;  %v1869_v58 = vshll.u32 %v1834_v10, 16 }
 0x246   : > { %v1401_v16 = vsel %vm1369_vm14, %v1368_v56, %v1137_v42  ;;  %v8514_v17 = vsel %vm7655_vm2, 0, %v1686_v31  ;;  %v2092_v44 = vrot.slane %v1833_v51, 1  ;;  %v1857_v53 = vshll.u32 %v1833_v51, 16 }
 0x247   : > { %2249 = vrot.lane.b32.xlu0 %v8514_v17, %s7567_s28  ;;  %2171 = vrot.lane.b32.xlu1 %v8514_v17, %s7568_s19  ;;  %v2094_v52 = vrot.slane %v8514_v17, 1  ;;  %v8523_v38 = vsel %vm7655_vm2, 0, %v1679_v36  ;;  %v1864_v49 = vshll.u32 %v8514_v17, 16  ;;  %v1862_v7 = vshrl.u32 %v8514_v17, 16 }
 0x248   : > { %7211 = vmatmul.mubr.msk.bf16.gmra.mrb[28].mxu0 %vm1424_vm15, %v1401_v16  ;;  %v2091_v46 = vrot.slane %v8523_v38, 1  ;;  %v1852_v9 = vshll.u32 %v8523_v38, 16  ;;  %v1871_v27 = vrot.slane %v1869_v58, 1  ;;  %v1850_v48 = vshrl.u32 %v8523_v38, 16 }
 0x249   : > { %v8539_v28 = vsel %vm849_vm3, %v2094_v52, %v2095_v63  ;;  %v1866_v23 = vrot.slane %v1864_v49, 1  ;;  %v1859_v62 = vrot.slane %v1857_v53, 1 }
 0x24a   : > { %v2093_v40 = vsel %vm849_vm3, %v2091_v46, %v2092_v44  ;;  %v1854_v14 = vrot.slane %v1852_v9, 1 }
 0x24b   : > { %2219 = vrot.lane.b32.xlu0 %v8539_v28, %s7566_s27  ;;  %2169 = vrot.lane.b32.xlu1 %v8523_v38, %s7568_s19  ;;  %v1867_v13 = vor.u32 %v1866_v23, %v1862_v7 }
 0x24c   : > { %v1855_v61 = vor.u32 %v1854_v14, %v1850_v48 }
 0x24d   : > { %v8567_v20 = vsel %vm597_vm4, %v1867_v13, %v1871_v27 }
 0x24e   : > { %v8577_v34 = vsel %vm597_vm4, %v1855_v61, %v1859_v62 }
 0x24f   : > { %2217 = vrot.lane.b32.xlu0 %v2093_v40, %s7566_s27  ;;  %2140 = vrot.lane.b32.xlu1 %v8539_v28, %s7567_s28 }
 0x253   : > { %2281 = vrot.lane.b32.xlu0 %v8567_v20, %s7568_s19  ;;  %2138 = vrot.lane.b32.xlu1 %v2093_v40, %s7567_s28 }
 0x257   : > { %2033 = vrot.lane.b32.xlu1 %v8567_v20, %s7566_s27 }
 0x25b   : > { %2031 = vrot.lane.b32.xlu1 %v8577_v34, %s7566_s27 }
 0x25f   : > { %v7188_v30 = vpop.f32.mrb[4].mxu0 }
 0x260   : > { %v1523_v59 = vadd.f32 %v7188_v30, %v8489_v43  ;;  %v1514_v24 = vpop.f32.mrb[5].mxu0 }
 0x261   : > { %v1515_v5 = vadd.f32 %v8489_v43, %v1514_v24  ;;  %v7189_v39 = vpop.f32.mrb[6].mxu0 }
 0x262   : > { %v1526_v11 = vadd.f32 %v7189_v39, %v8489_v43  ;;  %v1517_v6 = vpop.f32.mrb[7].mxu0  ;;  %v1631_v18 = vmax.f32 %v1523_v59, 0.0 }
 0x263   : > { %v1518_v41 = vadd.f32 %v8489_v43, %v1517_v6  ;;  %v1629_v12 = vmax.f32 %v1515_v5, 0.0 }
 0x264   : > { %v1632_v26 = vmax.f32 %v1526_v11, 0.0 }
 0x265   : > { %v1630_v60 = vmax.f32 %v1518_v41, 0.0 }
 0x266   : > { %v1660_v21 = vpack.c.bf16 %v1632_v26, %v1631_v18 }
 0x267   : > { %v1659_v0 = vpack.c.bf16 %v1630_v60, %v1629_v12 }
 0x268   : > { %v1695_v57 = vshrl.u32 %v1660_v21, 16  ;;  %v1698_v1 = vshll.u32 %v1660_v21, 16 }
 0x269   : > { %v1688_v35 = vshrl.u32 %v1659_v0, 16  ;;  %v1691_v29 = vshll.u32 %v1659_v0, 16 }
 0x26a   : > { %v1697_v50 = vrot.slane %v1695_v57, 7 }
 0x26b   : > { %v1690_v37 = vrot.slane %v1688_v35, 7 }
 0x26c   : > { %v1700_v22 = vor.u32 %v1698_v1, %v1697_v50  ;;  %v1836_v31 = vsel %vm7655_vm2, %v1697_v50, 0 }
 0x26d   : > { %v1693_v19 = vor.u32 %v1691_v29, %v1690_v37  ;;  %v2101_v56 = vrot.slane %v1836_v31, 1  ;;  %v1835_v42 = vsel %vm7655_vm2, %v1690_v37, 0  ;;  %v1893_v2 = vshll.u32 %v1836_v31, 16 }
 0x26e   : > { %v8587_v47 = vsel %vm7655_vm2, 0, %v1700_v22  ;;  %v2098_v32 = vrot.slane %v1835_v42, 1  ;;  %v1881_v40 = vshll.u32 %v1835_v42, 16 }
 0x26f   : > { %2253 = vrot.lane.b32.xlu0 %v8587_v47, %s7567_s28  ;;  %2175 = vrot.lane.b32.xlu1 %v8587_v47, %s7568_s19  ;;  %v8597_v10 = vsel %vm7655_vm2, 0, %v1693_v19  ;;  %v2100_v55 = vrot.slane %v8587_v47, 1  ;;  %v1888_v36 = vshll.u32 %v8587_v47, 16  ;;  %v1886_v8 = vshrl.u32 %v8587_v47, 16 }
 0x270   : > { %v2097_v52 = vrot.slane %v8597_v10, 1  ;;  %v1876_v49 = vshll.u32 %v8597_v10, 16  ;;  %v1895_v58 = vrot.slane %v1893_v2, 1  ;;  %v1874_v33 = vshrl.u32 %v8597_v10, 16 }
 0x271   : > { %v8608_v16 = vsel %vm849_vm3, %v2100_v55, %v2101_v56  ;;  %v1890_v63 = vrot.slane %v1888_v36, 1  ;;  %v1883_v30 = vrot.slane %v1881_v40, 1 }
 0x272   : > { %v8618_v51 = vsel %vm849_vm3, %v2097_v52, %v2098_v32  ;;  %v1878_v23 = vrot.slane %v1876_v49, 1 }
 0x273   : > { %2251 = vrot.lane.b32.xlu0 %v8597_v10, %s7567_s28  ;;  %2173 = vrot.lane.b32.xlu1 %v8597_v10, %s7568_s19  ;;  %v1891_v46 = vor.u32 %v1890_v63, %v1886_v8 }
 0x274   : > { %v1879_v48 = vor.u32 %v1878_v23, %v1874_v33 }
 0x275   : > { %v8629_v14 = vsel %vm597_vm4, %v1891_v46, %v1895_v58 }
 0x276   : > { %v8637_v39 = vsel %vm597_vm4, %v1879_v48, %v1883_v30 }
 0x277   : > { %2223 = vrot.lane.b32.xlu0 %v8608_v16, %s7566_s27  ;;  %2144 = vrot.lane.b32.xlu1 %v8608_v16, %s7567_s28 }
 0x27b   : > { %2221 = vrot.lane.b32.xlu0 %v8618_v51, %s7566_s27  ;;  %v7192_v54 = vpop.f32.mrb[8].mxu0  ;;  %2142 = vrot.lane.b32.xlu1 %v8618_v51, %s7567_s28 }
 0x27c   : > { %v1539_v44 = vadd.f32 %v7192_v54, %v8489_v43  ;;  %v1530_v7 = vpop.f32.mrb[9].mxu0 }
 0x27d   : > { %v1531_v13 = vadd.f32 %v8489_v43, %v1530_v7  ;;  %v7193_v9 = vpop.f32.mrb[10].mxu0 }
 0x27e   : > { %v1542_v45 = vadd.f32 %v7193_v9, %v8489_v43  ;;  %v1533_v27 = vpop.f32.mrb[11].mxu0  ;;  %v1635_v61 = vmax.f32 %v1539_v44, 0.0 }
 0x27f   : > { %v1534_v53 = vadd.f32 %v8489_v43, %v1533_v27  ;;  %2285 = vrot.lane.b32.xlu0 %v8629_v14, %s7568_s19  ;;  %2037 = vrot.lane.b32.xlu1 %v8629_v14, %s7566_s27  ;;  %v1633_v59 = vmax.f32 %v1531_v13, 0.0 }
 0x280   : > { %v1636_v62 = vmax.f32 %v1542_v45, 0.0 }
 0x281   : > { %v1634_v24 = vmax.f32 %v1534_v53, 0.0 }
 0x282   : > { %v1662_v5 = vpack.c.bf16 %v1636_v62, %v1635_v61 }
 0x283   : > { %v1661_v11 = vpack.c.bf16 %v1634_v24, %v1633_v59  ;;  %2283 = vrot.lane.b32.xlu0 %v8637_v39, %s7568_s19  ;;  %2035 = vrot.lane.b32.xlu1 %v8637_v39, %s7566_s27 }
 0x284   : > { %v1709_v6 = vshrl.u32 %v1662_v5, 16  ;;  %v1712_v26 = vshll.u32 %v1662_v5, 16 }
 0x285   : > { %v1702_v41 = vshrl.u32 %v1661_v11, 16  ;;  %v1705_v21 = vshll.u32 %v1661_v11, 16 }
 0x286   : > { %v1711_v18 = vrot.slane %v1709_v6, 7 }
 0x287   : > { %v1704_v12 = vrot.slane %v1702_v41, 7 }
 0x288   : > { %v1714_v60 = vor.u32 %v1712_v26, %v1711_v18  ;;  %v1838_v35 = vsel %vm7655_vm2, %v1711_v18, 0 }
 0x289   : > { %v1707_v0 = vor.u32 %v1705_v21, %v1704_v12  ;;  %v2107_v22 = vrot.slane %v1838_v35, 1  ;;  %v1837_v29 = vsel %vm7655_vm2, %v1704_v12, 0  ;;  %v1917_v52 = vshll.u32 %v1838_v35, 16 }
 0x28a   : > { %v8645_v57 = vsel %vm7655_vm2, 0, %v1714_v60  ;;  %v2104_v56 = vrot.slane %v1837_v29, 1  ;;  %v1905_v46 = vshll.u32 %v1837_v29, 16 }
 0x28b   : > { %2257 = vrot.lane.b32.xlu0 %v8645_v57, %s7567_s28  ;;  %2179 = vrot.lane.b32.xlu1 %v8645_v57, %s7568_s19  ;;  %v8655_v50 = vsel %vm7655_vm2, 0, %v1707_v0  ;;  %v2106_v1 = vrot.slane %v8645_v57, 1  ;;  %v1912_v37 = vshll.u32 %v8645_v57, 16  ;;  %v1910_v42 = vshrl.u32 %v8645_v57, 16 }
 0x28c   : > { %v2103_v31 = vrot.slane %v8655_v50, 1  ;;  %v1900_v36 = vshll.u32 %v8655_v50, 16  ;;  %v1919_v8 = vrot.slane %v1917_v52, 1  ;;  %v1898_v2 = vshrl.u32 %v8655_v50, 16 }
 0x28d   : > { %v8666_v19 = vsel %vm849_vm3, %v2106_v1, %v2107_v22  ;;  %v1914_v55 = vrot.slane %v1912_v37, 1  ;;  %v1907_v13 = vrot.slane %v1905_v46, 1 }
 0x28e   : > { %v8676_v63 = vsel %vm849_vm3, %v2103_v31, %v2104_v56  ;;  %v1902_v32 = vrot.slane %v1900_v36, 1 }
 0x28f   : > { %2255 = vrot.lane.b32.xlu0 %v8655_v50, %s7567_s28  ;;  %2177 = vrot.lane.b32.xlu1 %v8655_v50, %s7568_s19  ;;  %v1915_v49 = vor.u32 %v1914_v55, %v1910_v42  ;;  %v2030_v42 = vpop.permute.xlu1 %2029 }
 0x290   : > { %v1903_v44 = vor.u32 %v1902_v32, %v1898_v2 }
 0x291   : > { %v8684_v54 = vsel %vm597_vm4, %v1915_v49, %v1919_v8 }
 0x292   : > { %v8695_v48 = vsel %vm597_vm4, %v1903_v44, %v1907_v13 }
 0x293   : > { %2227 = vrot.lane.b32.xlu0 %v8666_v19, %s7566_s27  ;;  %2148 = vrot.lane.b32.xlu1 %v8666_v19, %s7567_s28 }
 0x297   : > { %2225 = vrot.lane.b32.xlu0 %v8676_v63, %s7566_s27  ;;  %2146 = vrot.lane.b32.xlu1 %v8676_v63, %s7567_s28 }
 0x29a   : > { %v7196_v23 = vpop.f32.mrb[12].mxu0 }
 0x29b   : > { %v1555_v7 = vadd.f32 %v7196_v23, %v8489_v43  ;;  %2289 = vrot.lane.b32.xlu0 %v8684_v54, %s7568_s19  ;;  %v1546_v58 = vpop.f32.mrb[13].mxu0  ;;  %2041 = vrot.lane.b32.xlu1 %v8684_v54, %s7566_s27 }
 0x29c   : > { %v1547_v33 = vadd.f32 %v8489_v43, %v1546_v58  ;;  %v7197_v40 = vpop.f32.mrb[14].mxu0  ;;  %v2137_v58 = vpop.permute.xlu1 %2136 }
 0x29d   : > { %v1558_v9 = vadd.f32 %v7197_v40, %v8489_v43  ;;  %v1549_v45 = vpop.f32.mrb[15].mxu0  ;;  %v1639_v53 = vmax.f32 %v1555_v7, 0.0 }
 0x29e   : > { %v1550_v27 = vadd.f32 %v8489_v43, %v1549_v45  ;;  %v1637_v62 = vmax.f32 %v1547_v33, 0.0 }
 0x29f   : > { %v1640_v61 = vmax.f32 %v1558_v9, 0.0  ;;  %2287 = vrot.lane.b32.xlu0 %v8695_v48, %s7568_s19  ;;  %2039 = vrot.lane.b32.xlu1 %v8695_v48, %s7566_s27 }
 0x2a0   : > { %v1638_v30 = vmax.f32 %v1550_v27, 0.0 }
 0x2a1   : > { %v1664_v59 = vpack.c.bf16 %v1640_v61, %v1639_v53 }
 0x2a2   : > { %v1663_v24 = vpack.c.bf16 %v1638_v30, %v1637_v62 }
 0x2a3   : > { %v1723_v5 = vshrl.u32 %v1664_v59, 16  ;;  %v1726_v41 = vshll.u32 %v1664_v59, 16 }
 0x2a4   : > { %v1716_v11 = vshrl.u32 %v1663_v24, 16  ;;  %v1719_v12 = vshll.u32 %v1663_v24, 16 }
 0x2a5   : > { %v1725_v6 = vrot.slane %v1723_v5, 7 }
 0x2a6   : > { %v1718_v18 = vrot.slane %v1716_v11, 7 }
 0x2a7   : > { %v1728_v26 = vor.u32 %v1726_v41, %v1725_v6  ;;  %v1840_v0 = vsel %vm7655_vm2, %v1725_v6, 0 }
 0x2a8   : > { %v1721_v60 = vor.u32 %v1719_v12, %v1718_v18  ;;  %v2113_v22 = vrot.slane %v1840_v0, 1  ;;  %v1839_v29 = vsel %vm7655_vm2, %v1718_v18, 0  ;;  %v1941_v32 = vshll.u32 %v1840_v0, 16 }
 0x2a9   : > { %v8703_v21 = vsel %vm7655_vm2, 0, %v1728_v26  ;;  %v2110_v52 = vrot.slane %v1839_v29, 1  ;;  %v1929_v7 = vshll.u32 %v1839_v29, 16 }
 0x2aa   : > { %2261 = vrot.lane.b32.xlu0 %v8703_v21, %s7567_s28  ;;  %2183 = vrot.lane.b32.xlu1 %v8703_v21, %s7568_s19  ;;  %v8713_v35 = vsel %vm7655_vm2, 0, %v1721_v60  ;;  %v2112_v1 = vrot.slane %v8703_v21, 1  ;;  %v1936_v37 = vshll.u32 %v8703_v21, 16  ;;  %v1934_v49 = vshrl.u32 %v8703_v21, 16 }
 0x2ab   : > { %v2109_v55 = vrot.slane %v8713_v35, 1  ;;  %v1924_v56 = vshll.u32 %v8713_v35, 16  ;;  %v1943_v23 = vrot.slane %v1941_v32, 1  ;;  %v1922_v44 = vshrl.u32 %v8713_v35, 16 }
 0x2ac   : > { %v8724_v31 = vsel %vm849_vm3, %v2112_v1, %v2113_v22  ;;  %v1938_v36 = vrot.slane %v1936_v37, 1  ;;  %v1931_v53 = vrot.slane %v1929_v7, 1  ;;  %v2315_v60 = vsel %vm2313_vm0, 0, %v2030_v42 }
 0x2ad   : > { %v8734_v8 = vsel %vm849_vm3, %v2109_v55, %v2110_v52  ;;  %v1926_v46 = vrot.slane %v1924_v56, 1  ;;  %v2348_v55 = vsel %vm2346_vm1, %v2315_v60, %v2137_v58 }
 0x2ae   : > { %2259 = vrot.lane.b32.xlu0 %v8713_v35, %s7567_s28  ;;  %2181 = vrot.lane.b32.xlu1 %v8713_v35, %s7568_s19  ;;  %v1939_v2 = vor.u32 %v1938_v36, %v1934_v49 }
 0x2af   : > { %v1927_v13 = vor.u32 %v1926_v46, %v1922_v44 }
 0x2b0   : > { %v8742_v40 = vsel %vm597_vm4, %v1939_v2, %v1943_v23 }
 0x2b1   : > { %v8754_v5 = vsel %vm597_vm4, %v1927_v13, %v1931_v53 }
 0x2b2   : > { %2231 = vrot.lane.b32.xlu0 %v8724_v31, %s7566_s27  ;;  %2152 = vrot.lane.b32.xlu1 %v8724_v31, %s7567_s28 }
 0x2b6   : > { %2229 = vrot.lane.b32.xlu0 %v8734_v8, %s7566_s27  ;;  %2150 = vrot.lane.b32.xlu1 %v8734_v8, %s7567_s28 }
 0x2b9   : > { %v2250_v33 = vpop.permute.xlu0 %2249  ;;  %v8756_v11 = vpop.permute.xlu1 %2171 }
 0x2ba   : > { %2293 = vrot.lane.b32.xlu0 %v8742_v40, %s7568_s19  ;;  %v7200_v9 = vpop.f32.mrb[16].mxu0  ;;  %2045 = vrot.lane.b32.xlu1 %v8742_v40, %s7566_s27 }
 0x2bb   : > { %v1571_v45 = vadd.f32 %v7200_v9, %v8489_v43  ;;  %v1562_v27 = vpop.f32.mrb[17].mxu0 }
 0x2bc   : > { %v1563_v61 = vadd.f32 %v8489_v43, %v1562_v27  ;;  %v7201_v62 = vpop.f32.mrb[18].mxu0 }
 0x2bd   : > { %v1574_v30 = vadd.f32 %v7201_v62, %v8489_v43  ;;  %v8751_v59 = vpop.permute.xlu0 %2219  ;;  %v1565_v24 = vpop.f32.mrb[19].mxu0  ;;  %v1643_v41 = vmax.f32 %v1571_v45, 0.0 }
 0x2be   : > { %v1566_v6 = vadd.f32 %v8489_v43, %v1565_v24  ;;  %2291 = vrot.lane.b32.xlu0 %v8754_v5, %s7568_s19  ;;  %2043 = vrot.lane.b32.xlu1 %v8754_v5, %s7566_s27  ;;  %v1641_v26 = vmax.f32 %v1563_v61, 0.0  ;;  %v2170_v56 = vpop.permute.xlu1 %2169 }
 0x2bf   : > { %v1644_v18 = vmax.f32 %v1574_v30, 0.0  ;;  %v2381_v7 = vsel %vm2379_vm5, %v2348_v55, %v2170_v56 }
 0x2c0   : > { %v1642_v12 = vmax.f32 %v1566_v6, 0.0 }
 0x2c1   : > { %v1666_v0 = vpack.c.bf16 %v1644_v18, %v1643_v41  ;;  %v2218_v1 = vpop.permute.xlu0 %2217 }
 0x2c2   : > { %v1665_v37 = vpack.c.bf16 %v1642_v12, %v1641_v26  ;;  %v2430_v22 = vsel %vm2313_vm0, %v8577_v34, %v2218_v1  ;;  %v7470_v34 = vld [vmem:[%s11068_s3 + $0x88] sm:$0xff]   ;;  %v8784_v13 = vpop.permute.xlu1 %2140 }
 0x2c3   : > { %v1737_v29 = vshrl.u32 %v1666_v0, 16  ;;  %v1740_v49 = vshll.u32 %v1666_v0, 16  ;;  %v2477_v2 = vsel %vm2346_vm1, %v2430_v22, %v2250_v33 }
 0x2c4   : > { %v1730_v36 = vshrl.u32 %v1665_v37, 16  ;;  %v1733_v44 = vshll.u32 %v1665_v37, 16 }
 0x2c5   : > { %v1739_v52 = vrot.slane %v1737_v29, 7  ;;  %v2282_v32 = vpop.permute.xlu0 %2281 }
 0x2c6   : > { %v1732_v46 = vrot.slane %v1730_v36, 7  ;;  %v2509_v42 = vsel %vm2379_vm5, %v2477_v2, %v2282_v32  ;;  %v8802_v61 = vpop.permute.xlu1 %2138 }
 0x2c7   : > { %v1742_v23 = vor.u32 %v1740_v49, %v1739_v52  ;;  %2787 = vmatprep.mubr.bf16.mxu0 %v2509_v42  ;;  %v1842_v9 = vsel %vm7655_vm2, %v1739_v52, 0 }
 0x2c8   : > { %2788 = vmatmul.mubr.bf16.vlgmr.msra.gmra.mrb[32].mxu0 %v2381_v7  ;;  %v1735_v58 = vor.u32 %v1733_v44, %v1732_v46  ;;  %v2119_v27 = vrot.slane %v1842_v9, 1  ;;  %v1841_v53 = vsel %vm7655_vm2, %v1732_v46, 0 }
 0x2c9   : > { %7215 = vmatpush3.bf16.msra.mxu0 %v8564_v25  ;;  %7218 = vmatprep.mubr.msk.bf16.mxu0 %vm2313_vm0, %v8539_v28  ;;  %v8778_v33 = vsel %vm7655_vm2, 0, %v1742_v23  ;;  %v2116_v41 = vrot.slane %v1841_v53, 1  ;;  %v1953_v37 = vshll.u32 %v1841_v53, 16 }
 0x2ca   : > { %2265 = vrot.lane.b32.xlu0 %v8778_v33, %s7567_s28  ;;  %2187 = vrot.lane.b32.xlu1 %v8778_v33, %s7568_s19  ;;  %v8790_v28 = vsel %vm7655_vm2, 0, %v1735_v58  ;;  %v2118_v25 = vrot.slane %v8778_v33, 1  ;;  %v1960_v45 = vshll.u32 %v8778_v33, 16  ;;  %v1958_v18 = vshrl.u32 %v8778_v33, 16 }
 0x2cb   : > { %7216 = vmatprep.subr.bf16.mxu0 %v7470_v34  ;;  %v2115_v30 = vrot.slane %v8790_v28, 1  ;;  %v1948_v6 = vshll.u32 %v8790_v28, 16  ;;  %v1946_v1 = vshrl.u32 %v8790_v28, 16  ;;  %v1955_v52 = vrot.slane %v1953_v37, 1 }
 0x2cc   : > { %v2120_v62 = vsel %vm849_vm3, %v2118_v25, %v2119_v27  ;;  %v1962_v24 = vrot.slane %v1960_v45, 1 }
 0x2cd   : > { %7217 = vmatpush3.bf16.msra.mxu0 %v7470_v34  ;;  %v2117_v26 = vsel %vm849_vm3, %v2115_v30, %v2116_v41  ;;  %v1950_v60 = vrot.slane %v1948_v6, 1 }
 0x2ce   : > { %2263 = vrot.lane.b32.xlu0 %v8790_v28, %s7567_s28  ;;  %2185 = vrot.lane.b32.xlu1 %v8790_v28, %s7568_s19  ;;  %v1963_v12 = vor.u32 %v1962_v24, %v1958_v18 }
 0x2cf   : > { %v1951_v29 = vor.u32 %v1950_v60, %v1946_v1 }
 0x2d0   : > { %7219 = vmatmul.mubr.msk.bf16.vlgmr.msra.gmra.mrb[36].mxu0 %vm2313_vm0, %v8618_v51  ;;  %v1965_v51 = vshll.u32 %v1842_v9, 16 }
 0x2d1   : > { %7222 = vmatprep.mubr.msk.bf16.mxu0 %vm2313_vm0, %v8608_v16  ;;  %v8815_v16 = vpop.permute.xlu1 %2033  ;;  %v8833_v46 = vsel %vm597_vm4, %v1951_v29, %v1955_v52 }
 0x2d2   : > { %2235 = vrot.lane.b32.xlu0 %v2120_v62, %s7566_s27  ;;  %2156 = vrot.lane.b32.xlu1 %v2120_v62, %s7567_s28  ;;  %v1967_v0 = vrot.slane %v1965_v51, 1 }
 0x2d4   : > { %v8823_v22 = vsel %vm597_vm4, %v1963_v12, %v1967_v0 }
 0x2d5   : > { %v2032_v32 = vpop.permute.xlu1 %2031 }
 0x2d6   : > { %2233 = vrot.lane.b32.xlu0 %v2117_v26, %s7566_s27  ;;  %2154 = vrot.lane.b32.xlu1 %v2117_v26, %s7567_s28 }
 0x2d8   : > { %7223 = vmatmul.mubr.msk.bf16.gmra.mrb[40].mxu0 %vm2313_vm0, %v8676_v63 }
 0x2d9   : > { %7226 = vmatprep.mubr.msk.bf16.mxu0 %vm2313_vm0, %v8666_v19 }
 0x2da   : > { %2297 = vrot.lane.b32.xlu0 %v8823_v22, %s7568_s19  ;;  %2049 = vrot.lane.b32.xlu1 %v8823_v22, %s7566_s27  ;;  %v7204_v55 = vpop.f32.mrb[20].mxu0 }
 0x2db   : > { %v1587_v36 = vadd.f32 %v7204_v55, %v8489_v43  ;;  %v1578_v56 = vpop.f32.mrb[21].mxu0 }
 0x2dc   : > { %v1579_v63 = vadd.f32 %v8489_v43, %v1578_v56  ;;  %v7205_v49 = vpop.f32.mrb[22].mxu0 }
 0x2dd   : > { %v1590_v19 = vadd.f32 %v7205_v49, %v8489_v43  ;;  %v1581_v2 = vpop.f32.mrb[23].mxu0  ;;  %v1647_v23 = vmax.f32 %v1587_v36, 0.0 }
 0x2de   : > { %v1582_v42 = vadd.f32 %v8489_v43, %v1581_v2  ;;  %2295 = vrot.lane.b32.xlu0 %v8833_v46, %s7568_s19  ;;  %2047 = vrot.lane.b32.xlu1 %v8833_v46, %s7566_s27  ;;  %v1645_v7 = vmax.f32 %v1579_v63, 0.0 }
 0x2df   : > { %v1648_v44 = vmax.f32 %v1590_v19, 0.0  ;;  %v2317_v19 = vsel %vm2313_vm0, %v8523_v38, %v2032_v32  ;;  %v2433_v32 = vsel %vm2313_vm0, %v8567_v20, %v8751_v59 }
 0x2e0   : > { %v1646_v34 = vmax.f32 %v1582_v42, 0.0  ;;  %7227 = vmatmul.mubr.msk.bf16.gmra.mrb[44].mxu0 %vm2313_vm0, %v8734_v8 }
 0x2e1   : > { %v1668_v58 = vpack.c.bf16 %v1648_v44, %v1647_v23  ;;  %v2254_v9 = vpop.permute.xlu0 %2253  ;;  %7230 = vmatprep.mubr.msk.bf16.mxu0 %vm2313_vm0, %v8724_v31  ;;  %v8844_v25 = vpop.permute.xlu1 %2175 }
 0x2e2   : > { %v1667_v45 = vpack.c.bf16 %v1646_v34, %v1645_v7  ;;  %v2350_v7 = vsel %vm2346_vm1, %v2317_v19, %v8802_v61 }
 0x2e3   : > { %v1751_v27 = vshrl.u32 %v1668_v58, 16  ;;  %v1754_v24 = vshll.u32 %v1668_v58, 16 }
 0x2e4   : > { %v1744_v53 = vshrl.u32 %v1667_v45, 16  ;;  %v1747_v51 = vshll.u32 %v1667_v45, 16 }
 0x2e5   : > { %v1753_v30 = vrot.slane %v1751_v27, 7  ;;  %v2252_v6 = vpop.permute.xlu0 %2251  ;;  %v8846_v41 = vpop.permute.xlu1 %2173 }
 0x2e6   : > { %v1746_v18 = vrot.slane %v1744_v53, 7  ;;  %v2479_v27 = vsel %vm2346_vm1, %v2433_v32, %v2252_v6 }
 0x2e7   : > { %v1756_v12 = vor.u32 %v1754_v24, %v1753_v30 }
 0x2e8   : > { %v1749_v60 = vor.u32 %v1747_v51, %v1746_v18  ;;  %7231 = vmatmul.mubr.msk.bf16.gmra.mrb[48].mxu0 %vm2313_vm0, %v2117_v26  ;;  %v1843_v1 = vsel %vm7655_vm2, %v1746_v18, 0  ;;  %v2384_v18 = vsel %vm2379_vm5, %v2350_v7, %v8756_v11 }
 0x2e9   : > { %v8849_v8 = vpop.permute.xlu0 %2223  ;;  %7234 = vmatprep.mubr.msk.bf16.mxu0 %vm2313_vm0, %v2120_v62  ;;  %v8852_v31 = vpop.permute.xlu1 %2144  ;;  %v8856_v0 = vsel %vm7655_vm2, 0, %v1756_v12  ;;  %v1844_v62 = vsel %vm7655_vm2, %v1753_v30, 0  ;;  %v2122_v36 = vrot.slane %v1843_v1, 1  ;;  %v1977_v51 = vshll.u32 %v1843_v1, 16 }
 0x2ea   : > { %2191 = vrot.lane.b32.xlu1 %v8856_v0, %s7568_s19  ;;  %2269 = vrot.lane.b32.xlu0 %v8856_v0, %s7567_s28  ;;  %v8866_v26 = vsel %vm7655_vm2, 0, %v1749_v60  ;;  %v2124_v29 = vrot.slane %v8856_v0, 1  ;;  %v1984_v56 = vshll.u32 %v8856_v0, 16  ;;  %v2125_v63 = vrot.slane %v1844_v62, 1 }
 0x2eb   : > { %v2121_v37 = vrot.slane %v8866_v26, 1  ;;  %v1972_v44 = vshll.u32 %v8866_v26, 16  ;;  %v1982_v34 = vshrl.u32 %v8856_v0, 16  ;;  %v1989_v38 = vshll.u32 %v1844_v62, 16 }
 0x2ec   : > { %v2126_v2 = vsel %vm849_vm3, %v2124_v29, %v2125_v63  ;;  %v1986_v23 = vrot.slane %v1984_v56, 1  ;;  %v1970_v59 = vshrl.u32 %v8866_v26, 16  ;;  %v1979_v29 = vrot.slane %v1977_v51, 1 }
 0x2ed   : > { %v2222_v55 = vpop.permute.xlu0 %2221  ;;  %v8873_v52 = vpop.permute.xlu1 %2142  ;;  %v2123_v49 = vsel %vm849_vm3, %v2121_v37, %v2122_v36  ;;  %v1974_v24 = vrot.slane %v1972_v44, 1 }
 0x2ee   : > { %2267 = vrot.lane.b32.xlu0 %v8866_v26, %s7567_s28  ;;  %2189 = vrot.lane.b32.xlu1 %v8866_v26, %s7568_s19  ;;  %v2436_v58 = vsel %vm2313_vm0, %v8637_v39, %v2222_v55  ;;  %v1987_v30 = vor.u32 %v1986_v23, %v1982_v34  ;;  %v1991_v39 = vrot.slane %v1989_v38, 1 }
 0x2ef   : > { %v2481_v20 = vsel %vm2346_vm1, %v2436_v58, %v2254_v9  ;;  %v1975_v60 = vor.u32 %v1974_v24, %v1970_v59  ;;  %v2319_v9 = vsel %vm2313_vm0, %v8514_v17, %v8815_v16 }
 0x2f0   : > { %7235 = vmatmul.mubr.msk.bf16.gmra.mrb[52].mxu0 %vm2313_vm0, %v2123_v49  ;;  %v8908_v12 = vsel %vm597_vm4, %v1987_v30, %v1991_v39  ;;  %v2352_v17 = vsel %vm2346_vm1, %v2319_v9, %v8784_v13 }
 0x2f1   : > { %v2286_v42 = vpop.permute.xlu0 %2285  ;;  %7238 = vmatprep.mubr.msk.bf16.mxu0 %vm2313_vm0, %v2126_v2  ;;  %v8896_v45 = vpop.permute.xlu1 %2037  ;;  %v8923_v19 = vsel %vm597_vm4, %v1975_v60, %v1979_v29  ;;  %v2387_v44 = vsel %vm2379_vm5, %v2352_v17, %v8846_v41 }
 0x2f2   : > { %2239 = vrot.lane.b32.xlu0 %v2126_v2, %s7566_s27  ;;  %2160 = vrot.lane.b32.xlu1 %v2126_v2, %s7567_s28  ;;  %v2515_v6 = vsel %vm2379_vm5, %v2481_v20, %v2286_v42 }
 0x2f5   : > { %v2284_v53 = vpop.permute.xlu0 %2283  ;;  %v2036_v62 = vpop.permute.xlu1 %2035 }
 0x2f6   : > { %2237 = vrot.lane.b32.xlu0 %v2123_v49, %s7566_s27  ;;  %2158 = vrot.lane.b32.xlu1 %v2123_v49, %s7567_s28  ;;  %v2512_v61 = vsel %vm2379_vm5, %v2479_v27, %v2284_v53 }
 0x2f7   : > { %2795 = vmatprep.mubr.bf16.mxu1 %v2512_v61 }
 0x2f8   : > { %2796 = vmatmul.mubr.bf16.vlgmr.msra.gmra.mrb[0].mxu1 %v2384_v18 }
 0x2f9   : > { %2803 = vmatprep.mubr.bf16.mxu1 %v2515_v6 }
 0x2fa   : > { %2301 = vrot.lane.b32.xlu0 %v8908_v12, %s7568_s19  ;;  %2053 = vrot.lane.b32.xlu1 %v8908_v12, %s7566_s27  ;;  %v7208_v11 = vpop.f32.mrb[24].mxu0 }
 0x2fb   : > { %v1603_v1 = vadd.f32 %v7208_v11, %v8489_v43  ;;  %v1594_v37 = vpop.f32.mrb[25].mxu0 }
 0x2fc   : > { %v1595_v55 = vadd.f32 %v8489_v43, %v1594_v37  ;;  %v7209_v36 = vpop.f32.mrb[26].mxu0 }
 0x2fd   : > { %v1606_v56 = vadd.f32 %v7209_v36, %v8489_v43  ;;  %v8920_v63 = vpop.permute.xlu0 %2257  ;;  %v1597_v49 = vpop.f32.mrb[27].mxu0  ;;  %v1651_v16 = vmax.f32 %v1603_v1, 0.0 }
 0x2fe   : > { %v1598_v2 = vadd.f32 %v8489_v43, %v1597_v49  ;;  %v8926_v42 = vpop.permute.xlu1 %2179  ;;  %2299 = vrot.lane.b32.xlu0 %v8923_v19, %s7568_s19  ;;  %2051 = vrot.lane.b32.xlu1 %v8923_v19, %s7566_s27  ;;  %v1649_v7 = vmax.f32 %v1595_v55, 0.0  ;;  %v2321_v55 = vsel %vm2313_vm0, %v8597_v10, %v2036_v62 }
 0x2ff   : > { %v1652_v23 = vmax.f32 %v1606_v56, 0.0  ;;  %v2354_v10 = vsel %vm2346_vm1, %v2321_v55, %v8873_v52 }
 0x300   : > { %v1650_v34 = vmax.f32 %v1598_v2, 0.0  ;;  %2804 = vmatmul.mubr.bf16.gmra.mrb[4].mxu1 %v2387_v44 }
 0x301   : > { %v1670_v43 = vpack.c.bf16 %v1652_v23, %v1651_v16  ;;  %v2256_v38 = vpop.permute.xlu0 %2255 }
 0x302   : > { %v1669_v32 = vpack.c.bf16 %v1650_v34, %v1649_v7  ;;  %v8936_v58 = vpop.permute.xlu1 %2177  ;;  %v2439_v7 = vsel %vm2313_vm0, %v8629_v14, %v8849_v8 }
 0x303   : > { %v1765_v27 = vshrl.u32 %v1670_v43, 16  ;;  %v1768_v24 = vshll.u32 %v1670_v43, 16  ;;  %v2483_v43 = vsel %vm2346_vm1, %v2439_v7, %v2256_v38 }
 0x304   : > { %v1758_v53 = vshrl.u32 %v1669_v32, 16  ;;  %v1761_v18 = vshll.u32 %v1669_v32, 16 }
 0x305   : > { %v1767_v30 = vrot.slane %v1765_v27, 7  ;;  %v8938_v61 = vpop.permute.xlu0 %2227 }
 0x306   : > { %v1760_v13 = vrot.slane %v1758_v53, 7  ;;  %v8942_v59 = vpop.permute.xlu1 %2148 }
 0x307   : > { %v1770_v20 = vor.u32 %v1768_v24, %v1767_v30  ;;  %v1846_v60 = vsel %vm7655_vm2, %v1767_v30, 0  ;;  %v2390_v30 = vsel %vm2379_vm5, %v2354_v10, %v8844_v25  ;;  %v2323_v25 = vsel %vm2313_vm0, %v8587_v47, %v8896_v45  ;;  %v7543_v47 = vld [vmem:[%s11067_s2] ss:$0 sm:$0xff] }
 0x308   : > { %v1763_v39 = vor.u32 %v1761_v18, %v1760_v13  ;;  %v1845_v41 = vsel %vm7655_vm2, %v1760_v13, 0  ;;  %v2131_v49 = vrot.slane %v1846_v60, 1  ;;  %v2013_v44 = vshll.u32 %v1846_v60, 16 }
 0x309   : > { %v2226_v51 = vpop.permute.xlu0 %2225  ;;  %v8946_v6 = vsel %vm7655_vm2, 0, %v1770_v20  ;;  %v2128_v1 = vrot.slane %v1845_v41, 1  ;;  %v2001_v38 = vshll.u32 %v1845_v41, 16 }
 0x30a   : > { %2195 = vrot.lane.b32.xlu1 %v8946_v6, %s7568_s19  ;;  %2273 = vrot.lane.b32.xlu0 %v8946_v6, %s7567_s28  ;;  %v8956_v11 = vsel %vm7655_vm2, 0, %v1763_v39  ;;  %v2130_v37 = vrot.slane %v8946_v6, 1  ;;  %v2008_v29 = vshll.u32 %v8946_v6, 16  ;;  %v8965_v16 = vpop.permute.xlu1 %2146  ;;  %v2006_v62 = vshrl.u32 %v8946_v6, 16 }
 0x30b   : > { %v2127_v9 = vrot.slane %v8956_v11, 1  ;;  %v1996_v17 = vshll.u32 %v8956_v11, 16  ;;  %v2442_v34 = vsel %vm2313_vm0, %v8695_v48, %v2226_v51  ;;  %v2015_v48 = vrot.slane %v2013_v44, 1 }
 0x30c   : > { %v2010_v2 = vrot.slane %v2008_v29, 1  ;;  %v2132_v23 = vsel %vm849_vm3, %v2130_v37, %v2131_v49  ;;  %v2485_v14 = vsel %vm2346_vm1, %v2442_v34, %v8920_v63  ;;  %v1994_v8 = vshrl.u32 %v8956_v11, 16 }
 0x30d   : > { %v2290_v36 = vpop.permute.xlu0 %2289  ;;  %v2129_v56 = vsel %vm849_vm3, %v2127_v9, %v2128_v1  ;;  %v1998_v53 = vrot.slane %v1996_v17, 1  ;;  %v2003_v63 = vrot.slane %v2001_v38, 1  ;;  %v2356_v51 = vsel %vm2346_vm1, %v2323_v25, %v8852_v31 }
 0x30e   : > { %2193 = vrot.lane.b32.xlu1 %v8956_v11, %s7568_s19  ;;  %2271 = vrot.lane.b32.xlu0 %v8956_v11, %s7567_s28  ;;  %v2011_v27 = vor.u32 %v2010_v2, %v2006_v62  ;;  %v8991_v24 = vpop.permute.xlu1 %2041  ;;  %v2521_v13 = vsel %vm2379_vm5, %v2485_v14, %v2290_v36  ;;  %v2393_v9 = vsel %vm2379_vm5, %v2356_v51, %v8936_v58 }
 0x30f   : > { %7239 = vmatmul.mubr.msk.bf16.gmra.mrb[56].mxu0 %vm2313_vm0, %v2129_v56  ;;  %v1999_v20 = vor.u32 %v1998_v53, %v1994_v8 }
 0x310   : > { %7242 = vmatprep.mubr.msk.bf16.mxu0 %vm2313_vm0, %v2132_v23  ;;  %v8995_v18 = vsel %vm597_vm4, %v2011_v27, %v2015_v48 }
 0x311   : > { %v2288_v32 = vpop.permute.xlu0 %2287  ;;  %v9004_v39 = vsel %vm597_vm4, %v1999_v20, %v2003_v63 }
 0x312   : > { %2243 = vrot.lane.b32.xlu0 %v2132_v23, %s7566_s27  ;;  %2162 = vrot.lane.b32.xlu1 %v2129_v56, %s7567_s28  ;;  %v2518_v52 = vsel %vm2379_vm5, %v2483_v43, %v2288_v32  ;;  %v2040_v41 = vpop.permute.xlu1 %2039 }
 0x313   : > { %2811 = vmatprep.mubr.bf16.mxu1 %v2518_v52  ;;  %v2325_v63 = vsel %vm2313_vm0, %v8655_v50, %v2040_v41  ;;  %v2445_v50 = vsel %vm2313_vm0, %v8684_v54, %v8938_v61 }
 0x314   : > { %2812 = vmatmul.mubr.bf16.gmra.mrb[8].mxu1 %v2390_v30  ;;  %v2358_v54 = vsel %vm2346_vm1, %v2325_v63, %v8965_v16 }
 0x315   : > { %2819 = vmatprep.mubr.bf16.mxu1 %v2521_v13 }
 0x316   : > { %2241 = vrot.lane.b32.xlu0 %v2129_v56, %s7566_s27  ;;  %2057 = vrot.lane.b32.xlu1 %v8995_v18, %s7566_s27 }
 0x31a   : > { %2305 = vrot.lane.b32.xlu0 %v8995_v18, %s7568_s19  ;;  %2055 = vrot.lane.b32.xlu1 %v9004_v39, %s7566_s27 }
 0x31b   : > { %v7212_v60 = vpop.f32.mrb[28].mxu0 }
 0x31c   : > { %v1619_v45 = vadd.f32 %v7543_v47, %v7212_v60  ;;  %v1610_v1 = vpop.f32.mrb[29].mxu0  ;;  %v9017_v37 = vpop.permute.xlu0 %2261  ;;  %2820 = vmatmul.mubr.bf16.gmra.mrb[12].mxu1 %v2393_v9 }
 0x31d   : > { %v1611_v29 = vadd.f32 %v7543_v47, %v1610_v1  ;;  %v7213_v55 = vpop.f32.mrb[30].mxu0  ;;  %v9019_v56 = vpop.permute.xlu1 %2183 }
 0x31e   : > { %v1622_v36 = vadd.f32 %v7543_v47, %v7213_v55  ;;  %v1613_v49 = vpop.f32.mrb[31].mxu0  ;;  %2303 = vrot.lane.b32.xlu0 %v9004_v39, %s7568_s19  ;;  %2164 = vrot.lane.b32.xlu1 %v2132_v23, %s7567_s28  ;;  %v1655_v58 = vmax.f32 %v1619_v45, 0.0 }
 0x31f   : > { %v1614_v31 = vadd.f32 %v7543_v47, %v1613_v49  ;;  %v1653_v10 = vmax.f32 %v1611_v29, 0.0 }
 0x320   : > { %v1656_v2 = vmax.f32 %v1622_v36, 0.0  ;;  %v2260_v17 = vpop.permute.xlu0 %2259 }
 0x321   : > { %v1654_v62 = vmax.f32 %v1614_v31, 0.0  ;;  %v9024_v43 = vpop.permute.xlu1 %2181  ;;  %v2487_v61 = vsel %vm2346_vm1, %v2445_v50, %v2260_v17 }
 0x322   : > { %v1672_v44 = vpack.c.bf16 %v1656_v2, %v1655_v58 }
 0x323   : > { %v1671_v7 = vpack.c.bf16 %v1654_v62, %v1653_v10 }
 0x324   : > { %v1779_v34 = vshrl.u32 %v1672_v44, 16  ;;  %v9026_v32 = vpop.permute.xlu0 %2231  ;;  %v1782_v52 = vshll.u32 %v1672_v44, 16 }
 0x325   : > { %v1772_v27 = vshrl.u32 %v1671_v7, 16  ;;  %v1775_v14 = vshll.u32 %v1671_v7, 16  ;;  %v9032_v20 = vpop.permute.xlu1 %2152 }
 0x326   : > { %v1781_v53 = vrot.slane %v1779_v34, 7 }
 0x327   : > { %v1774_v30 = vrot.slane %v1772_v27, 7  ;;  %v2396_v27 = vsel %vm2379_vm5, %v2358_v54, %v8926_v42 }
 0x328   : > { %v1784_v48 = vor.u32 %v1782_v52, %v1781_v53  ;;  %v2230_v23 = vpop.permute.xlu0 %2229  ;;  %v1848_v13 = vsel %vm7655_vm2, %v1781_v53, 0 }
 0x329   : > { %v1777_v8 = vor.u32 %v1775_v14, %v1774_v30  ;;  %v1847_v38 = vsel %vm7655_vm2, %v1774_v30, 0  ;;  %v2215_v41 = vrot.slane %v1848_v13, 1  ;;  %v2448_v58 = vsel %vm2313_vm0, %v8754_v5, %v2230_v23  ;;  %v2151_v10 = vpop.permute.xlu1 %2150 }
 0x32a   : > { %v1832_v25 = vsel %vm7655_vm2, 0, %v1784_v48  ;;  %v2134_v45 = vrot.slane %v1847_v38, 1  ;;  %v2025_v29 = vshll.u32 %v1847_v38, 16  ;;  %v2489_v16 = vsel %vm2346_vm1, %v2448_v58, %v9017_v37 }
 0x32b   : > { %2277 = vrot.lane.b32.xlu0 %v1832_v25, %s7567_s28  ;;  %v9041_v51 = vsel %vm7655_vm2, 0, %v1777_v8  ;;  %v2214_v60 = vrot.slane %v1832_v25, 1  ;;  %v2204_v31 = vshll.u32 %v1832_v25, 16  ;;  %v2202_v52 = vshrl.u32 %v1832_v25, 16 }
 0x32c   : > { %2197 = vrot.lane.b32.xlu1 %v9041_v51, %s7568_s19  ;;  %v2294_v9 = vpop.permute.xlu0 %2293  ;;  %v2133_v47 = vrot.slane %v9041_v51, 1  ;;  %v2020_v1 = vshll.u32 %v9041_v51, 16  ;;  %v2018_v36 = vshrl.u32 %v9041_v51, 16  ;;  %v2027_v5 = vrot.slane %v2025_v29, 1 }
 0x32d   : > { %v2216_v2 = vsel %vm849_vm3, %v2214_v60, %v2215_v41  ;;  %v2206_v17 = vrot.slane %v2204_v31, 1  ;;  %v2527_v53 = vsel %vm2379_vm5, %v2489_v16, %v2294_v9  ;;  %v2209_v30 = vshll.u32 %v1848_v13, 16  ;;  %v2046_v42 = vpop.permute.xlu1 %2045 }
 0x32e   : > { %v2135_v55 = vsel %vm849_vm3, %v2133_v47, %v2134_v45  ;;  %v2022_v49 = vrot.slane %v2020_v1, 1  ;;  %v2327_v14 = vsel %vm2313_vm0, %v8645_v57, %v8991_v24  ;;  %v2451_v45 = vsel %vm2313_vm0, %v8742_v40, %v9026_v32 }
 0x32f   : > { %2275 = vrot.lane.b32.xlu0 %v9041_v51, %s7567_s28  ;;  %7243 = vmatmul.mubr.msk.bf16.gmra.mrb[60].mxu0 %vm2313_vm0, %v2135_v55  ;;  %v2207_v48 = vor.u32 %v2206_v17, %v2202_v52  ;;  %v2211_v37 = vrot.slane %v2209_v30, 1  ;;  %v2360_v23 = vsel %vm2346_vm1, %v2327_v14, %v8942_v59 }
 0x330   : > { %2166 = vrot.lane.b32.xlu1 %v2135_v55, %s7567_s28  ;;  %7246 = vmatprep.mubr.msk.bf16.mxu0 %vm2313_vm0, %v2216_v2  ;;  %v2292_v62 = vpop.permute.xlu0 %2291  ;;  %v2023_v44 = vor.u32 %v2022_v49, %v2018_v36  ;;  %v2399_v57 = vsel %vm2379_vm5, %v2360_v23, %v9024_v43 }
 0x331   : > { %v2524_v7 = vsel %vm2379_vm5, %v2487_v61, %v2292_v62  ;;  %v9086_v8 = vsel %vm597_vm4, %v2207_v48, %v2211_v37  ;;  %v2044_v24 = vpop.permute.xlu1 %2043 }
 0x332   : > { %2827 = vmatprep.mubr.bf16.mxu1 %v2524_v7  ;;  %v9065_v34 = vsel %vm597_vm4, %v2023_v44, %v2027_v5  ;;  %v2329_v60 = vsel %vm2313_vm0, %v8713_v35, %v2044_v24 }
 0x333   : > { %2245 = vrot.lane.b32.xlu0 %v2135_v55, %s7566_s27  ;;  %2828 = vmatmul.mubr.bf16.gmra.mrb[16].mxu1 %v2396_v27 }
 0x334   : > { %2059 = vrot.lane.b32.xlu1 %v9065_v34, %s7566_s27  ;;  %2835 = vmatprep.mubr.bf16.mxu1 %v2527_v53 }
 0x337   : > { %2307 = vrot.lane.b32.xlu0 %v9065_v34, %s7568_s19  ;;  %7247 = vmatmul.mubr.msk.bf16.gmra.mrb[64].mxu0 %vm2313_vm0, %v7639_v4 }
 0x338   : > { %2199 = vrot.lane.b32.xlu1 %v1832_v25, %s7568_s19 }
 0x33b   : > { %2309 = vrot.lane.b32.xlu0 %v9086_v8, %s7568_s19  ;;  %2836 = vmatmul.mubr.bf16.gmra.mrb[20].mxu1 %v2399_v57 }
 0x33c   : > { %v2266_v38 = vpop.permute.xlu0 %2265  ;;  %3481 = vrot.lane.b32.xlu1 %v7639_v4, %s7567_s28  ;;  %v2188_v13 = vpop.permute.xlu1 %2187 }
 0x33f   : > { %2247 = vrot.lane.b32.xlu0 %v2216_v2, %s7566_s27 }
 0x340   : > { %v2264_v25 = vpop.permute.xlu0 %2263  ;;  %v2186_v63 = vpop.permute.xlu1 %2185 }
 0x341   : > { %v2491_v29 = vsel %vm2346_vm1, %v2451_v45, %v2264_v25 }
 0x343   : > { %2279 = vrot.lane.b32.xlu0 %v7556_v3, %s7567_s28  ;;  %v2362_v3 = vsel %vm2346_vm1, %v2329_v60, %v2151_v10 }
 0x344   : > { %v2236_v59 = vpop.permute.xlu0 %2235  ;;  %v2157_v9 = vpop.permute.xlu1 %2156  ;;  %v2402_v35 = vsel %vm2379_vm5, %v2362_v3, %v9019_v56 }
 0x347   : > { %2311 = vrot.lane.b32.xlu0 %v7639_v4, %s7568_s19 }
 0x348   : > { %v2234_v43 = vpop.permute.xlu0 %2233  ;;  %v2155_v55 = vpop.permute.xlu1 %2154 }
 0x349   : > { %v2454_v1 = vsel %vm2313_vm0, %v8833_v46, %v2234_v43  ;;  %v2331_v46 = vsel %vm2313_vm0, %v8703_v21, %v2046_v42  ;;  %v2457_v21 = vsel %vm2313_vm0, %v8823_v22, %v2236_v59 }
 0x34a   : > { %v2493_v36 = vsel %vm2346_vm1, %v2454_v1, %v2266_v38  ;;  %v2364_v49 = vsel %vm2346_vm1, %v2331_v46, %v9032_v20 }
 0x34b   : > { %v2405_v31 = vsel %vm2379_vm5, %v2364_v49, %v2186_v63 }
 0x34c   : > { %v2298_v47 = vpop.permute.xlu0 %2297  ;;  %v2050_v32 = vpop.permute.xlu1 %2049 }
 0x34d   : > { %v2533_v40 = vsel %vm2379_vm5, %v2493_v36, %v2298_v47  ;;  %v2335_v22 = vsel %vm2313_vm0, %v8778_v33, %v2050_v32 }
 0x350   : > { %v2296_v50 = vpop.permute.xlu0 %2295  ;;  %v2048_v2 = vpop.permute.xlu1 %2047 }
 0x351   : > { %v2530_v41 = vsel %vm2379_vm5, %v2491_v29, %v2296_v50  ;;  %v2333_v44 = vsel %vm2313_vm0, %v8790_v28, %v2048_v2 }
 0x352   : > { %2843 = vmatprep.mubr.bf16.mxu1 %v2530_v41  ;;  %v2366_v27 = vsel %vm2346_vm1, %v2333_v44, %v2155_v55 }
 0x353   : > { %2844 = vmatmul.mubr.bf16.gmra.mrb[24].mxu1 %v2402_v35  ;;  %v2408_v52 = vsel %vm2379_vm5, %v2366_v27, %v2188_v13 }
 0x354   : > { %2851 = vmatprep.mubr.bf16.mxu1 %v2533_v40 }
 0x35b   : > { %2852 = vmatmul.mubr.bf16.gmra.mrb[28].mxu1 %v2405_v31 }
 0x35c   : > { %v2270_v58 = vpop.permute.xlu0 %2269  ;;  %v2192_v56 = vpop.permute.xlu1 %2191 }
 0x360   : > { %v2268_v54 = vpop.permute.xlu0 %2267  ;;  %v2190_v10 = vpop.permute.xlu1 %2189 }
 0x361   : > { %v2495_v16 = vsel %vm2346_vm1, %v2457_v21, %v2268_v54 }
 0x364   : > { %v2240_v61 = vpop.permute.xlu0 %2239  ;;  %v2161_v7 = vpop.permute.xlu1 %2160 }
 0x365   : > { %v2463_v33 = vsel %vm2313_vm0, %v8908_v12, %v2240_v61 }
 0x368   : > { %v2238_v62 = vpop.permute.xlu0 %2237  ;;  %v2159_v14 = vpop.permute.xlu1 %2158 }
 0x369   : > { %v2460_v20 = vsel %vm2313_vm0, %v8923_v19, %v2238_v62  ;;  %v2368_v19 = vsel %vm2346_vm1, %v2335_v22, %v2157_v9 }
 0x36a   : > { %v2497_v28 = vsel %vm2346_vm1, %v2460_v20, %v2270_v58  ;;  %v2411_v48 = vsel %vm2379_vm5, %v2368_v19, %v2190_v10  ;;  %v9153_v58 = vld [vmem:[%s11069_s4] ss:$0 sm:$0xff] }
 0x36c   : > { %v2302_v5 = vpop.permute.xlu0 %2301  ;;  %v2054_v42 = vpop.permute.xlu1 %2053 }
 0x36d   : > { %v2539_v30 = vsel %vm2379_vm5, %v2497_v28, %v2302_v5  ;;  %v2339_v12 = vsel %vm2313_vm0, %v8856_v0, %v2054_v42 }
 0x36e   : > { %v2372_v50 = vsel %vm2346_vm1, %v2339_v12, %v2161_v7 }
 0x370   : > { %v2300_v17 = vpop.permute.xlu0 %2299  ;;  %v2052_v23 = vpop.permute.xlu1 %2051 }
 0x371   : > { %v2536_v53 = vsel %vm2379_vm5, %v2495_v16, %v2300_v17  ;;  %v2337_v59 = vsel %vm2313_vm0, %v8866_v26, %v2052_v23 }
 0x372   : > { %2859 = vmatprep.mubr.bf16.mxu1 %v2536_v53  ;;  %v2370_v60 = vsel %vm2346_vm1, %v2337_v59, %v2159_v14 }
 0x373   : > { %2860 = vmatmul.mubr.bf16.gmra.mrb[32].mxu1 %v2408_v52  ;;  %v2414_v3 = vsel %vm2379_vm5, %v2370_v60, %v2192_v56 }
 0x374   : > { %2867 = vmatprep.mubr.bf16.mxu1 %v2539_v30 }
 0x37b   : > { %2868 = vmatmul.mubr.bf16.gmra.mrb[36].mxu1 %v2411_v48 }
 0x37c   : > { %v2274_v37 = vpop.permute.xlu0 %2273  ;;  %v2196_v24 = vpop.permute.xlu1 %2195 }
 0x380   : > { %v2272_v57 = vpop.permute.xlu0 %2271  ;;  %v2194_v25 = vpop.permute.xlu1 %2193 }
 0x381   : > { %v2499_v9 = vsel %vm2346_vm1, %v2463_v33, %v2272_v57  ;;  %v2417_v41 = vsel %vm2379_vm5, %v2372_v50, %v2194_v25 }
 0x384   : > { %v2244_v38 = vpop.permute.xlu0 %2243  ;;  %v2163_v47 = vpop.permute.xlu1 %2162 }
 0x385   : > { %v2469_v16 = vsel %vm2313_vm0, %v8995_v18, %v2244_v38 }
 0x388   : > { %v2242_v13 = vpop.permute.xlu0 %2241 }
 0x389   : > { %v2466_v43 = vsel %vm2313_vm0, %v9004_v39, %v2242_v13  ;;  %v2058_v39 = vpop.permute.xlu1 %2057 }
 0x38a   : > { %v2501_v26 = vsel %vm2346_vm1, %v2466_v43, %v2274_v37 }
 0x38c   : > { %v2306_v63 = vpop.permute.xlu0 %2305 }
 0x38d   : > { %v2545_v29 = vsel %vm2379_vm5, %v2501_v26, %v2306_v63  ;;  %v2056_v35 = vpop.permute.xlu1 %2055 }
 0x38e   : > { %v2341_v10 = vsel %vm2313_vm0, %v8956_v11, %v2056_v35  ;;  %v7472_v35 = vld [vmem:[%s11070_s5] sm:$0xff]  }
 0x38f   : > { %v2374_v17 = vsel %vm2346_vm1, %v2341_v10, %v2163_v47 }
 0x390   : > { %v2304_v45 = vpop.permute.xlu0 %2303  ;;  %v2420_v19 = vsel %vm2379_vm5, %v2374_v17, %v2196_v24  ;;  %v2343_v24 = vsel %vm2313_vm0, %v8946_v6, %v2058_v39 }
 0x391   : > { %v2542_v1 = vsel %vm2379_vm5, %v2499_v9, %v2304_v45  ;;  %v2165_v2 = vpop.permute.xlu1 %2164 }
 0x392   : > { %2875 = vmatprep.mubr.bf16.mxu1 %v2542_v1  ;;  %v2376_v60 = vsel %vm2346_vm1, %v2343_v24, %v2165_v2 }
 0x393   : > { %2876 = vmatmul.mubr.bf16.gmra.mrb[40].mxu1 %v2414_v3 }
 0x394   : > { %2883 = vmatprep.mubr.bf16.mxu1 %v2545_v29 }
 0x39b   : > { %v6576_v55 = vpop.f32.mrb[32].mxu0  ;;  %2884 = vmatmul.mubr.bf16.gmra.mrb[44].mxu1 %v2417_v41 }
 0x39c   : > { %v6577_v36 = vpop.f32.mrb[33].mxu0 }
 0x39d   : > { %v2278_v40 = vpop.permute.xlu0 %2277  ;;  %v6578_v46 = vadd.f32 %v6577_v36, %v6576_v55  ;;  %v6579_v32 = vpop.f32.mrb[34].mxu0  ;;  %v7471_v55 = vld [vmem:[%s11070_s5 + $0x40] sm:$0xff]  }
 0x39e   : > { %v6580_v49 = vpop.f32.mrb[35].mxu0  ;;  %v2198_v21 = vpop.permute.xlu1 %2197  ;;  %6690 = vmatprep.subr.bf16.mxu0 %v7471_v55 }
 0x39f   : > { %v6581_v31 = vadd.f32 %v6580_v49, %v6579_v32  ;;  %v2790_v56 = vadd.f32 %v6578_v46, %v9153_v58  ;;  %v2423_v47 = vsel %vm2379_vm5, %v2376_v60, %v2198_v21  ;;  %6691 = vmatpush3.bf16.msra.mxu0 %v7472_v35  ;;  %v7474_v21 = vld [vmem:[%s11070_s5 + $0x8] sm:$0xff]   ;;  %v7484_v60 = vld [vmem:[%s11070_s5 + $0x30] sm:$0xff]   ;;  %v7486_v35 = vld [vmem:[%s11070_s5 + $0x38] sm:$0xff]  }
 0x3a1   : > { %v2276_v0 = vpop.permute.xlu0 %2275  ;;  %v2793_v7 = vadd.f32 %v6581_v31, %v9153_v58 }
 0x3a2   : > { %v2503_v53 = vsel %vm2346_vm1, %v2469_v16, %v2276_v0  ;;  %v2167_v48 = vpop.permute.xlu1 %2166  ;;  %v7477_v16 = vld [vmem:[%s11070_s5 + $0x58] sm:$0xff]  }
 0x3a3   : > { %v9155_v54 = vpop.f32.mrb[36].mxu0 }
 0x3a4   : > { %v2950_v61 = vpop.f32.mrb[37].mxu0 }
 0x3a5   : > { %v2246_v62 = vpop.permute.xlu0 %2245  ;;  %v2951_v44 = vadd.f32 %v2950_v61, %v2790_v56  ;;  %v9160_v5 = vpop.f32.mrb[38].mxu0 }
 0x3a6   : > { %v2953_v20 = vpop.f32.mrb[39].mxu0  ;;  %v2472_v11 = vsel %vm2313_vm0, %v9065_v34, %v2246_v62  ;;  %v2060_v9 = vpop.permute.xlu1 %2059 }
 0x3a7   : > { %v2954_v27 = vadd.f32 %v2953_v20, %v2793_v7  ;;  %v3077_v52 = vmax.f32 %v2951_v44, 0.0  ;;  %v2505_v38 = vsel %vm2346_vm1, %v2472_v11, %v2278_v40  ;;  %v2345_v36 = vsel %vm2313_vm0, %v9041_v51, %v2060_v9  ;;  %v7473_v7 = vld [vmem:[%s11070_s5 + $0x48] sm:$0xff]   ;;  %v7475_v20 = vld [vmem:[%s11070_s5 + $0x50] sm:$0xff]   ;;  %v7479_v11 = vld [vmem:[%s11070_s5 + $0x60] sm:$0xff]  }
 0x3a8   : > { %v2378_v61 = vsel %vm2346_vm1, %v2345_v36, %v2167_v48  ;;  %6692 = vmatprep.subr.bf16.mxu0 %v7473_v7 }
 0x3a9   : > { %v3078_v28 = vmax.f32 %v2954_v27, 0.0  ;;  %v2308_v30 = vpop.permute.xlu0 %2307  ;;  %6693 = vmatpush3.bf16.msra.mxu0 %v7474_v21  ;;  %v7476_v27 = vld [vmem:[%s11070_s5 + $0x10] sm:$0xff]  }
 0x3aa   : > { %v2548_v14 = vsel %vm2379_vm5, %v2503_v53, %v2308_v30  ;;  %v2200_v40 = vpop.permute.xlu1 %2199  ;;  %6694 = vmatprep.subr.bf16.mxu0 %v7475_v20 }
 0x3ab   : > { %v3109_v22 = vpack.c.bf16 %v3078_v28, %v3077_v52  ;;  %2891 = vmatprep.mubr.bf16.mxu1 %v2548_v14  ;;  %v9171_v42 = vpop.f32.mrb[40].mxu0  ;;  %v7478_v28 = vld [vmem:[%s11070_s5 + $0x18] sm:$0xff]   ;;  %v7480_v14 = vld [vmem:[%s11070_s5 + $0x20] sm:$0xff]  }
 0x3ac   : > { %2892 = vmatmul.mubr.bf16.gmra.mrb[48].mxu1 %v2420_v19  ;;  %v9173_v18 = vpop.f32.mrb[41].mxu0 }
 0x3ad   : > { %v3126_v37 = vshrl.u32 %v3109_v22, 16  ;;  %v2310_v23 = vpop.permute.xlu0 %2309  ;;  %v9175_v57 = vpop.f32.mrb[42].mxu0  ;;  %v3129_v59 = vshll.u32 %v3109_v22, 16  ;;  %6695 = vmatpush3.bf16.msra.mxu0 %v7476_v27  ;;  %v7481_v22 = vld [vmem:[%s11070_s5 + $0x68] sm:$0xff]  }
 0x3ae   : > { %v2551_v34 = vsel %vm2379_vm5, %v2505_v38, %v2310_v23  ;;  %v9179_v13 = vpop.f32.mrb[43].mxu0  ;;  %6696 = vmatprep.subr.bf16.mxu0 %v7477_v16  ;;  %v7482_v38 = vld [vmem:[%s11070_s5 + $0x28] sm:$0xff]  }
 0x3af   : > { %v3128_v25 = vrot.slane %v3126_v37, 7  ;;  %2899 = vmatprep.mubr.bf16.mxu1 %v2551_v34 }
 0x3b1   : > { %v3131_v63 = vor.u32 %v3129_v59, %v3128_v25  ;;  %v9185_v33 = vsel %vm7655_vm2, %v3128_v25, 0  ;;  %v2248_v43 = vpop.permute.xlu0 %2247  ;;  %6697 = vmatpush3.bf16.msra.mxu0 %v7478_v28  ;;  %v7483_v25 = vld [vmem:[%s11070_s5 + $0x70] sm:$0xff]  }
 0x3b2   : > { %v3309_v26 = vshll.u32 %v9185_v33, 16  ;;  %v2475_v46 = vsel %vm2313_vm0, %v9086_v8, %v2248_v43  ;;  %v2426_v8 = vsel %vm2379_vm5, %v2378_v61, %v2200_v40  ;;  %6698 = vmatprep.subr.bf16.mxu0 %v7479_v11 }
 0x3b3   : > { %v9189_v45 = vpop.f32.mrb[44].mxu0  ;;  %v9193_v1 = vsel %vm7655_vm2, 0, %v3131_v63 }
 0x3b4   : > { %2900 = vmatmul.mubr.bf16.gmra.mrb[52].mxu1 %v2423_v47  ;;  %v9195_v3 = vpop.f32.mrb[45].mxu0  ;;  %3589 = vrot.lane.b32.xlu0 %v9193_v1, %s7567_s28  ;;  %v3304_v6 = vshll.u32 %v9193_v1, 16  ;;  %v3302_v50 = vshrl.u32 %v9193_v1, 16  ;;  %v3311_v49 = vrot.slane %v3309_v26, 1 }
 0x3b5   : > { %v2280_v29 = vpop.permute.xlu0 %2279  ;;  %v9201_v12 = vpop.f32.mrb[46].mxu0  ;;  %6699 = vmatpush3.bf16.msra.mxu0 %v7480_v14 }
 0x3b6   : > { %v9203_v39 = vpop.f32.mrb[47].mxu0  ;;  %v3306_v41 = vrot.slane %v3304_v6, 1  ;;  %v2507_v31 = vsel %vm2346_vm1, %v2475_v46, %v2280_v29  ;;  %6700 = vmatprep.subr.bf16.mxu0 %v7481_v22 }
 0x3b8   : > { %v3307_v32 = vor.u32 %v3306_v41, %v3302_v50 }
 0x3b9   : > { %v2312_v0 = vpop.permute.xlu0 %2311  ;;  %6701 = vmatpush3.bf16.msra.mxu0 %v7482_v38 }
 0x3ba   : > { %v2554_v2 = vsel %vm2379_vm5, %v2507_v31, %v2312_v0  ;;  %v9219_v56 = vsel %vm597_vm4, %v3307_v32, %v3311_v49  ;;  %6702 = vmatprep.subr.bf16.mxu0 %v7483_v25 }
 0x3bb   : > { %2907 = vmatprep.mubr.bf16.mxu1 %v2554_v2  ;;  %v9222_v51 = vpop.f32.mrb[48].mxu0  ;;  %3483 = vrot.lane.b32.xlu1 %v9219_v56, %s7567_s28 }
 0x3bc   : > { %2908 = vmatmul.mubr.bf16.gmra.mrb[56].mxu1 %v2426_v8  ;;  %v9227_v10 = vpop.f32.mrb[49].mxu0 }
 0x3bd   : > { %v9229_v62 = vpop.f32.mrb[50].mxu0  ;;  %6703 = vmatpush3.bf16.msra.mxu0 %v7484_v60 }
 0x3be   : > { %v9231_v44 = vpop.f32.mrb[51].mxu0 }
 0x3c3   : > { %v9248_v17 = vpop.f32.mrb[52].mxu0 }
 0x3c4   : > { %v9250_v53 = vpop.f32.mrb[53].mxu0 }
 0x3c5   : > { %v9252_v52 = vpop.f32.mrb[54].mxu0 }
 0x3c6   : > { %v9257_v30 = vpop.f32.mrb[55].mxu0 }
 0x3cb   : > { %v6582_v19 = vpop.f32.mrb[0].mxu1 }
 0x3cc   : > { %v6583_v48 = vpop.f32.mrb[1].mxu1 }
 0x3cd   : > { %v6584_v37 = vadd.f32 %v6583_v48, %v6582_v19  ;;  %v6585_v23 = vpop.f32.mrb[2].mxu1 }
 0x3ce   : > { %v6586_v34 = vpop.f32.mrb[3].mxu1 }
 0x3cf   : > { %v2798_v59 = vadd.f32 %v6584_v37, %v9153_v58  ;;  %v6587_v24 = vadd.f32 %v6586_v34, %v6585_v23 }
 0x3d1   : > { %v2959_v63 = vadd.f32 %v9155_v54, %v2798_v59  ;;  %v2801_v43 = vadd.f32 %v6587_v24, %v9153_v58  ;;  %v7485_v54 = vld [vmem:[%s11070_s5 + $0x78] sm:$0xff]  }
 0x3d2   : > { %6704 = vmatprep.subr.bf16.mxu0 %v7485_v54 }
 0x3d3   : > { %v2962_v9 = vadd.f32 %v9160_v5, %v2801_v43  ;;  %v6588_v47 = vpop.f32.mrb[4].mxu1  ;;  %v3079_v26 = vmax.f32 %v2959_v63, 0.0  ;;  %6705 = vmatpush3.bf16.msra.mxu0 %v7486_v35 }
 0x3d4   : > { %v6589_v6 = vpop.f32.mrb[5].mxu1 }
 0x3d5   : > { %v3080_v29 = vmax.f32 %v2962_v9, 0.0  ;;  %v6590_v50 = vadd.f32 %v6589_v6, %v6588_v47  ;;  %v6591_v41 = vpop.f32.mrb[6].mxu1 }
 0x3d6   : > { %v6592_v55 = vpop.f32.mrb[7].mxu1 }
 0x3d7   : > { %v3110_v36 = vpack.c.bf16 %v3080_v29, %v3079_v26  ;;  %v2806_v40 = vadd.f32 %v6590_v50, %v9153_v58  ;;  %v6593_v5 = vadd.f32 %v6592_v55, %v6591_v41 }
 0x3d9   : > { %v3133_v46 = vshrl.u32 %v3110_v36, 16  ;;  %v2967_v32 = vadd.f32 %v9173_v18, %v2806_v40  ;;  %v2809_v49 = vadd.f32 %v6593_v5, %v9153_v58  ;;  %v3136_v0 = vshll.u32 %v3110_v36, 16 }
 0x3db   : > { %v3135_v31 = vrot.slane %v3133_v46, 7  ;;  %v2970_v2 = vadd.f32 %v9179_v13, %v2809_v49  ;;  %v3081_v61 = vmax.f32 %v2967_v32, 0.0 }
 0x3dd   : > { %v3082_v8 = vmax.f32 %v2970_v2, 0.0  ;;  %v3138_v7 = vor.u32 %v3136_v0, %v3135_v31  ;;  %v9293_v21 = vsel %vm7655_vm2, %v3135_v31, 0 }
 0x3de   : > { %v3321_v16 = vshll.u32 %v9293_v21, 16 }
 0x3df   : > { %v3111_v20 = vpack.c.bf16 %v3082_v8, %v3081_v61  ;;  %v9297_v27 = vsel %vm7655_vm2, 0, %v3138_v7 }
 0x3e0   : > { %3591 = vrot.lane.b32.xlu0 %v9297_v27, %s7567_s28  ;;  %v3316_v18 = vshll.u32 %v9297_v27, 16  ;;  %v3314_v11 = vshrl.u32 %v9297_v27, 16  ;;  %v3323_v38 = vrot.slane %v3321_v16, 1 }
 0x3e1   : > { %v3140_v13 = vshrl.u32 %v3111_v20, 16  ;;  %v3143_v19 = vshll.u32 %v3111_v20, 16 }
 0x3e2   : > { %v9303_v28 = vpop.f32.mrb[56].mxu0  ;;  %v3318_v14 = vrot.slane %v3316_v18, 1 }
 0x3e3   : > { %v3142_v22 = vrot.slane %v3140_v13, 7  ;;  %v9306_v48 = vpop.f32.mrb[57].mxu0 }
 0x3e4   : > { %v9308_v37 = vpop.f32.mrb[58].mxu0  ;;  %v3319_v23 = vor.u32 %v3318_v14, %v3314_v11 }
 0x3e5   : > { %v9310_v34 = vpop.f32.mrb[59].mxu0  ;;  %v3145_v25 = vor.u32 %v3143_v19, %v3142_v22  ;;  %v9314_v59 = vsel %vm7655_vm2, %v3142_v22, 0 }
 0x3e6   : > { %v9317_v24 = vsel %vm597_vm4, %v3319_v23, %v3323_v38  ;;  %v3333_v47 = vshll.u32 %v9314_v59, 16 }
 0x3e7   : > { %3485 = vrot.lane.b32.xlu1 %v9317_v24, %s7567_s28  ;;  %v6594_v63 = vpop.f32.mrb[8].mxu1  ;;  %v9323_v43 = vsel %vm7655_vm2, 0, %v3145_v25 }
 0x3e8   : > { %3593 = vrot.lane.b32.xlu0 %v9323_v43, %s7567_s28  ;;  %v6595_v60 = vpop.f32.mrb[9].mxu1  ;;  %v3328_v9 = vshll.u32 %v9323_v43, 16  ;;  %v3326_v50 = vshrl.u32 %v9323_v43, 16  ;;  %v3335_v36 = vrot.slane %v3333_v47, 1 }
 0x3e9   : > { %v6596_v6 = vadd.f32 %v6595_v60, %v6594_v63  ;;  %v6597_v26 = vpop.f32.mrb[10].mxu1 }
 0x3ea   : > { %v6598_v29 = vpop.f32.mrb[11].mxu1  ;;  %v3330_v41 = vrot.slane %v3328_v9, 1 }
 0x3eb   : > { %v2814_v55 = vadd.f32 %v6596_v6, %v9153_v58  ;;  %v6599_v54 = vadd.f32 %v6598_v29, %v6597_v26 }
 0x3ec   : > { %v3331_v35 = vor.u32 %v3330_v41, %v3326_v50 }
 0x3ed   : > { %v2975_v40 = vadd.f32 %v9171_v42, %v2814_v55  ;;  %v2817_v5 = vadd.f32 %v6599_v54, %v9153_v58 }
 0x3ee   : > { %v9334_v46 = vsel %vm597_vm4, %v3331_v35, %v3335_v36 }
 0x3ef   : > { %v2978_v32 = vadd.f32 %v9175_v57, %v2817_v5  ;;  %3487 = vrot.lane.b32.xlu1 %v9334_v46, %s7567_s28  ;;  %v6600_v49 = vpop.f32.mrb[12].mxu1  ;;  %v3083_v0 = vmax.f32 %v2975_v40, 0.0 }
 0x3f0   : > { %v6601_v31 = vpop.f32.mrb[13].mxu1 }
 0x3f1   : > { %v3084_v2 = vmax.f32 %v2978_v32, 0.0  ;;  %v6602_v61 = vadd.f32 %v6601_v31, %v6600_v49  ;;  %v6603_v8 = vpop.f32.mrb[14].mxu1 }
 0x3f2   : > { %v6604_v7 = vpop.f32.mrb[15].mxu1 }
 0x3f3   : > { %v3112_v20 = vpack.c.bf16 %v3084_v2, %v3083_v0  ;;  %v2822_v42 = vadd.f32 %v6602_v61, %v9153_v58  ;;  %v6605_v18 = vadd.f32 %v6604_v7, %v6603_v8 }
 0x3f5   : > { %v3147_v16 = vshrl.u32 %v3112_v20, 16  ;;  %v2983_v13 = vadd.f32 %v9195_v3, %v2822_v42  ;;  %v2825_v11 = vadd.f32 %v6605_v18, %v9153_v58  ;;  %v3150_v14 = vshll.u32 %v3112_v20, 16 }
 0x3f7   : > { %v3149_v57 = vrot.slane %v3147_v16, 7  ;;  %v2986_v22 = vadd.f32 %v9203_v39, %v2825_v11  ;;  %v3085_v19 = vmax.f32 %v2983_v13, 0.0 }
 0x3f9   : > { %v3086_v23 = vmax.f32 %v2986_v22, 0.0  ;;  %v3152_v38 = vor.u32 %v3150_v14, %v3149_v57  ;;  %v9345_v25 = vsel %vm7655_vm2, %v3149_v57, 0 }
 0x3fa   : > { %v3345_v9 = vshll.u32 %v9345_v25, 16 }
 0x3fb   : > { %v3113_v63 = vpack.c.bf16 %v3086_v23, %v3085_v19  ;;  %v9349_v60 = vsel %vm7655_vm2, 0, %v3152_v38 }
 0x3fc   : > { %3595 = vrot.lane.b32.xlu0 %v9349_v60, %s7567_s28  ;;  %v3340_v3 = vshll.u32 %v9349_v60, 16  ;;  %v3338_v47 = vshrl.u32 %v9349_v60, 16  ;;  %v3347_v41 = vrot.slane %v3345_v9, 1 }
 0x3fd   : > { %v3154_v39 = vshrl.u32 %v3113_v63, 16  ;;  %v3157_v29 = vshll.u32 %v3113_v63, 16 }
 0x3fe   : > { %v3342_v6 = vrot.slane %v3340_v3, 1 }
 0x3ff   : > { %v3156_v26 = vrot.slane %v3154_v39, 7 }
 0x400   : > { %v3343_v50 = vor.u32 %v3342_v6, %v3338_v47 }
 0x401   : > { %v3159_v55 = vor.u32 %v3157_v29, %v3156_v26  ;;  %v9358_v54 = vsel %vm7655_vm2, %v3156_v26, 0 }
 0x402   : > { %v9360_v35 = vpop.f32.mrb[60].mxu0  ;;  %v9363_v36 = vsel %vm597_vm4, %v3343_v50, %v3347_v41  ;;  %v3357_v31 = vshll.u32 %v9358_v54, 16 }
 0x403   : > { %v9365_v40 = vpop.f32.mrb[61].mxu0  ;;  %3489 = vrot.lane.b32.xlu1 %v9363_v36, %s7567_s28  ;;  %v9371_v5 = vsel %vm7655_vm2, 0, %v3159_v55 }
 0x404   : > { %v9373_v32 = vpop.f32.mrb[62].mxu0  ;;  %3597 = vrot.lane.b32.xlu0 %v9371_v5, %s7567_s28  ;;  %v3352_v49 = vshll.u32 %v9371_v5, 16  ;;  %v3350_v61 = vshrl.u32 %v9371_v5, 16  ;;  %v3359_v16 = vrot.slane %v3357_v31, 1 }
 0x405   : > { %v9379_v0 = vpop.f32.mrb[63].mxu0 }
 0x406   : > { %v6606_v2 = vpop.f32.mrb[16].mxu1  ;;  %v3354_v8 = vrot.slane %v3352_v49, 1 }
 0x407   : > { %v6607_v7 = vpop.f32.mrb[17].mxu1 }
 0x408   : > { %v6608_v20 = vadd.f32 %v6607_v7, %v6606_v2  ;;  %v6609_v42 = vpop.f32.mrb[18].mxu1  ;;  %v3355_v18 = vor.u32 %v3354_v8, %v3350_v61 }
 0x409   : > { %v6610_v13 = vpop.f32.mrb[19].mxu1 }
 0x40a   : > { %v2830_v11 = vadd.f32 %v6608_v20, %v9153_v58  ;;  %v6611_v57 = vadd.f32 %v6610_v13, %v6609_v42  ;;  %v9384_v14 = vsel %vm597_vm4, %v3355_v18, %v3359_v16  ;;  %v9391_v3 = vpop.f32.mrb[64].mxu0 }
 0x40b   : > { %3491 = vrot.lane.b32.xlu1 %v9384_v14, %s7567_s28  ;;  %v9393_v26 = vpop.f32.mrb[65].mxu0 }
 0x40c   : > { %v2991_v22 = vadd.f32 %v9189_v45, %v2830_v11  ;;  %v2833_v19 = vadd.f32 %v6611_v57, %v9153_v58  ;;  %v9395_v50 = vpop.f32.mrb[66].mxu0 }
 0x40d   : > { %v9398_v49 = vpop.f32.mrb[67].mxu0 }
 0x40e   : > { %v2994_v23 = vadd.f32 %v9201_v12, %v2833_v19  ;;  %v6612_v38 = vpop.f32.mrb[20].mxu1  ;;  %v3087_v9 = vmax.f32 %v2991_v22, 0.0 }
 0x40f   : > { %v6613_v63 = vpop.f32.mrb[21].mxu1 }
 0x410   : > { %v3088_v39 = vmax.f32 %v2994_v23, 0.0  ;;  %v6614_v47 = vadd.f32 %v6613_v63, %v6612_v38  ;;  %v6615_v6 = vpop.f32.mrb[22].mxu1 }
 0x411   : > { %v6616_v29 = vpop.f32.mrb[23].mxu1 }
 0x412   : > { %v3114_v41 = vpack.c.bf16 %v3088_v39, %v3087_v9  ;;  %v2838_v45 = vadd.f32 %v6614_v47, %v9153_v58  ;;  %v6617_v55 = vadd.f32 %v6616_v29, %v6615_v6  ;;  %v7487_v39 = vld [vmem:[%s11070_s5 + $0x100] sm:$0xff]  }
 0x413   : > { %7250 = vmatprep.subr.bf16.mxu0 %v7487_v39 }
 0x414   : > { %v3161_v12 = vshrl.u32 %v3114_v41, 16  ;;  %v2999_v31 = vadd.f32 %v9227_v10, %v2838_v45  ;;  %v2841_v2 = vadd.f32 %v6617_v55, %v9153_v58  ;;  %v3164_v8 = vshll.u32 %v3114_v41, 16 }
 0x416   : > { %v3163_v61 = vrot.slane %v3161_v12, 7  ;;  %v3002_v7 = vadd.f32 %v9231_v44, %v2841_v2  ;;  %v3089_v20 = vmax.f32 %v2999_v31, 0.0  ;;  %v7488_v12 = vld [vmem:[%s11070_s5 + $0xc0] sm:$0xff]  }
 0x417   : > { %v7489_v31 = vld [vmem:[%s11070_s5 + $0x80] sm:$0xff]   ;;  %6802 = vmatprep.subr.bf16.mxu1 %v7488_v12 }
 0x418   : > { %v3090_v42 = vmax.f32 %v3002_v7, 0.0  ;;  %v3166_v18 = vor.u32 %v3164_v8, %v3163_v61  ;;  %v9405_v16 = vsel %vm7655_vm2, %v3163_v61, 0  ;;  %6803 = vmatpush3.bf16.msra.mxu1 %v7489_v31 }
 0x419   : > { %v3369_v57 = vshll.u32 %v9405_v16, 16 }
 0x41a   : > { %v3115_v13 = vpack.c.bf16 %v3090_v42, %v3089_v20  ;;  %v9409_v11 = vsel %vm7655_vm2, 0, %v3166_v18  ;;  %v11092_v20 = vmov 0 }
 0x41b   : > { %3599 = vrot.lane.b32.xlu0 %v9409_v11, %s7567_s28  ;;  %v3364_v10 = vshll.u32 %v9409_v11, 16  ;;  %v3362_v22 = vshrl.u32 %v9409_v11, 16  ;;  %v3371_v9 = vrot.slane %v3369_v57, 1  ;;  %v11093_v20 = vsel %vm9444_vm6, 4294967295, %v11092_v20 }
 0x41c   : > { %v3168_v44 = vshrl.u32 %v3115_v13, 16  ;;  %v3171_v38 = vshll.u32 %v3115_v13, 16  ;;  %11094 = vst [vmem:[#allocation3_spill] sm:$0xff] %v11093_v20 }
 0x41d   : > { %v3366_v19 = vrot.slane %v3364_v10, 1 }
 0x41e   : > { %v3170_v23 = vrot.slane %v3168_v44, 7 }
 0x41f   : > { %v3367_v63 = vor.u32 %v3366_v19, %v3362_v22  ;;  %v9450_v22 = vpop.permute.xlu1 %3481 }
 0x420   : > { %v3173_v47 = vor.u32 %v3171_v38, %v3170_v23  ;;  %v9421_v6 = vsel %vm7655_vm2, %v3170_v23, 0  ;;  %11095 = vst [vmem:[#allocation4_spill] sm:$0xff] %v9450_v22 }
 0x421   : > { %v9424_v29 = vsel %vm597_vm4, %v3367_v63, %v3371_v9  ;;  %v3381_v55 = vshll.u32 %v9421_v6, 16 }
 0x422   : > { %3493 = vrot.lane.b32.xlu1 %v9424_v29, %s7567_s28  ;;  %v9430_v41 = vsel %vm7655_vm2, 0, %v3173_v47 }
 0x423   : > { %3601 = vrot.lane.b32.xlu0 %v9430_v41, %s7567_s28  ;;  %v3376_v45 = vshll.u32 %v9430_v41, 16  ;;  %v3374_v2 = vshrl.u32 %v9430_v41, 16  ;;  %v3383_v10 = vrot.slane %v3381_v55, 1 }
 0x425   : > { %v3378_v61 = vrot.slane %v3376_v45, 1 }
 0x426   : > { %v3590_v8 = vpop.permute.xlu0 %3589  ;;  %v6618_v7 = vpop.f32.mrb[24].mxu1 }
 0x427   : > { %v6619_v42 = vpop.f32.mrb[25].mxu1  ;;  %v3720_v18 = vsel %vm2346_vm1, %v7639_v4, %v3590_v8  ;;  %v3379_v13 = vor.u32 %v3378_v61, %v3374_v2 }
 0x428   : > { %v6620_v57 = vadd.f32 %v6619_v42, %v6618_v7  ;;  %v6621_v44 = vpop.f32.mrb[26].mxu1  ;;  %4209 = vmatprep.mubr.bf16.mxu0 %v3720_v18  ;;  %v7490_v7 = vld [vmem:[%s11070_s5 + $0xc8] sm:$0xff]  }
 0x429   : > { %v6622_v19 = vpop.f32.mrb[27].mxu1  ;;  %v9453_v23 = vsel %vm597_vm4, %v3379_v13, %v3383_v10  ;;  %6462 = vmatmul.mubr.msk.bf16.vlgmr.msra.gmra.mrb[68].mxu0 %vm9444_vm6, %v9450_v22  ;;  %6804 = vmatprep.subr.bf16.mxu1 %v7490_v7 }
 0x42a   : > { %v2846_v38 = vadd.f32 %v6620_v57, %v9153_v58  ;;  %v6623_v63 = vadd.f32 %v6622_v19, %v6621_v44  ;;  %3495 = vrot.lane.b32.xlu1 %v9453_v23, %s7567_s28  ;;  %7251 = vmatpush3.bf16.msra.mxu0 %v7487_v39 }
 0x42c   : > { %v3007_v9 = vadd.f32 %v9222_v51, %v2846_v38  ;;  %v2849_v47 = vadd.f32 %v6623_v63, %v9153_v58  ;;  %v7491_v51 = vld [vmem:[%s11070_s5 + $0x88] sm:$0xff]  }
 0x42d   : > { %6805 = vmatpush3.bf16.msra.mxu1 %v7491_v51  ;;  %v7492_v51 = vld [vmem:[%s11070_s5 + $0x108] sm:$0xff]  }
 0x42e   : > { %v3010_v45 = vadd.f32 %v9229_v62, %v2849_v47  ;;  %v6624_v55 = vpop.f32.mrb[28].mxu1  ;;  %v3091_v31 = vmax.f32 %v3007_v9, 0.0  ;;  %7252 = vmatprep.subr.bf16.mxu0 %v7492_v51 }
 0x42f   : > { %v6625_v12 = vpop.f32.mrb[29].mxu1  ;;  %7253 = vmatpush3.bf16.msra.mxu0 %v7492_v51 }
 0x430   : > { %v3092_v2 = vmax.f32 %v3010_v45, 0.0  ;;  %v6626_v61 = vadd.f32 %v6625_v12, %v6624_v55  ;;  %v6627_v8 = vpop.f32.mrb[30].mxu1 }
 0x431   : > { %v6628_v42 = vpop.f32.mrb[31].mxu1 }
 0x432   : > { %v3116_v18 = vpack.c.bf16 %v3092_v2, %v3091_v31  ;;  %v2854_v39 = vadd.f32 %v6626_v61, %v9153_v58  ;;  %v6629_v13 = vadd.f32 %v6628_v42, %v6627_v8 }
 0x434   : > { %v3175_v62 = vshrl.u32 %v3116_v18, 16  ;;  %v3015_v10 = vadd.f32 %v9250_v53, %v2854_v39  ;;  %v2857_v57 = vadd.f32 %v6629_v13, %v9153_v58  ;;  %v3178_v19 = vshll.u32 %v3116_v18, 16 }
 0x436   : > { %v3177_v44 = vrot.slane %v3175_v62, 7  ;;  %v3018_v38 = vadd.f32 %v9257_v30, %v2857_v57  ;;  %v3093_v63 = vmax.f32 %v3015_v10, 0.0  ;;  %v7493_v62 = vld [vmem:[%s11070_s5 + $0xd0] sm:$0xff]  }
 0x437   : > { %v7494_v57 = vld [vmem:[%s11070_s5 + $0x90] sm:$0xff]   ;;  %6806 = vmatprep.subr.bf16.mxu1 %v7493_v62 }
 0x438   : > { %v3094_v9 = vmax.f32 %v3018_v38, 0.0  ;;  %v3180_v47 = vor.u32 %v3178_v19, %v3177_v44  ;;  %v9476_v45 = vsel %vm7655_vm2, %v3177_v44, 0  ;;  %6807 = vmatpush3.bf16.msra.mxu1 %v7494_v57  ;;  %v3543_v57 = vrot.slane %v9193_v1, 1 }
 0x439   : > { %v3393_v31 = vshll.u32 %v9476_v45, 16 }
 0x43a   : > { %v3117_v55 = vpack.c.bf16 %v3094_v9, %v3093_v63  ;;  %v9480_v12 = vsel %vm7655_vm2, 0, %v3180_v47 }
 0x43b   : > { %3603 = vrot.lane.b32.xlu0 %v9480_v12, %s7567_s28  ;;  %v3388_v53 = vshll.u32 %v9480_v12, 16  ;;  %v3386_v2 = vshrl.u32 %v9480_v12, 16  ;;  %v3395_v18 = vrot.slane %v3393_v31, 1 }
 0x43c   : > { %v3182_v30 = vshrl.u32 %v3117_v55, 16  ;;  %v3185_v7 = vshll.u32 %v3117_v55, 16 }
 0x43d   : > { %v3390_v61 = vrot.slane %v3388_v53, 1 }
 0x43e   : > { %v3184_v8 = vrot.slane %v3182_v30, 7 }
 0x43f   : > { %v3391_v42 = vor.u32 %v3390_v61, %v3386_v2 }
 0x440   : > { %v3187_v39 = vor.u32 %v3185_v7, %v3184_v8  ;;  %v9489_v13 = vsel %vm7655_vm2, %v3184_v8, 0 }
 0x441   : > { %v9498_v10 = vsel %vm597_vm4, %v3391_v42, %v3395_v18  ;;  %v3405_v38 = vshll.u32 %v9489_v13, 16 }
 0x442   : > { %3497 = vrot.lane.b32.xlu1 %v9498_v10, %s7567_s28  ;;  %v9507_v44 = vsel %vm7655_vm2, 0, %v3187_v39 }
 0x443   : > { %3605 = vrot.lane.b32.xlu0 %v9507_v44, %s7567_s28  ;;  %v3400_v19 = vshll.u32 %v9507_v44, 16  ;;  %v3398_v63 = vshrl.u32 %v9507_v44, 16  ;;  %v3407_v31 = vrot.slane %v3405_v38, 1 }
 0x445   : > { %v3402_v9 = vrot.slane %v3400_v19, 1 }
 0x446   : > { %v6630_v47 = vpop.f32.mrb[32].mxu1 }
 0x447   : > { %v6631_v55 = vpop.f32.mrb[33].mxu1  ;;  %v3403_v53 = vor.u32 %v3402_v9, %v3398_v63 }
 0x448   : > { %v6632_v30 = vadd.f32 %v6631_v55, %v6630_v47  ;;  %v6633_v2 = vpop.f32.mrb[34].mxu1  ;;  %v3544_v55 = vrot.slane %v9185_v33, 1 }
 0x449   : > { %v6634_v61 = vpop.f32.mrb[35].mxu1  ;;  %v9515_v8 = vsel %vm597_vm4, %v3403_v53, %v3407_v31  ;;  %v7495_v53 = vld [vmem:[%s11070_s5 + $0xd8] sm:$0xff]   ;;  %v3484_v31 = vpop.permute.xlu1 %3483 }
 0x44a   : > { %v2862_v7 = vadd.f32 %v6632_v30, %v9153_v58  ;;  %v6635_v42 = vadd.f32 %v6634_v61, %v6633_v2  ;;  %3499 = vrot.lane.b32.xlu1 %v9515_v8, %s7567_s28  ;;  %6808 = vmatprep.subr.bf16.mxu1 %v7495_v53 }
 0x44c   : > { %v3023_v18 = vadd.f32 %v9248_v17, %v2862_v7  ;;  %v2865_v39 = vadd.f32 %v6635_v42, %v9153_v58  ;;  %v7496_v17 = vld [vmem:[%s11070_s5 + $0x98] sm:$0xff]   ;;  %v9533_v42 = vsel %vm849_vm3, %v3543_v57, %v3544_v55 }
 0x44d   : > { %6809 = vmatpush3.bf16.msra.mxu1 %v7496_v17 }
 0x44e   : > { %v3026_v51 = vadd.f32 %v9252_v52, %v2865_v39  ;;  %v6636_v62 = vpop.f32.mrb[36].mxu1  ;;  %v3095_v38 = vmax.f32 %v3023_v18, 0.0 }
 0x44f   : > { %v6637_v19 = vpop.f32.mrb[37].mxu1 }
 0x450   : > { %v3096_v63 = vmax.f32 %v3026_v51, 0.0  ;;  %v6638_v9 = vadd.f32 %v6637_v19, %v6636_v62  ;;  %v6639_v47 = vpop.f32.mrb[38].mxu1  ;;  %v3675_v62 = vsel %vm2346_vm1, %v9193_v1, %v3484_v31 }
 0x451   : > { %v6640_v52 = vpop.f32.mrb[39].mxu1 }
 0x452   : > { %v3118_v30 = vpack.c.bf16 %v3096_v63, %v3095_v38  ;;  %v2870_v2 = vadd.f32 %v6638_v9, %v9153_v58  ;;  %v6641_v61 = vadd.f32 %v6640_v52, %v6639_v47  ;;  %v3592_v7 = vpop.permute.xlu0 %3591  ;;  %v3546_v63 = vrot.slane %v9297_v27, 1 }
 0x453   : > { %v3724_v33 = vsel %vm2346_vm1, %v9533_v42, %v3592_v7  ;;  %v3547_v9 = vrot.slane %v9293_v21, 1 }
 0x454   : > { %v3189_v18 = vshrl.u32 %v3118_v30, 16  ;;  %v3031_v39 = vadd.f32 %v9306_v48, %v2870_v2  ;;  %v2873_v51 = vadd.f32 %v6641_v61, %v9153_v58  ;;  %4217 = vmatprep.mubr.bf16.mxu0 %v3724_v33  ;;  %v3192_v38 = vshll.u32 %v3118_v30, 16  ;;  %v7498_v33 = vld [vmem:[%s11070_s5 + $0x110] sm:$0xff]  }
 0x455   : > { %4218 = vmatmul.mubr.bf16.gmra.mrb[72].mxu0 %v3675_v62  ;;  %v9555_v31 = vsel %vm849_vm3, %v3546_v63, %v3547_v9  ;;  %7254 = vmatprep.subr.bf16.mxu0 %v7498_v33 }
 0x456   : > { %v3191_v19 = vrot.slane %v3189_v18, 7  ;;  %v3034_v57 = vadd.f32 %v9310_v34, %v2873_v51  ;;  %v3097_v47 = vmax.f32 %v3031_v39, 0.0  ;;  %v7499_v18 = vld [vmem:[%s11070_s5 + $0xa0] sm:$0xff]   ;;  %7255 = vmatpush3.bf16.msra.mxu0 %v7498_v33 }
 0x458   : > { %v3098_v55 = vmax.f32 %v3034_v57, 0.0  ;;  %v3194_v53 = vor.u32 %v3192_v38, %v3191_v19  ;;  %v9546_v48 = vsel %vm7655_vm2, %v3191_v19, 0 }
 0x459   : > { %v3486_v17 = vpop.permute.xlu1 %3485  ;;  %v3417_v61 = vshll.u32 %v9546_v48, 16 }
 0x45a   : > { %v3119_v52 = vpack.c.bf16 %v3098_v55, %v3097_v47  ;;  %v3594_v2 = vpop.permute.xlu0 %3593  ;;  %v9550_v1 = vsel %vm7655_vm2, 0, %v3194_v53  ;;  %v3678_v34 = vsel %vm2346_vm1, %v9297_v27, %v3486_v17  ;;  %v7497_v27 = vld [vmem:[%s11070_s5 + $0xe0] sm:$0xff]  }
 0x45b   : > { %3607 = vrot.lane.b32.xlu0 %v9550_v1, %s7567_s28  ;;  %4370 = vmatprep.mubr.bf16.mxu1 %v3678_v34  ;;  %v3728_v21 = vsel %vm2346_vm1, %v9555_v31, %v3594_v2  ;;  %v3412_v30 = vshll.u32 %v9550_v1, 16  ;;  %v3410_v39 = vshrl.u32 %v9550_v1, 16  ;;  %v3419_v57 = vrot.slane %v3417_v61, 1 }
 0x45c   : > { %v3196_v7 = vshrl.u32 %v3119_v52, 16  ;;  %4225 = vmatprep.mubr.bf16.mxu0 %v3728_v21  ;;  %v3199_v19 = vshll.u32 %v3119_v52, 16  ;;  %6810 = vmatprep.subr.bf16.mxu1 %v7497_v27 }
 0x45d   : > { %4226 = vmatmul.mubr.bf16.gmra.mrb[76].mxu0 %v3678_v34  ;;  %v3414_v51 = vrot.slane %v3412_v30, 1  ;;  %6811 = vmatpush3.bf16.msra.mxu1 %v7499_v18 }
 0x45e   : > { %v3198_v62 = vrot.slane %v3196_v7, 7 }
 0x45f   : > { %v3415_v38 = vor.u32 %v3414_v51, %v3410_v39 }
 0x460   : > { %v3201_v63 = vor.u32 %v3199_v19, %v3198_v62  ;;  %v9575_v9 = vsel %vm7655_vm2, %v3198_v62, 0  ;;  %v3549_v62 = vrot.slane %v9323_v43, 1 }
 0x461   : > { %v9578_v47 = vsel %vm597_vm4, %v3415_v38, %v3419_v57  ;;  %v3429_v17 = vshll.u32 %v9575_v9, 16  ;;  %v3550_v57 = vrot.slane %v9314_v59, 1  ;;  %v7501_v59 = vld [vmem:[%s11070_s5 + $0xa8] sm:$0xff]  }
 0x462   : > { %3501 = vrot.lane.b32.xlu1 %v9578_v47, %s7567_s28  ;;  %v9584_v55 = vsel %vm7655_vm2, 0, %v3201_v63  ;;  %v3488_v63 = vpop.permute.xlu1 %3487 }
 0x463   : > { %3609 = vrot.lane.b32.xlu0 %v9584_v55, %s7567_s28  ;;  %v3424_v53 = vshll.u32 %v9584_v55, 16  ;;  %v3422_v52 = vshrl.u32 %v9584_v55, 16  ;;  %v3431_v61 = vrot.slane %v3429_v17, 1 }
 0x465   : > { %v3426_v2 = vrot.slane %v3424_v53, 1  ;;  %v7500_v53 = vld [vmem:[%s11070_s5 + $0xe8] sm:$0xff]  }
 0x466   : > { %v6642_v34 = vpop.f32.mrb[40].mxu1  ;;  %6812 = vmatprep.subr.bf16.mxu1 %v7500_v53 }
 0x467   : > { %v6643_v21 = vpop.f32.mrb[41].mxu1  ;;  %v3427_v30 = vor.u32 %v3426_v2, %v3422_v52  ;;  %6813 = vmatpush3.bf16.msra.mxu1 %v7501_v59 }
 0x468   : > { %v6644_v7 = vadd.f32 %v6643_v21, %v6642_v34  ;;  %v6645_v27 = vpop.f32.mrb[42].mxu1  ;;  %v9606_v34 = vsel %vm849_vm3, %v3549_v62, %v3550_v57 }
 0x469   : > { %v6646_v33 = vpop.f32.mrb[43].mxu1  ;;  %v9592_v18 = vsel %vm597_vm4, %v3427_v30, %v3431_v61 }
 0x46a   : > { %v2878_v39 = vadd.f32 %v6644_v7, %v9153_v58  ;;  %v6647_v51 = vadd.f32 %v6646_v33, %v6645_v27  ;;  %3503 = vrot.lane.b32.xlu1 %v9592_v18, %s7567_s28 }
 0x46c   : > { %v3039_v19 = vadd.f32 %v9303_v28, %v2878_v39  ;;  %v2881_v38 = vadd.f32 %v6647_v51, %v9153_v58 }
 0x46e   : > { %v3042_v17 = vadd.f32 %v9308_v37, %v2881_v38  ;;  %v3596_v52 = vpop.permute.xlu0 %3595  ;;  %v6648_v2 = vpop.f32.mrb[44].mxu1  ;;  %v3099_v30 = vmax.f32 %v3039_v19, 0.0  ;;  %v9615_v37 = vsel %vm2346_vm1, %v9323_v43, %v3488_v63  ;;  %v3552_v38 = vrot.slane %v9349_v60, 1 }
 0x46f   : > { %v6649_v21 = vpop.f32.mrb[45].mxu1  ;;  %v3732_v28 = vsel %vm2346_vm1, %v9606_v34, %v3596_v52 }
 0x470   : > { %v3100_v61 = vmax.f32 %v3042_v17, 0.0  ;;  %v6650_v7 = vadd.f32 %v6649_v21, %v6648_v2  ;;  %v6651_v27 = vpop.f32.mrb[46].mxu1  ;;  %4233 = vmatprep.mubr.bf16.mxu0 %v3732_v28  ;;  %v3553_v17 = vrot.slane %v9345_v25, 1 }
 0x471   : > { %v6652_v33 = vpop.f32.mrb[47].mxu1  ;;  %4234 = vmatmul.mubr.bf16.gmra.mrb[80].mxu0 %v9615_v37 }
 0x472   : > { %v3120_v39 = vpack.c.bf16 %v3100_v61, %v3099_v30  ;;  %v2886_v51 = vadd.f32 %v6650_v7, %v9153_v58  ;;  %v6653_v62 = vadd.f32 %v6652_v33, %v6651_v27  ;;  %v9625_v28 = vsel %vm849_vm3, %v3552_v38, %v3553_v17 }
 0x474   : > { %v3203_v57 = vshrl.u32 %v3120_v39, 16  ;;  %v3047_v19 = vadd.f32 %v9365_v40, %v2886_v51  ;;  %v2889_v53 = vadd.f32 %v6653_v62, %v9153_v58  ;;  %v3206_v63 = vshll.u32 %v3120_v39, 16  ;;  %v7502_v39 = vld [vmem:[%s11070_s5 + $0xf0] sm:$0xff]   ;;  %v7504_v62 = vld [vmem:[%s11070_s5 + $0x118] sm:$0xff]  }
 0x475   : > { %v3490_v52 = vpop.permute.xlu1 %3489  ;;  %v7503_v51 = vld [vmem:[%s11070_s5 + $0xb0] sm:$0xff]   ;;  %6814 = vmatprep.subr.bf16.mxu1 %v7502_v39  ;;  %7256 = vmatprep.subr.bf16.mxu0 %v7504_v62 }
 0x476   : > { %v3205_v43 = vrot.slane %v3203_v57, 7  ;;  %v3050_v2 = vadd.f32 %v9379_v0, %v2889_v53  ;;  %v3598_v21 = vpop.permute.xlu0 %3597  ;;  %v3101_v59 = vmax.f32 %v3047_v19, 0.0  ;;  %v9631_v58 = vsel %vm2346_vm1, %v9349_v60, %v3490_v52  ;;  %6815 = vmatpush3.bf16.msra.mxu1 %v7503_v51  ;;  %7257 = vmatpush3.bf16.msra.mxu0 %v7504_v62 }
 0x477   : > { %v3736_v30 = vsel %vm2346_vm1, %v9625_v28, %v3598_v21 }
 0x478   : > { %v3102_v61 = vmax.f32 %v3050_v2, 0.0  ;;  %4241 = vmatprep.mubr.bf16.mxu0 %v3736_v30  ;;  %v3208_v25 = vor.u32 %v3206_v63, %v3205_v43  ;;  %v9635_v40 = vsel %vm7655_vm2, %v3205_v43, 0 }
 0x479   : > { %4242 = vmatmul.mubr.bf16.gmra.mrb[84].mxu0 %v9631_v58  ;;  %v3441_v60 = vshll.u32 %v9635_v40, 16 }
 0x47a   : > { %v3121_v0 = vpack.c.bf16 %v3102_v61, %v3101_v59  ;;  %v9640_v7 = vsel %vm7655_vm2, 0, %v3208_v25 }
 0x47b   : > { %3611 = vrot.lane.b32.xlu0 %v9640_v7, %s7567_s28  ;;  %v3436_v27 = vshll.u32 %v9640_v7, 16  ;;  %v3434_v38 = vshrl.u32 %v9640_v7, 16  ;;  %v3443_v43 = vrot.slane %v3441_v60, 1 }
 0x47c   : > { %v3210_v33 = vshrl.u32 %v3121_v0, 16  ;;  %v3213_v53 = vshll.u32 %v3121_v0, 16 }
 0x47d   : > { %v3438_v57 = vrot.slane %v3436_v27, 1  ;;  %v9672_v27 = vld [vmem:[%s11069_s4] ss:$0 sm:$0xff] }
 0x47e   : > { %v3212_v19 = vrot.slane %v3210_v33, 7 }
 0x47f   : > { %v6654_v17 = vpop.f32.mrb[48].mxu1  ;;  %v3439_v52 = vor.u32 %v3438_v57, %v3434_v38 }
 0x480   : > { %v6655_v63 = vpop.f32.mrb[49].mxu1  ;;  %v3215_v2 = vor.u32 %v3213_v53, %v3212_v19  ;;  %v9658_v21 = vsel %vm7655_vm2, %v3212_v19, 0 }
 0x481   : > { %v6656_v59 = vadd.f32 %v6655_v63, %v6654_v17  ;;  %v6657_v30 = vpop.f32.mrb[50].mxu1  ;;  %v9661_v61 = vsel %vm597_vm4, %v3439_v52, %v3443_v43  ;;  %v3453_v51 = vshll.u32 %v9658_v21, 16 }
 0x482   : > { %v6658_v25 = vpop.f32.mrb[51].mxu1  ;;  %3505 = vrot.lane.b32.xlu1 %v9661_v61, %s7567_s28  ;;  %v9667_v0 = vsel %vm7655_vm2, 0, %v3215_v2  ;;  %v3555_v2 = vrot.slane %v9371_v5, 1 }
 0x483   : > { %v2894_v60 = vadd.f32 %v9672_v27, %v6656_v59  ;;  %v6659_v33 = vadd.f32 %v6658_v25, %v6657_v30  ;;  %3613 = vrot.lane.b32.xlu0 %v9667_v0, %s7567_s28  ;;  %v3448_v39 = vshll.u32 %v9667_v0, 16  ;;  %v3446_v57 = vshrl.u32 %v9667_v0, 16 }
 0x484   : > { %v3455_v43 = vrot.slane %v3453_v51, 1  ;;  %v3556_v51 = vrot.slane %v9358_v54, 1 }
 0x485   : > { %v3055_v62 = vadd.f32 %v9360_v35, %v2894_v60  ;;  %v2897_v38 = vadd.f32 %v9672_v27, %v6659_v33  ;;  %v3450_v19 = vrot.slane %v3448_v39, 1  ;;  %v7505_v35 = vld [vmem:[%s11070_s5 + $0xf8] sm:$0xff]  }
 0x486   : > { %6816 = vmatprep.subr.bf16.mxu1 %v7505_v35 }
 0x487   : > { %v3058_v53 = vadd.f32 %v9373_v32, %v2897_v38  ;;  %v6660_v17 = vpop.f32.mrb[52].mxu1  ;;  %v3451_v52 = vor.u32 %v3450_v19, %v3446_v57  ;;  %v3103_v59 = vmax.f32 %v3055_v62, 0.0  ;;  %v3492_v62 = vpop.permute.xlu1 %3491 }
 0x488   : > { %v6661_v63 = vpop.f32.mrb[53].mxu1 }
 0x489   : > { %v3104_v30 = vmax.f32 %v3058_v53, 0.0  ;;  %v6662_v25 = vadd.f32 %v6661_v63, %v6660_v17  ;;  %v6663_v20 = vpop.f32.mrb[54].mxu1  ;;  %v9685_v22 = vsel %vm597_vm4, %v3451_v52, %v3455_v43  ;;  %v9697_v17 = vsel %vm849_vm3, %v3555_v2, %v3556_v51  ;;  %v7506_v52 = vld [vmem:[%s11070_s5 + $0xb8] sm:$0xff]  }
 0x48a   : > { %v6664_v60 = vpop.f32.mrb[55].mxu1  ;;  %3507 = vrot.lane.b32.xlu1 %v9685_v22, %s7567_s28  ;;  %6817 = vmatpush3.bf16.msra.mxu1 %v7506_v52  ;;  %v3559_v51 = vrot.slane %v9405_v16, 1 }
 0x48b   : > { %v3122_v32 = vpack.c.bf16 %v3104_v30, %v3103_v59  ;;  %v2902_v33 = vadd.f32 %v9672_v27, %v6662_v25  ;;  %v6665_v39 = vadd.f32 %v6664_v60, %v6663_v20  ;;  %v3558_v25 = vrot.slane %v9409_v11, 1 }
 0x48d   : > { %v3217_v38 = vshrl.u32 %v3122_v32, 16  ;;  %v3063_v57 = vadd.f32 %v9393_v26, %v2902_v33  ;;  %v2905_v19 = vadd.f32 %v9672_v27, %v6665_v39  ;;  %v3600_v53 = vpop.permute.xlu0 %3599  ;;  %v3220_v54 = vshll.u32 %v3122_v32, 16 }
 0x48e   : > { %v3740_v20 = vsel %vm2346_vm1, %v9697_v17, %v3600_v53  ;;  %v9707_v26 = vsel %vm2346_vm1, %v9371_v5, %v3492_v62 }
 0x48f   : > { %v3219_v43 = vrot.slane %v3217_v38, 7  ;;  %v3066_v63 = vadd.f32 %v9398_v49, %v2905_v19  ;;  %v6666_v59 = vpop.f32.mrb[56].mxu1  ;;  %4249 = vmatprep.mubr.bf16.mxu0 %v3740_v20  ;;  %v3105_v2 = vmax.f32 %v3063_v57, 0.0 }
 0x490   : > { %v6667_v30 = vpop.f32.mrb[57].mxu1  ;;  %4250 = vmatmul.mubr.bf16.gmra.mrb[88].mxu0 %v9707_v26 }
 0x491   : > { %v3106_v35 = vmax.f32 %v3066_v63, 0.0  ;;  %v6668_v60 = vadd.f32 %v6667_v30, %v6666_v59  ;;  %v6669_v33 = vpop.f32.mrb[58].mxu1  ;;  %v3222_v39 = vor.u32 %v3220_v54, %v3219_v43  ;;  %v9713_v49 = vsel %vm7655_vm2, %v3219_v43, 0 }
 0x492   : > { %v6670_v32 = vpop.f32.mrb[59].mxu1  ;;  %v3465_v52 = vshll.u32 %v9713_v49, 16  ;;  %v9728_v63 = vsel %vm849_vm3, %v3558_v25, %v3559_v51 }
 0x493   : > { %v3123_v5 = vpack.c.bf16 %v3106_v35, %v3105_v2  ;;  %v2910_v62 = vadd.f32 %v9672_v27, %v6668_v60  ;;  %v6671_v38 = vadd.f32 %v6670_v32, %v6669_v33  ;;  %v9719_v57 = vsel %vm7655_vm2, 0, %v3222_v39 }
 0x494   : > { %3615 = vrot.lane.b32.xlu0 %v9719_v57, %s7567_s28  ;;  %v3494_v19 = vpop.permute.xlu1 %3493  ;;  %v3460_v53 = vshll.u32 %v9719_v57, 16  ;;  %v3458_v2 = vshrl.u32 %v9719_v57, 16  ;;  %v3467_v25 = vrot.slane %v3465_v52, 1 }
 0x495   : > { %v3224_v20 = vshrl.u32 %v3123_v5, 16  ;;  %v3071_v43 = vadd.f32 %v9391_v3, %v2910_v62  ;;  %v2913_v16 = vadd.f32 %v9672_v27, %v6671_v38  ;;  %v3602_v54 = vpop.permute.xlu0 %3601  ;;  %v3227_v60 = vshll.u32 %v3123_v5, 16 }
 0x496   : > { %v3744_v59 = vsel %vm2346_vm1, %v9728_v63, %v3602_v54  ;;  %v3462_v30 = vrot.slane %v3460_v53, 1  ;;  %v9736_v3 = vsel %vm2346_vm1, %v9409_v11, %v3494_v19 }
 0x497   : > { %v3226_v35 = vrot.slane %v3224_v20, 7  ;;  %v3074_v33 = vadd.f32 %v9395_v50, %v2913_v16  ;;  %4257 = vmatprep.mubr.bf16.mxu0 %v3744_v59  ;;  %v3107_v51 = vmax.f32 %v3071_v43, 0.0 }
 0x498   : > { %4258 = vmatmul.mubr.bf16.gmra.mrb[92].mxu0 %v9736_v3  ;;  %v3463_v27 = vor.u32 %v3462_v30, %v3458_v2 }
 0x499   : > { %v3229_v39 = vor.u32 %v3227_v60, %v3226_v35  ;;  %v9741_v32 = vsel %vm7655_vm2, %v3226_v35, 0  ;;  %v3108_v62 = vmax.f32 %v3074_v33, 0.0  ;;  %v3561_v60 = vrot.slane %v9430_v41, 1 }
 0x49a   : > { %v9744_v5 = vsel %vm597_vm4, %v3463_v27, %v3467_v25  ;;  %v3477_v19 = vshll.u32 %v9741_v32, 16  ;;  %v3562_v33 = vrot.slane %v9421_v6, 1 }
 0x49b   : > { %v3124_v50 = vpack.c.bf16 %v3108_v62, %v3107_v51  ;;  %3509 = vrot.lane.b32.xlu1 %v9744_v5, %s7567_s28  ;;  %v9750_v11 = vsel %vm7655_vm2, 0, %v3229_v39  ;;  %v3565_v62 = vrot.slane %v9476_v45, 1 }
 0x49c   : > { %3617 = vrot.lane.b32.xlu0 %v9750_v11, %s7567_s28  ;;  %v3472_v38 = vshll.u32 %v9750_v11, 16  ;;  %v3470_v52 = vshrl.u32 %v9750_v11, 16  ;;  %v3479_v59 = vrot.slane %v3477_v19, 1  ;;  %v3496_v27 = vpop.permute.xlu1 %3495  ;;  %v9779_v39 = vsel %vm849_vm3, %v3561_v60, %v3562_v33 }
 0x49d   : > { %v3231_v53 = vshrl.u32 %v3124_v50, 16  ;;  %v3234_v16 = vshll.u32 %v3124_v50, 16  ;;  %v9788_v6 = vsel %vm2346_vm1, %v9430_v41, %v3496_v27  ;;  %v3567_v19 = vrot.slane %v9507_v44, 1 }
 0x49e   : > { %v3474_v20 = vrot.slane %v3472_v38, 1  ;;  %v3570_v38 = vrot.slane %v9550_v1, 1  ;;  %v3577_v60 = vrot.slane %v9635_v40, 1  ;;  %v3574_v33 = vrot.slane %v9575_v9, 1 }
 0x49f   : > { %v3233_v43 = vrot.slane %v3231_v53, 7  ;;  %v3571_v53 = vrot.slane %v9546_v48, 1  ;;  %v3583_v9 = vrot.slane %v9713_v49, 1  ;;  %v3580_v40 = vrot.slane %v9658_v21, 1 }
 0x4a0   : > { %v3475_v54 = vor.u32 %v3474_v20, %v3470_v52  ;;  %v3568_v20 = vrot.slane %v9489_v13, 1  ;;  %v3573_v13 = vrot.slane %v9584_v55, 1  ;;  %v3586_v21 = vrot.slane %v9741_v32, 1 }
 0x4a1   : > { %v3236_v2 = vor.u32 %v3234_v16, %v3233_v43  ;;  %v9806_v45 = vsel %vm849_vm3, %v3570_v38, %v3571_v53 }
 0x4a2   : > { %v9758_v30 = vsel %vm597_vm4, %v3475_v54, %v3479_v59  ;;  %v3576_v54 = vrot.slane %v9640_v7, 1  ;;  %v9814_v59 = vsel %vm849_vm3, %v3567_v19, %v3568_v20 }
 0x4a3   : > { %3511 = vrot.lane.b32.xlu1 %v9758_v30, %s7567_s28  ;;  %v9764_v35 = vsel %vm7655_vm2, 0, %v3236_v2 }
 0x4a4   : > { %3619 = vrot.lane.b32.xlu0 %v9764_v35, %s7567_s28  ;;  %v3624_v2 = vshll.u32 %v9764_v35, 16  ;;  %v9828_v27 = vsel %vm849_vm3, %v3576_v54, %v3577_v60  ;;  %v3622_v38 = vshrl.u32 %v9764_v35, 16  ;;  %v3634_v54 = vrot.slane %v9764_v35, 1 }
 0x4a7   : > { %3639 = vrot.lane.b32.xlu1 %v9555_v31, %s7567_s28 }
 0x4a8   : > { %3637 = vrot.lane.b32.xlu0 %v9533_v42, %s7567_s28  ;;  %v3564_v42 = vrot.slane %v9480_v12, 1 }
 0x4aa   : > { %v9795_v50 = vsel %vm849_vm3, %v3564_v42, %v3565_v62  ;;  %v3579_v42 = vrot.slane %v9667_v0, 1  ;;  %v3626_v62 = vrot.slane %v3624_v2, 1 }
 0x4ab   : > { %3643 = vrot.lane.b32.xlu1 %v9625_v28, %s7567_s28 }
 0x4ac   : > { %3641 = vrot.lane.b32.xlu0 %v9606_v34, %s7567_s28  ;;  %v9851_v53 = vsel %vm849_vm3, %v3579_v42, %v3580_v40 }
 0x4ad   : > { %v3604_v25 = vpop.permute.xlu0 %3603 }
 0x4ae   : > { %v3748_v51 = vsel %vm2346_vm1, %v9779_v39, %v3604_v25  ;;  %v3582_v25 = vrot.slane %v9719_v57, 1 }
 0x4af   : > { %3647 = vrot.lane.b32.xlu1 %v9728_v63, %s7567_s28  ;;  %4265 = vmatprep.mubr.bf16.mxu0 %v3748_v51  ;;  %v9836_v51 = vsel %vm849_vm3, %v3573_v13, %v3574_v33 }
 0x4b0   : > { %3645 = vrot.lane.b32.xlu0 %v9697_v17, %s7567_s28  ;;  %4266 = vmatmul.mubr.bf16.gmra.mrb[96].mxu0 %v9788_v6 }
 0x4b3   : > { %3651 = vrot.lane.b32.xlu1 %v9795_v50, %s7567_s28 }
 0x4b4   : > { %3649 = vrot.lane.b32.xlu0 %v9779_v39, %s7567_s28  ;;  %v3498_v41 = vpop.permute.xlu1 %3497 }
 0x4b5   : > { %v3606_v52 = vpop.permute.xlu0 %3605  ;;  %v9818_v48 = vsel %vm2346_vm1, %v9480_v12, %v3498_v41  ;;  %v3300_v12 = vsel %vm7655_vm2, %v3233_v43, 0  ;;  %v9845_v43 = vsel %vm849_vm3, %v3582_v25, %v3583_v9  ;;  %v3585_v41 = vrot.slane %v9750_v11, 1 }
 0x4b6   : > { %v3752_v16 = vsel %vm2346_vm1, %v9795_v50, %v3606_v52  ;;  %v3629_v19 = vshll.u32 %v3300_v12, 16  ;;  %v3627_v52 = vor.u32 %v3626_v62, %v3622_v38  ;;  %v3635_v13 = vrot.slane %v3300_v12, 1 }
 0x4b7   : > { %3655 = vrot.lane.b32.xlu1 %v9806_v45, %s7567_s28  ;;  %4273 = vmatprep.mubr.bf16.mxu0 %v3752_v16  ;;  %v9857_v20 = vsel %vm849_vm3, %v3585_v41, %v3586_v21 }
 0x4b8   : > { %3653 = vrot.lane.b32.xlu0 %v9814_v59, %s7567_s28  ;;  %4274 = vmatmul.mubr.bf16.gmra.mrb[100].mxu0 %v9818_v48  ;;  %v3631_v49 = vrot.slane %v3629_v19, 1  ;;  %v9868_v2 = vsel %vm849_vm3, %v3634_v54, %v3635_v13 }
 0x4ba   : > { %v9862_v16 = vsel %vm597_vm4, %v3627_v52, %v3631_v49 }
 0x4bb   : > { %3659 = vrot.lane.b32.xlu1 %v9828_v27, %s7567_s28 }
 0x4bc   : > { %3657 = vrot.lane.b32.xlu0 %v9836_v51, %s7567_s28  ;;  %v3500_v32 = vpop.permute.xlu1 %3499 }
 0x4bd   : > { %v9876_v25 = vsel %vm2346_vm1, %v9507_v44, %v3500_v32 }
 0x4bf   : > { %3663 = vrot.lane.b32.xlu1 %v9845_v43, %s7567_s28 }
 0x4c0   : > { %3661 = vrot.lane.b32.xlu0 %v9851_v53, %s7567_s28 }
 0x4c3   : > { %3665 = vrot.lane.b32.xlu1 %v9857_v20, %s7567_s28 }
 0x4c4   : > { %3669 = vrot.lane.b32.xlu0 %v9862_v16, %s7567_s28 }
 0x4c8   : > { %3667 = vrot.lane.b32.xlu0 %v9868_v2, %s7567_s28 }
 0x4cd   : > { %v3608_v60 = vpop.permute.xlu0 %3607 }
 0x4ce   : > { %v3756_v33 = vsel %vm2346_vm1, %v9814_v59, %v3608_v60 }
 0x4cf   : > { %4281 = vmatprep.mubr.bf16.mxu0 %v3756_v33 }
 0x4d0   : > { %4282 = vmatmul.mubr.bf16.gmra.mrb[104].mxu0 %v9876_v25 }
 0x4d4   : > { %v3502_v42 = vpop.permute.xlu1 %3501 }
 0x4d5   : > { %v3610_v12 = vpop.permute.xlu0 %3609  ;;  %v9883_v9 = vsel %vm2346_vm1, %v9550_v1, %v3502_v42 }
 0x4d6   : > { %v3760_v62 = vsel %vm2346_vm1, %v9806_v45, %v3610_v12 }
 0x4d7   : > { %4289 = vmatprep.mubr.bf16.mxu0 %v3760_v62 }
 0x4d8   : > { %4290 = vmatmul.mubr.bf16.gmra.mrb[108].mxu0 %v9883_v9 }
 0x4dc   : > { %v3504_v40 = vpop.permute.xlu1 %3503 }
 0x4dd   : > { %v9890_v19 = vsel %vm2346_vm1, %v9584_v55, %v3504_v40 }
 0x4ed   : > { %v3612_v38 = vpop.permute.xlu0 %3611 }
 0x4ee   : > { %v3764_v44 = vsel %vm2346_vm1, %v9836_v51, %v3612_v38 }
 0x4ef   : > { %4297 = vmatprep.mubr.bf16.mxu0 %v3764_v44 }
 0x4f0   : > { %4298 = vmatmul.mubr.bf16.gmra.mrb[112].mxu0 %v9890_v19 }
 0x4f4   : > { %v3506_v41 = vpop.permute.xlu1 %3505 }
 0x4f5   : > { %v3614_v52 = vpop.permute.xlu0 %3613  ;;  %v9897_v21 = vsel %vm2346_vm1, %v9640_v7, %v3506_v41 }
 0x4f6   : > { %v3768_v1 = vsel %vm2346_vm1, %v9828_v27, %v3614_v52 }
 0x4f7   : > { %4305 = vmatprep.mubr.bf16.mxu0 %v3768_v1 }
 0x4f8   : > { %4306 = vmatmul.mubr.bf16.gmra.mrb[116].mxu0 %v9897_v21 }
 0x4fc   : > { %v6706_v49 = vpop.f32.mrb[68].mxu0  ;;  %v3508_v33 = vpop.permute.xlu1 %3507 }
 0x4fd   : > { %v6707_v54 = vpop.f32.mrb[69].mxu0  ;;  %v9908_v7 = vsel %vm2346_vm1, %v9667_v0, %v3508_v33 }
 0x4fe   : > { %v9900_v13 = vadd.f32 %v6707_v54, %v6706_v49  ;;  %v6709_v55 = vpop.f32.mrb[70].mxu0 }
 0x4ff   : > { %v6710_v32 = vpop.f32.mrb[71].mxu0 }
 0x500   : > { %v9902_v60 = vadd.f32 %v6710_v32, %v6709_v55 }
 0x506   : > { %v3616_v42 = vpop.permute.xlu0 %3615 }
 0x507   : > { %v3772_v12 = vsel %vm2346_vm1, %v9851_v53, %v3616_v42 }
 0x508   : > { %4313 = vmatprep.mubr.bf16.mxu0 %v3772_v12 }
 0x509   : > { %4314 = vmatmul.mubr.bf16.gmra.mrb[120].mxu0 %v9908_v7 }
 0x50d   : > { %v3510_v62 = vpop.permute.xlu1 %3509 }
 0x50e   : > { %v3618_v40 = vpop.permute.xlu0 %3617  ;;  %v9915_v44 = vsel %vm2346_vm1, %v9719_v57, %v3510_v62 }
 0x50f   : > { %v3776_v38 = vsel %vm2346_vm1, %v9845_v43, %v3618_v40 }
 0x510   : > { %4321 = vmatprep.mubr.bf16.mxu0 %v3776_v38 }
 0x511   : > { %4322 = vmatmul.mubr.bf16.gmra.mrb[124].mxu0 %v9915_v44 }
 0x515   : > { %v3512_v41 = vpop.permute.xlu1 %3511 }
 0x516   : > { %v3620_v52 = vpop.permute.xlu0 %3619  ;;  %v9922_v1 = vsel %vm2346_vm1, %v9750_v11, %v3512_v41 }
 0x517   : > { %v3780_v0 = vsel %vm2346_vm1, %v9857_v20, %v3620_v52 }
 0x518   : > { %4329 = vmatprep.mubr.bf16.mxu0 %v3780_v0 }
 0x519   : > { %4330 = vmatmul.mubr.bf16.gmra.mrb[128].mxu0 %v9922_v1  ;;  %v3640_v54 = vpop.permute.xlu1 %3639 }
 0x51a   : > { %v3638_v49 = vpop.permute.xlu0 %3637  ;;  %7258 = vmatprep.mubr.msk.bf16.mxu0 %vm2346_vm1, %v9555_v31  ;;  %v3788_v11 = vsel %vm2346_vm1, %v9317_v24, %v3640_v54 }
 0x51b   : > { %v3784_v57 = vsel %vm2346_vm1, %v9219_v56, %v3638_v49 }
 0x51c   : > { %4371 = vmatmul.mubr.bf16.vlgmr.msra.gmra.mrb[60].mxu1 %v3784_v57 }
 0x51d   : > { %4378 = vmatprep.mubr.bf16.mxu1 %v9615_v37 }
 0x51e   : > { %v3642_v31 = vpop.permute.xlu0 %3641 }
 0x521   : > { %7259 = vmatmul.mubr.msk.bf16.vlgmr.msra.gmra.mrb[132].mxu0 %vm2346_vm1, %v9606_v34 }
 0x522   : > { %7262 = vmatprep.mubr.msk.bf16.mxu0 %vm2346_vm1, %v9625_v28  ;;  %v3792_v28 = vsel %vm2346_vm1, %v9334_v46, %v3642_v31 }
 0x524   : > { %4379 = vmatmul.mubr.bf16.gmra.mrb[64].mxu1 %v3788_v11 }
 0x525   : > { %4386 = vmatprep.mubr.bf16.mxu1 %v9631_v58  ;;  %v3644_v58 = vpop.permute.xlu1 %3643 }
 0x526   : > { %v3796_v46 = vsel %vm2346_vm1, %v9363_v36, %v3644_v58 }
 0x528   : > { %v6712_v55 = vpop.f32.mrb[72].mxu0 }
 0x529   : > { %7263 = vmatmul.mubr.msk.bf16.gmra.mrb[136].mxu0 %vm2346_vm1, %v9697_v17  ;;  %v6713_v56 = vpop.f32.mrb[73].mxu0 }
 0x52a   : > { %v9939_v37 = vadd.f32 %v6713_v56, %v6712_v55  ;;  %7266 = vmatprep.mubr.msk.bf16.mxu0 %vm2346_vm1, %v9728_v63  ;;  %v6715_v34 = vpop.f32.mrb[74].mxu0 }
 0x52b   : > { %v6716_v32 = vpop.f32.mrb[75].mxu0 }
 0x52c   : > { %v9945_v24 = vadd.f32 %v6716_v32, %v6715_v34  ;;  %4387 = vmatmul.mubr.bf16.gmra.mrb[68].mxu1 %v3792_v28 }
 0x52d   : > { %4394 = vmatprep.mubr.bf16.mxu1 %v9707_v26  ;;  %v3646_v26 = vpop.permute.xlu0 %3645 }
 0x530   : > { %v6718_v33 = vpop.f32.mrb[76].mxu0 }
 0x531   : > { %7267 = vmatmul.mubr.msk.bf16.gmra.mrb[140].mxu0 %vm2346_vm1, %v9779_v39  ;;  %v6719_v17 = vpop.f32.mrb[77].mxu0  ;;  %v3800_v39 = vsel %vm2346_vm1, %v9384_v14, %v3646_v26 }
 0x532   : > { %v9950_v42 = vadd.f32 %v6719_v17, %v6718_v33  ;;  %7270 = vmatprep.mubr.msk.bf16.mxu0 %vm2346_vm1, %v9795_v50  ;;  %v6721_v63 = vpop.f32.mrb[78].mxu0  ;;  %v3648_v50 = vpop.permute.xlu1 %3647  ;;  %v7507_v17 = vld [vmem:[%s11072_s7 + $0x40] sm:$0xff]  }
 0x533   : > { %v6722_v12 = vpop.f32.mrb[79].mxu0  ;;  %v3804_v36 = vsel %vm2346_vm1, %v9424_v29, %v3648_v50  ;;  %6934 = vmatprep.subr.bf16.mxu1 %v7507_v17 }
 0x534   : > { %v9956_v62 = vadd.f32 %v6722_v12, %v6721_v63  ;;  %4395 = vmatmul.mubr.bf16.gmra.mrb[72].mxu1 %v3796_v46 }
 0x535   : > { %4402 = vmatprep.mubr.bf16.mxu1 %v9736_v3 }
 0x536   : > { %v3652_v0 = vpop.permute.xlu1 %3651 }
 0x539   : > { %7271 = vmatmul.mubr.msk.bf16.gmra.mrb[144].mxu0 %vm2346_vm1, %v9814_v59 }
 0x53a   : > { %7274 = vmatprep.mubr.msk.bf16.mxu0 %vm2346_vm1, %v9806_v45 }
 0x53c   : > { %4403 = vmatmul.mubr.bf16.gmra.mrb[76].mxu1 %v3800_v39  ;;  %v7508_v39 = vld [vmem:[%s11072_s7] sm:$0xff]  }
 0x53d   : > { %4410 = vmatprep.mubr.bf16.mxu1 %v9788_v6  ;;  %v3650_v6 = vpop.permute.xlu0 %3649  ;;  %6935 = vmatpush3.bf16.msra.mxu1 %v7508_v39  ;;  %v7518_v39 = vld [vmem:[%s11072_s7 + $0x28] sm:$0xff]  }
 0x53e   : > { %v3808_v29 = vsel %vm2346_vm1, %v9453_v23, %v3650_v6  ;;  %v3812_v23 = vsel %vm2346_vm1, %v9498_v10, %v3652_v0 }
 0x541   : > { %7275 = vmatmul.mubr.msk.bf16.gmra.mrb[148].mxu0 %vm2346_vm1, %v9836_v51 }
 0x542   : > { %7278 = vmatprep.mubr.msk.bf16.mxu0 %vm2346_vm1, %v9828_v27 }
 0x544   : > { %4411 = vmatmul.mubr.bf16.gmra.mrb[80].mxu1 %v3804_v36  ;;  %v6724_v3 = vpop.f32.mrb[80].mxu0 }
 0x545   : > { %4418 = vmatprep.mubr.bf16.mxu1 %v9818_v48  ;;  %v6725_v45 = vpop.f32.mrb[81].mxu0 }
 0x546   : > { %v9973_v59 = vadd.f32 %v6725_v45, %v6724_v3  ;;  %v6727_v14 = vpop.f32.mrb[82].mxu0  ;;  %v11096_v45 = vld [vmem:[#allocation4_spill] sm:$0xff] }
 0x547   : > { %v6728_v40 = vpop.f32.mrb[83].mxu0 }
 0x548   : > { %v9975_v38 = vadd.f32 %v6728_v40, %v6727_v14 }
 0x549   : > { %7279 = vmatmul.mubr.msk.bf16.gmra.mrb[152].mxu0 %vm2346_vm1, %v9851_v53 }
 0x54a   : > { %7282 = vmatprep.mubr.msk.bf16.mxu0 %vm2346_vm1, %v9845_v43  ;;  %v3654_v43 = vpop.permute.xlu0 %3653 }
 0x54b   : > { %v3816_v53 = vsel %vm2346_vm1, %v9515_v8, %v3654_v43 }
 0x54c   : > { %4419 = vmatmul.mubr.bf16.gmra.mrb[84].mxu1 %v3808_v29  ;;  %v6730_v27 = vpop.f32.mrb[84].mxu0 }
 0x54d   : > { %4426 = vmatprep.mubr.bf16.mxu1 %v9876_v25  ;;  %v6731_v48 = vpop.f32.mrb[85].mxu0 }
 0x54e   : > { %v9984_v51 = vadd.f32 %v6731_v48, %v6730_v27  ;;  %v6733_v41 = vpop.f32.mrb[86].mxu0  ;;  %v3658_v31 = vpop.permute.xlu0 %3657  ;;  %v7509_v27 = vld [vmem:[%s11072_s7 + $0x48] sm:$0xff]  }
 0x54f   : > { %v6734_v52 = vpop.f32.mrb[87].mxu0  ;;  %6936 = vmatprep.subr.bf16.mxu1 %v7509_v27 }
 0x550   : > { %v9986_v49 = vadd.f32 %v6734_v52, %v6733_v41  ;;  %v7510_v41 = vld [vmem:[%s11072_s7 + $0x8] sm:$0xff]   ;;  %v7511_v52 = vld [vmem:[%s11072_s7 + $0x50] sm:$0xff]  }
 0x551   : > { %7283 = vmatmul.mubr.msk.bf16.gmra.mrb[156].mxu0 %vm2346_vm1, %v9857_v20  ;;  %v3656_v20 = vpop.permute.xlu1 %3655  ;;  %6937 = vmatpush3.bf16.msra.mxu1 %v7510_v41 }
 0x552   : > { %7286 = vmatprep.mubr.msk.bf16.mxu0 %vm2346_vm1, %v9868_v2  ;;  %v3820_v2 = vsel %vm2346_vm1, %v9578_v47, %v3656_v20  ;;  %v3662_v58 = vpop.permute.xlu0 %3661  ;;  %6938 = vmatprep.subr.bf16.mxu1 %v7511_v52 }
 0x554   : > { %4427 = vmatmul.mubr.bf16.gmra.mrb[88].mxu1 %v3812_v23 }
 0x555   : > { %4434 = vmatprep.mubr.bf16.mxu1 %v9883_v9 }
 0x559   : > { %7287 = vmatmul.mubr.msk.bf16.gmra.mrb[160].mxu0 %vm2346_vm1, %v7639_v4 }
 0x55c   : > { %4435 = vmatmul.mubr.bf16.gmra.mrb[92].mxu1 %v3816_v53 }
 0x55d   : > { %4442 = vmatprep.mubr.bf16.mxu1 %v9890_v19  ;;  %v3824_v19 = vsel %vm2346_vm1, %v9592_v18, %v3658_v31  ;;  %v3832_v18 = vsel %vm2346_vm1, %v9685_v22, %v3662_v58 }
 0x563   : > { %v6736_v25 = vpop.f32.mrb[88].mxu0 }
 0x564   : > { %4443 = vmatmul.mubr.bf16.gmra.mrb[96].mxu1 %v3820_v2  ;;  %v6737_v10 = vpop.f32.mrb[89].mxu0 }
 0x565   : > { %v10002_v57 = vadd.f32 %v6737_v10, %v6736_v25  ;;  %4450 = vmatprep.mubr.bf16.mxu1 %v9897_v21  ;;  %v6739_v9 = vpop.f32.mrb[90].mxu0  ;;  %v3660_v21 = vpop.permute.xlu1 %3659 }
 0x566   : > { %v6740_v54 = vpop.f32.mrb[91].mxu0  ;;  %v3828_v28 = vsel %vm2346_vm1, %v9661_v61, %v3660_v21 }
 0x567   : > { %v10005_v11 = vadd.f32 %v6740_v54, %v6739_v9 }
 0x569   : > { %v3664_v33 = vpop.permute.xlu1 %3663 }
 0x56a   : > { %v3836_v61 = vsel %vm2346_vm1, %v9744_v5, %v3664_v33 }
 0x56b   : > { %v6742_v8 = vpop.f32.mrb[92].mxu0 }
 0x56c   : > { %4451 = vmatmul.mubr.bf16.gmra.mrb[100].mxu1 %v3824_v19  ;;  %v6743_v55 = vpop.f32.mrb[93].mxu0  ;;  %v7513_v19 = vld [vmem:[%s11072_s7 + $0x58] sm:$0xff]  }
 0x56d   : > { %v10009_v56 = vadd.f32 %v6743_v55, %v6742_v8  ;;  %4458 = vmatprep.mubr.bf16.mxu1 %v9908_v7  ;;  %v6745_v47 = vpop.f32.mrb[94].mxu0  ;;  %v3670_v7 = vpop.permute.xlu0 %3669  ;;  %v7514_v55 = vld [vmem:[%s11072_s7 + $0x18] sm:$0xff]  }
 0x56e   : > { %v6746_v34 = vpop.f32.mrb[95].mxu0  ;;  %v3666_v50 = vpop.permute.xlu1 %3665 }
 0x56f   : > { %v10012_v32 = vadd.f32 %v6746_v34, %v6745_v47  ;;  %v3840_v36 = vsel %vm2346_vm1, %v9758_v30, %v3666_v50  ;;  %v7515_v47 = vld [vmem:[%s11072_s7 + $0x60] sm:$0xff]  }
 0x571   : > { %v3668_v48 = vpop.permute.xlu0 %3667 }
 0x572   : > { %v3844_v30 = vsel %vm2346_vm1, %v9862_v16, %v3668_v48  ;;  %v7512_v16 = vld [vmem:[%s11072_s7 + $0x10] sm:$0xff]  }
 0x573   : > { %6939 = vmatpush3.bf16.msra.mxu1 %v7512_v16 }
 0x574   : > { %4459 = vmatmul.mubr.bf16.gmra.mrb[104].mxu1 %v3828_v28  ;;  %6940 = vmatprep.subr.bf16.mxu1 %v7513_v19  ;;  %v10110_v19 = vld [vmem:[%s11071_s6] ss:$0 sm:$0xff] }
 0x575   : > { %4466 = vmatprep.mubr.bf16.mxu1 %v9915_v44  ;;  %v3847_v44 = vsel %vm2346_vm1, %v9764_v35, %v3670_v7  ;;  %v7516_v7 = vld [vmem:[%s11072_s7 + $0x20] sm:$0xff]  }
 0x577   : > { %6941 = vmatpush3.bf16.msra.mxu1 %v7514_v55 }
 0x578   : > { %6942 = vmatprep.subr.bf16.mxu1 %v7515_v47 }
 0x57b   : > { %6943 = vmatpush3.bf16.msra.mxu1 %v7516_v7 }
 0x57c   : > { %4467 = vmatmul.mubr.bf16.gmra.mrb[108].mxu1 %v3832_v18 }
 0x57d   : > { %4474 = vmatprep.mubr.bf16.mxu1 %v9922_v1 }
 0x583   : > { %v6748_v63 = vpop.f32.mrb[96].mxu0 }
 0x584   : > { %4475 = vmatmul.mubr.bf16.gmra.mrb[112].mxu1 %v3836_v61  ;;  %v6749_v12 = vpop.f32.mrb[97].mxu0 }
 0x585   : > { %v10027_v22 = vadd.f32 %v6749_v12, %v6748_v63  ;;  %4482 = vmatprep.mubr.bf16.mxu1 %v3847_v44  ;;  %v6751_v1 = vpop.f32.mrb[98].mxu0 }
 0x586   : > { %v6752_v46 = vpop.f32.mrb[99].mxu0 }
 0x587   : > { %v10029_v26 = vadd.f32 %v6752_v46, %v6751_v1  ;;  %v7517_v46 = vld [vmem:[%s11072_s7 + $0x68] sm:$0xff]  }
 0x588   : > { %6944 = vmatprep.subr.bf16.mxu1 %v7517_v46 }
 0x589   : > { %6945 = vmatpush3.bf16.msra.mxu1 %v7518_v39 }
 0x58b   : > { %v6754_v5 = vpop.f32.mrb[100].mxu0 }
 0x58c   : > { %4483 = vmatmul.mubr.bf16.gmra.mrb[116].mxu1 %v3840_v36  ;;  %v6755_v35 = vpop.f32.mrb[101].mxu0 }
 0x58d   : > { %v10036_v3 = vadd.f32 %v6755_v35, %v6754_v5  ;;  %6464 = vmatprep.mubr.msk.bf16.mxu1 %vm9444_vm6, %v11096_v45  ;;  %v6757_v40 = vpop.f32.mrb[102].mxu0 }
 0x58e   : > { %v6758_v6 = vpop.f32.mrb[103].mxu0 }
 0x58f   : > { %v10041_v29 = vadd.f32 %v6758_v6, %v6757_v40  ;;  %v7519_v6 = vld [vmem:[%s11072_s7 + $0x70] sm:$0xff]  }
 0x590   : > { %6946 = vmatprep.subr.bf16.mxu1 %v7519_v6 }
 0x594   : > { %4491 = vmatmul.mubr.bf16.gmra.mrb[120].mxu1 %v3844_v30 }
 0x5a3   : > { %v6760_v0 = vpop.f32.mrb[104].mxu0 }
 0x5a4   : > { %v6761_v23 = vpop.f32.mrb[105].mxu0 }
 0x5a5   : > { %v10054_v43 = vadd.f32 %v6761_v23, %v6760_v0  ;;  %v6763_v53 = vpop.f32.mrb[106].mxu0  ;;  %v7520_v23 = vld [vmem:[%s11072_s7 + $0x30] sm:$0xff]  }
 0x5a6   : > { %v6764_v20 = vpop.f32.mrb[107].mxu0  ;;  %6947 = vmatpush3.bf16.msra.mxu1 %v7520_v23 }
 0x5a7   : > { %v10056_v25 = vadd.f32 %v6764_v20, %v6763_v53 }
 0x5ab   : > { %v6766_v2 = vpop.f32.mrb[108].mxu0 }
 0x5ac   : > { %v6767_v10 = vpop.f32.mrb[109].mxu0 }
 0x5ad   : > { %v10061_v9 = vadd.f32 %v6767_v10, %v6766_v2  ;;  %v6769_v54 = vpop.f32.mrb[110].mxu0 }
 0x5ae   : > { %v6770_v31 = vpop.f32.mrb[111].mxu0 }
 0x5af   : > { %v10063_v8 = vadd.f32 %v6770_v31, %v6769_v54 }
 0x5c3   : > { %v6772_v34 = vpop.f32.mrb[112].mxu0 }
 0x5c4   : > { %v6773_v21 = vpop.f32.mrb[113].mxu0 }
 0x5c5   : > { %v10074_v28 = vadd.f32 %v6773_v21, %v6772_v34  ;;  %v6775_v58 = vpop.f32.mrb[114].mxu0  ;;  %v4212_v34 = vadd.f32 %v9900_v13, %v10110_v19 }
 0x5c6   : > { %v6776_v18 = vpop.f32.mrb[115].mxu0 }
 0x5c7   : > { %v10076_v33 = vadd.f32 %v6776_v18, %v6775_v58  ;;  %v7521_v18 = vld [vmem:[%s11072_s7 + $0x78] sm:$0xff]  }
 0x5c8   : > { %6948 = vmatprep.subr.bf16.mxu1 %v7521_v18 }
 0x5cb   : > { %v6778_v17 = vpop.f32.mrb[116].mxu0 }
 0x5cc   : > { %v6779_v63 = vpop.f32.mrb[117].mxu0 }
 0x5cd   : > { %v10081_v61 = vadd.f32 %v6779_v63, %v6778_v17  ;;  %v6781_v12 = vpop.f32.mrb[118].mxu0  ;;  %v4215_v17 = vadd.f32 %v9902_v60, %v10110_v19 }
 0x5ce   : > { %v6782_v44 = vpop.f32.mrb[119].mxu0 }
 0x5cf   : > { %v10083_v1 = vadd.f32 %v6782_v44, %v6781_v12 }
 0x5dc   : > { %v6784_v50 = vpop.f32.mrb[120].mxu0 }
 0x5dd   : > { %v6785_v5 = vpop.f32.mrb[121].mxu0 }
 0x5de   : > { %v10091_v36 = vadd.f32 %v6785_v5, %v6784_v50  ;;  %v6787_v35 = vpop.f32.mrb[122].mxu0 }
 0x5df   : > { %v6788_v40 = vpop.f32.mrb[123].mxu0 }
 0x5e0   : > { %v10096_v27 = vadd.f32 %v6788_v40, %v6787_v35  ;;  %v7522_v40 = vld [vmem:[%s11072_s7 + $0x38] sm:$0xff]  }
 0x5e1   : > { %6949 = vmatpush3.bf16.msra.mxu1 %v7522_v40 }
 0x5e4   : > { %v6790_v48 = vpop.f32.mrb[124].mxu0 }
 0x5e5   : > { %v6791_v30 = vpop.f32.mrb[125].mxu0 }
 0x5e6   : > { %v10098_v41 = vadd.f32 %v6791_v30, %v6790_v48  ;;  %v6793_v52 = vpop.f32.mrb[126].mxu0  ;;  %v4220_v30 = vadd.f32 %v9939_v37, %v10110_v19 }
 0x5e7   : > { %v6794_v0 = vpop.f32.mrb[127].mxu0 }
 0x5e8   : > { %v10103_v53 = vadd.f32 %v6794_v0, %v6793_v52  ;;  %v7523_v0 = vld [vmem:[%s11072_s7 + $0x100] sm:$0xff]  }
 0x5e9   : > { %7290 = vmatprep.subr.bf16.mxu1 %v7523_v0 }
 0x5ec   : > { %v6796_v20 = vpop.f32.mrb[128].mxu0 }
 0x5ed   : > { %v6797_v16 = vpop.f32.mrb[129].mxu0 }
 0x5ee   : > { %v10105_v2 = vadd.f32 %v6797_v16, %v6796_v20  ;;  %v6799_v10 = vpop.f32.mrb[130].mxu0 }
 0x5ef   : > { %v6800_v54 = vpop.f32.mrb[131].mxu0  ;;  %v6818_v31 = vpop.f32.mrb[60].mxu1 }
 0x5f0   : > { %v10112_v55 = vadd.f32 %v6800_v54, %v6799_v10  ;;  %v6819_v47 = vpop.f32.mrb[61].mxu1  ;;  %v4223_v10 = vadd.f32 %v9945_v24, %v10110_v19  ;;  %v4228_v24 = vadd.f32 %v9950_v42, %v10110_v19 }
 0x5f1   : > { %v6820_v21 = vadd.f32 %v6819_v47, %v6818_v31  ;;  %v6821_v58 = vpop.f32.mrb[62].mxu1 }
 0x5f2   : > { %11098 = vst [vmem:[#allocation5_spill] sm:$0xff] %v10112_v55  ;;  %v6822_v7 = vpop.f32.mrb[63].mxu1 }
 0x5f3   : > { %v6823_v63 = vadd.f32 %v6822_v7, %v6821_v58  ;;  %v4373_v12 = vadd.f32 %v6820_v21, %v4212_v34 }
 0x5f4   : > { %v7260_v44 = vpop.f32.mrb[132].mxu0 }
 0x5f5   : > { %v4533_v46 = vpop.f32.mrb[133].mxu0  ;;  %v4376_v39 = vadd.f32 %v6823_v63, %v4215_v17 }
 0x5f6   : > { %v4534_v50 = vadd.f32 %v4533_v46, %v4373_v12  ;;  %v7261_v5 = vpop.f32.mrb[134].mxu0 }
 0x5f7   : > { %v6824_v35 = vpop.f32.mrb[64].mxu1  ;;  %v4536_v13 = vpop.f32.mrb[135].mxu0 }
 0x5f8   : > { %v4537_v6 = vadd.f32 %v4536_v13, %v4376_v39  ;;  %v6825_v48 = vpop.f32.mrb[65].mxu1  ;;  %v4660_v23 = vmax.f32 %v4534_v50, 0.0 }
 0x5f9   : > { %v6826_v60 = vadd.f32 %v6825_v48, %v6824_v35  ;;  %v6827_v52 = vpop.f32.mrb[66].mxu1 }
 0x5fa   : > { %v4661_v20 = vmax.f32 %v4537_v6, 0.0  ;;  %v6828_v16 = vpop.f32.mrb[67].mxu1 }
 0x5fb   : > { %v4381_v54 = vadd.f32 %v6826_v60, %v4220_v30  ;;  %v6829_v31 = vadd.f32 %v6828_v16, %v6827_v52 }
 0x5fc   : > { %v4692_v47 = vpack.c.bf16 %v4661_v20, %v4660_v23  ;;  %v10131_v34 = vpop.f32.mrb[136].mxu0 }
 0x5fd   : > { %v4542_v37 = vadd.f32 %v7260_v44, %v4381_v54  ;;  %v4384_v21 = vadd.f32 %v6829_v31, %v4223_v10  ;;  %v4549_v58 = vpop.f32.mrb[137].mxu0  ;;  %v4231_v44 = vadd.f32 %v9956_v62, %v10110_v19 }
 0x5fe   : > { %v4709_v18 = vshrl.u32 %v4692_v47, 16  ;;  %v10133_v7 = vpop.f32.mrb[138].mxu0  ;;  %v4712_v39 = vshll.u32 %v4692_v47, 16 }
 0x5ff   : > { %v4545_v17 = vadd.f32 %v7261_v5, %v4384_v21  ;;  %v6830_v63 = vpop.f32.mrb[68].mxu1  ;;  %v4552_v12 = vpop.f32.mrb[139].mxu0  ;;  %v4662_v35 = vmax.f32 %v4542_v37, 0.0 }
 0x600   : > { %v4711_v46 = vrot.slane %v4709_v18, 7  ;;  %v6831_v50 = vpop.f32.mrb[69].mxu1 }
 0x601   : > { %v4663_v13 = vmax.f32 %v4545_v17, 0.0  ;;  %v6832_v40 = vadd.f32 %v6831_v50, %v6830_v63  ;;  %v6833_v6 = vpop.f32.mrb[70].mxu1 }
 0x602   : > { %v4714_v48 = vor.u32 %v4712_v39, %v4711_v46  ;;  %v6834_v30 = vpop.f32.mrb[71].mxu1  ;;  %v10141_v5 = vsel %vm7655_vm2, %v4711_v46, 0 }
 0x603   : > { %v4693_v60 = vpack.c.bf16 %v4663_v13, %v4662_v35  ;;  %v4389_v52 = vadd.f32 %v6832_v40, %v4228_v24  ;;  %v6835_v0 = vadd.f32 %v6834_v30, %v6833_v6  ;;  %v4892_v47 = vshll.u32 %v10141_v5, 16 }
 0x604   : > { %v10143_v23 = vpop.f32.mrb[140].mxu0  ;;  %v10147_v42 = vsel %vm7655_vm2, 0, %v4714_v48 }
 0x605   : > { %v4716_v20 = vshrl.u32 %v4693_v60, 16  ;;  %v4550_v16 = vadd.f32 %v4549_v58, %v4389_v52  ;;  %v4392_v10 = vadd.f32 %v6835_v0, %v4231_v44  ;;  %v10149_v54 = vpop.f32.mrb[141].mxu0  ;;  %5170 = vrot.lane.b32.xlu1 %v10147_v42, %s7567_s28  ;;  %v4887_v31 = vshll.u32 %v10147_v42, 16 }
 0x606   : > { %v10153_v62 = vpop.f32.mrb[142].mxu0  ;;  %v4719_v21 = vshll.u32 %v4693_v60, 16  ;;  %v4236_v58 = vadd.f32 %v9973_v59, %v10110_v19  ;;  %v4885_v50 = vshrl.u32 %v10147_v42, 16  ;;  %v4894_v60 = vrot.slane %v4892_v47, 1 }
 0x607   : > { %v4718_v37 = vrot.slane %v4716_v20, 7  ;;  %v4553_v18 = vadd.f32 %v4552_v12, %v4392_v10  ;;  %v6836_v17 = vpop.f32.mrb[72].mxu1  ;;  %v10157_v63 = vpop.f32.mrb[143].mxu0  ;;  %v4664_v46 = vmax.f32 %v4550_v16, 0.0  ;;  %v4889_v24 = vrot.slane %v4887_v31, 1 }
 0x608   : > { %v6837_v39 = vpop.f32.mrb[73].mxu1  ;;  %v4239_v12 = vadd.f32 %v9975_v38, %v10110_v19 }
 0x609   : > { %v4665_v35 = vmax.f32 %v4553_v18, 0.0  ;;  %v6838_v13 = vadd.f32 %v6837_v39, %v6836_v17  ;;  %v6839_v40 = vpop.f32.mrb[74].mxu1  ;;  %v4721_v6 = vor.u32 %v4719_v21, %v4718_v37  ;;  %v10164_v44 = vsel %vm7655_vm2, %v4718_v37, 0 }
 0x60a   : > { %v6840_v48 = vpop.f32.mrb[75].mxu1  ;;  %v4890_v30 = vor.u32 %v4889_v24, %v4885_v50  ;;  %v4904_v31 = vshll.u32 %v10164_v44, 16 }
 0x60b   : > { %v4694_v59 = vpack.c.bf16 %v4665_v35, %v4664_v46  ;;  %v4397_v52 = vadd.f32 %v6838_v13, %v4236_v58  ;;  %v6841_v0 = vadd.f32 %v6840_v48, %v6839_v40  ;;  %v10170_v20 = vsel %vm7655_vm2, 0, %v4721_v6 }
 0x60c   : > { %v10172_v16 = vpop.f32.mrb[144].mxu0  ;;  %v10175_v10 = vsel %vm597_vm4, %v4890_v30, %v4894_v60  ;;  %5172 = vrot.lane.b32.xlu0 %v10170_v20, %s7567_s28  ;;  %v4899_v38 = vshll.u32 %v10170_v20, 16  ;;  %v4897_v58 = vshrl.u32 %v10170_v20, 16  ;;  %v4906_v48 = vrot.slane %v4904_v31, 1 }
 0x60d   : > { %11099 = vst [vmem:[#allocation6_spill] sm:$0xff] %v10175_v10  ;;  %v4723_v47 = vshrl.u32 %v4694_v59, 16  ;;  %v4558_v37 = vadd.f32 %v10131_v34, %v4397_v52  ;;  %v4400_v21 = vadd.f32 %v6841_v0, %v4239_v12  ;;  %5064 = vrot.lane.b32.xlu1 %v10175_v10, %s7567_s28  ;;  %v10184_v18 = vpop.f32.mrb[145].mxu0  ;;  %v4726_v50 = vshll.u32 %v4694_v59, 16 }
 0x60e   : > { %v10186_v17 = vpop.f32.mrb[146].mxu0  ;;  %v4901_v46 = vrot.slane %v4899_v38, 1  ;;  %v4244_v34 = vadd.f32 %v9984_v51, %v10110_v19  ;;  %v7524_v51 = vld [vmem:[%s11072_s7 + $0xc0] sm:$0xff]  }
 0x60f   : > { %v4725_v39 = vrot.slane %v4723_v47, 7  ;;  %v4561_v24 = vadd.f32 %v10133_v7, %v4400_v21  ;;  %v6842_v35 = vpop.f32.mrb[76].mxu1  ;;  %v10190_v13 = vpop.f32.mrb[147].mxu0  ;;  %v4666_v40 = vmax.f32 %v4558_v37, 0.0  ;;  %v4247_v7 = vadd.f32 %v9986_v49, %v10110_v19  ;;  %7046 = vmatprep.subr.bf16.mxu0 %v7524_v51 }
 0x610   : > { %v6843_v6 = vpop.f32.mrb[77].mxu1  ;;  %v4902_v12 = vor.u32 %v4901_v46, %v4897_v58 }
 0x611   : > { %v4667_v30 = vmax.f32 %v4561_v24, 0.0  ;;  %v6844_v60 = vadd.f32 %v6843_v6, %v6842_v35  ;;  %v6845_v52 = vpop.f32.mrb[78].mxu1  ;;  %v4728_v0 = vor.u32 %v4726_v50, %v4725_v39  ;;  %v10196_v38 = vsel %vm7655_vm2, %v4725_v39, 0 }
 0x612   : > { %v6846_v59 = vpop.f32.mrb[79].mxu1  ;;  %v10201_v47 = vsel %vm597_vm4, %v4902_v12, %v4906_v48  ;;  %v4916_v39 = vshll.u32 %v10196_v38, 16 }
 0x613   : > { %11100 = vst [vmem:[#allocation7_spill] sm:$0xff] %v10201_v47  ;;  %v4695_v31 = vpack.c.bf16 %v4667_v30, %v4666_v40  ;;  %v4405_v37 = vadd.f32 %v6844_v60, %v4244_v34  ;;  %v6847_v21 = vadd.f32 %v6846_v59, %v6845_v52  ;;  %5066 = vrot.lane.b32.xlu1 %v10201_v47, %s7567_s28  ;;  %v10210_v58 = vsel %vm7655_vm2, 0, %v4728_v0  ;;  %v7525_v40 = vld [vmem:[%s11072_s7 + $0x80] sm:$0xff]  }
 0x614   : > { %v10212_v46 = vpop.f32.mrb[148].mxu0  ;;  %5174 = vrot.lane.b32.xlu0 %v10210_v58, %s7567_s28  ;;  %v4911_v49 = vshll.u32 %v10210_v58, 16  ;;  %v4909_v12 = vshrl.u32 %v10210_v58, 16  ;;  %7047 = vmatpush3.bf16.msra.mxu0 %v7525_v40 }
 0x615   : > { %v4730_v50 = vshrl.u32 %v4695_v31, 16  ;;  %v4566_v24 = vadd.f32 %v10149_v54, %v4405_v37  ;;  %v4408_v35 = vadd.f32 %v6847_v21, %v4247_v7  ;;  %v10219_v34 = vpop.f32.mrb[149].mxu0  ;;  %v4733_v60 = vshll.u32 %v4695_v31, 16 }
 0x616   : > { %v10224_v6 = vpop.f32.mrb[150].mxu0  ;;  %v4913_v48 = vrot.slane %v4911_v49, 1  ;;  %v4252_v54 = vadd.f32 %v10002_v57, %v10110_v19  ;;  %v4918_v21 = vrot.slane %v4916_v39, 1  ;;  %v7527_v57 = vld [vmem:[%s11072_s7 + $0xc8] sm:$0xff]  }
 0x617   : > { %v4732_v30 = vrot.slane %v4730_v50, 7  ;;  %v4569_v52 = vadd.f32 %v10157_v63, %v4408_v35  ;;  %v6848_v0 = vpop.f32.mrb[80].mxu1  ;;  %v10228_v59 = vpop.f32.mrb[151].mxu0  ;;  %v4668_v7 = vmax.f32 %v4566_v24, 0.0  ;;  %v4255_v63 = vadd.f32 %v10005_v11, %v10110_v19  ;;  %7048 = vmatprep.subr.bf16.mxu0 %v7527_v57 }
 0x618   : > { %v6849_v51 = vpop.f32.mrb[81].mxu1  ;;  %v4914_v37 = vor.u32 %v4913_v48, %v4909_v12 }
 0x619   : > { %v4669_v47 = vmax.f32 %v4569_v52, 0.0  ;;  %v6850_v10 = vadd.f32 %v6849_v51, %v6848_v0  ;;  %v6851_v14 = vpop.f32.mrb[82].mxu1  ;;  %v4735_v45 = vor.u32 %v4733_v60, %v4732_v30  ;;  %v10234_v31 = vsel %vm7655_vm2, %v4732_v30, 0 }
 0x61a   : > { %v6852_v49 = vpop.f32.mrb[83].mxu1  ;;  %v10239_v50 = vsel %vm597_vm4, %v4914_v37, %v4918_v21  ;;  %v4928_v48 = vshll.u32 %v10234_v31, 16 }
 0x61b   : > { %11101 = vst [vmem:[#allocation8_spill] sm:$0xff] %v10239_v50  ;;  %v4696_v39 = vpack.c.bf16 %v4669_v47, %v4668_v7  ;;  %v4413_v24 = vadd.f32 %v6850_v10, %v4252_v54  ;;  %v6853_v35 = vadd.f32 %v6852_v49, %v6851_v14  ;;  %5068 = vrot.lane.b32.xlu1 %v10239_v50, %s7567_s28  ;;  %v10248_v40 = vsel %vm7655_vm2, 0, %v4735_v45  ;;  %v7528_v45 = vld [vmem:[%s11072_s7 + $0x88] sm:$0xff]  }
 0x61c   : > { %v10250_v12 = vpop.f32.mrb[152].mxu0  ;;  %5176 = vrot.lane.b32.xlu0 %v10248_v40, %s7567_s28  ;;  %v4923_v11 = vshll.u32 %v10248_v40, 16  ;;  %v4921_v52 = vshrl.u32 %v10248_v40, 16  ;;  %7049 = vmatpush3.bf16.msra.mxu0 %v7528_v45 }
 0x61d   : > { %v4737_v47 = vshrl.u32 %v4696_v39, 16  ;;  %v4574_v14 = vadd.f32 %v10143_v23, %v4413_v24  ;;  %v4416_v10 = vadd.f32 %v6853_v35, %v4255_v63  ;;  %v10257_v30 = vpop.f32.mrb[153].mxu0  ;;  %v4740_v7 = vshll.u32 %v4696_v39, 16 }
 0x61e   : > { %v10262_v60 = vpop.f32.mrb[154].mxu0  ;;  %v4925_v0 = vrot.slane %v4923_v11, 1  ;;  %v4260_v23 = vadd.f32 %v10009_v56, %v10110_v19  ;;  %v4930_v24 = vrot.slane %v4928_v48, 1  ;;  %v7529_v56 = vld [vmem:[%s11072_s7 + $0xd0] sm:$0xff]  }
 0x61f   : > { %v4739_v54 = vrot.slane %v4737_v47, 7  ;;  %v4577_v51 = vadd.f32 %v10153_v62, %v4416_v10  ;;  %v6854_v37 = vpop.f32.mrb[84].mxu1  ;;  %v10266_v21 = vpop.f32.mrb[155].mxu0  ;;  %v4670_v63 = vmax.f32 %v4574_v14, 0.0  ;;  %v4263_v62 = vadd.f32 %v10012_v32, %v10110_v19  ;;  %v7530_v48 = vld [vmem:[%s11072_s7 + $0x90] sm:$0xff]   ;;  %7050 = vmatprep.subr.bf16.mxu0 %v7529_v56 }
 0x620   : > { %v6855_v49 = vpop.f32.mrb[85].mxu1  ;;  %v4926_v57 = vor.u32 %v4925_v0, %v4921_v52  ;;  %7051 = vmatpush3.bf16.msra.mxu0 %v7530_v48  ;;  %v7531_v48 = vld [vmem:[%s11072_s7 + $0xd8] sm:$0xff]  }
 0x621   : > { %v4671_v35 = vmax.f32 %v4577_v51, 0.0  ;;  %v6856_v50 = vadd.f32 %v6855_v49, %v6854_v37  ;;  %v6857_v4 = vpop.f32.mrb[86].mxu1  ;;  %v4742_v55 = vor.u32 %v4740_v7, %v4739_v54  ;;  %v10272_v39 = vsel %vm7655_vm2, %v4739_v54, 0  ;;  %7052 = vmatprep.subr.bf16.mxu0 %v7531_v48 }
 0x622   : > { %v6858_v11 = vpop.f32.mrb[87].mxu1  ;;  %v10277_v47 = vsel %vm597_vm4, %v4926_v57, %v4930_v24  ;;  %v4940_v54 = vshll.u32 %v10272_v39, 16 }
 0x623   : > { %11102 = vst [vmem:[#allocation9_spill] sm:$0xff] %v10277_v47  ;;  %v4697_v14 = vpack.c.bf16 %v4671_v35, %v4670_v63  ;;  %v4421_v10 = vadd.f32 %v6856_v50, %v4260_v23  ;;  %v6859_v45 = vadd.f32 %v6858_v11, %v6857_v4  ;;  %5070 = vrot.lane.b32.xlu1 %v10277_v47, %s7567_s28  ;;  %v10289_v32 = vsel %vm7655_vm2, 0, %v4742_v55 }
 0x624   : > { %v10291_v52 = vpop.f32.mrb[156].mxu0  ;;  %5178 = vrot.lane.b32.xlu0 %v10289_v32, %s7567_s28  ;;  %v4935_v0 = vshll.u32 %v10289_v32, 16  ;;  %v4933_v55 = vshrl.u32 %v10289_v32, 16  ;;  %v4268_v11 = vadd.f32 %v10027_v22, %v10110_v19  ;;  %v4271_v22 = vadd.f32 %v10029_v26, %v10110_v19  ;;  %v7534_v26 = vld [vmem:[%s11072_s7 + $0xa0] sm:$0xff]  }
 0x625   : > { %v4744_v7 = vshrl.u32 %v4697_v14, 16  ;;  %v4582_v4 = vadd.f32 %v10184_v18, %v4421_v10  ;;  %v4424_v50 = vadd.f32 %v6859_v45, %v4263_v62  ;;  %v10298_v51 = vpop.f32.mrb[157].mxu0  ;;  %v4747_v49 = vshll.u32 %v4697_v14, 16  ;;  %v7532_v14 = vld [vmem:[%s11072_s7 + $0x98] sm:$0xff]  }
 0x626   : > { %v10300_v37 = vpop.f32.mrb[158].mxu0  ;;  %v4937_v23 = vrot.slane %v4935_v0, 1  ;;  %v4942_v10 = vrot.slane %v4940_v54, 1  ;;  %7053 = vmatpush3.bf16.msra.mxu0 %v7532_v14 }
 0x627   : > { %v4746_v63 = vrot.slane %v4744_v7, 7  ;;  %v4585_v57 = vadd.f32 %v10190_v13, %v4424_v50  ;;  %v6860_v24 = vpop.f32.mrb[88].mxu1  ;;  %v10304_v35 = vpop.f32.mrb[159].mxu0  ;;  %v4672_v18 = vmax.f32 %v4582_v4, 0.0 }
 0x628   : > { %v6861_v62 = vpop.f32.mrb[89].mxu1  ;;  %v4938_v56 = vor.u32 %v4937_v23, %v4933_v55  ;;  %v7533_v55 = vld [vmem:[%s11072_s7 + $0xe0] sm:$0xff]  }
 0x629   : > { %v4673_v45 = vmax.f32 %v4585_v57, 0.0  ;;  %v6862_v13 = vadd.f32 %v6861_v62, %v6860_v24  ;;  %v6863_v0 = vpop.f32.mrb[90].mxu1  ;;  %v4749_v7 = vor.u32 %v4747_v49, %v4746_v63  ;;  %v10316_v50 = vsel %vm7655_vm2, %v4746_v63, 0  ;;  %7054 = vmatprep.subr.bf16.mxu0 %v7533_v55 }
 0x62a   : > { %v6864_v54 = vpop.f32.mrb[91].mxu1  ;;  %v10321_v4 = vsel %vm597_vm4, %v4938_v56, %v4942_v10  ;;  %7055 = vmatpush3.bf16.msra.mxu0 %v7534_v26  ;;  %v4276_v55 = vadd.f32 %v10036_v3, %v10110_v19  ;;  %v4279_v3 = vadd.f32 %v10041_v29, %v10110_v19  ;;  %v7538_v29 = vld [vmem:[%s11072_s7 + $0xb0] sm:$0xff]  }
 0x62b   : > { %11103 = vst [vmem:[#allocation10_spill] sm:$0xff] %v10321_v4  ;;  %v4698_v23 = vpack.c.bf16 %v4673_v45, %v4672_v18  ;;  %v4429_v57 = vadd.f32 %v6862_v13, %v4268_v11  ;;  %v6865_v24 = vadd.f32 %v6864_v54, %v6863_v0  ;;  %5072 = vrot.lane.b32.xlu1 %v10321_v4, %s7567_s28  ;;  %v10330_v63 = vsel %vm7655_vm2, 0, %v4749_v7 }
 0x62c   : > { %5180 = vrot.lane.b32.xlu0 %v10330_v63, %s7567_s28  ;;  %v4947_v49 = vshll.u32 %v10330_v63, 16  ;;  %v4952_v11 = vshll.u32 %v10316_v50, 16  ;;  %v10339_v18 = vpop.f32.mrb[160].mxu0  ;;  %v4945_v14 = vshrl.u32 %v10330_v63, 16 }
 0x62d   : > { %v4751_v62 = vshrl.u32 %v4698_v23, 16  ;;  %v4590_v56 = vadd.f32 %v10172_v16, %v4429_v57  ;;  %v4432_v10 = vadd.f32 %v6865_v24, %v4271_v22  ;;  %v10342_v48 = vpop.f32.mrb[161].mxu0  ;;  %v4754_v7 = vshll.u32 %v4698_v23, 16  ;;  %v7536_v23 = vld [vmem:[%s11072_s7 + $0xa8] sm:$0xff]  }
 0x62e   : > { %v4949_v45 = vrot.slane %v4947_v49, 1  ;;  %v10345_v13 = vpop.f32.mrb[162].mxu0  ;;  %v4954_v24 = vrot.slane %v4952_v11, 1  ;;  %v7535_v49 = vld [vmem:[%s11072_s7 + $0xe8] sm:$0xff]  }
 0x62f   : > { %11104 = vst [vmem:[#allocation11_spill] sm:$0xff] %v10345_v13  ;;  %v4753_v0 = vrot.slane %v4751_v62, 7  ;;  %v4593_v54 = vadd.f32 %v10186_v17, %v4432_v10  ;;  %v6866_v4 = vpop.f32.mrb[92].mxu1  ;;  %v10348_v47 = vpop.f32.mrb[163].mxu0  ;;  %v4674_v16 = vmax.f32 %v4590_v56, 0.0  ;;  %7056 = vmatprep.subr.bf16.mxu0 %v7535_v49 }
 0x630   : > { %v6867_v22 = vpop.f32.mrb[93].mxu1  ;;  %v4950_v57 = vor.u32 %v4949_v45, %v4945_v14  ;;  %v7537_v14 = vld [vmem:[%s11072_s7 + $0xf0] sm:$0xff]   ;;  %7057 = vmatpush3.bf16.msra.mxu0 %v7536_v23 }
 0x631   : > { %v4675_v17 = vmax.f32 %v4593_v54, 0.0  ;;  %v6868_v62 = vadd.f32 %v6867_v22, %v6866_v4  ;;  %v6869_v10 = vpop.f32.mrb[94].mxu1  ;;  %v4756_v13 = vor.u32 %v4754_v7, %v4753_v0  ;;  %v10360_v26 = vsel %vm7655_vm2, %v4753_v0, 0  ;;  %7058 = vmatprep.subr.bf16.mxu0 %v7537_v14 }
 0x632   : > { %11105 = vst [vmem:[#allocation12_spill] sm:$0xff] %v10360_v26  ;;  %v6870_v11 = vpop.f32.mrb[95].mxu1  ;;  %v10365_v56 = vsel %vm597_vm4, %v4950_v57, %v4954_v24 }
 0x633   : > { %11106 = vst [vmem:[#allocation13_spill] sm:$0xff] %v10365_v56  ;;  %v4699_v45 = vpack.c.bf16 %v4675_v17, %v4674_v16  ;;  %v4437_v4 = vadd.f32 %v6868_v62, %v4276_v55  ;;  %v6871_v54 = vadd.f32 %v6870_v11, %v6869_v10  ;;  %5074 = vrot.lane.b32.xlu1 %v10365_v56, %s7567_s28  ;;  %v10374_v0 = vsel %vm7655_vm2, 0, %v4756_v13 }
 0x634   : > { %5182 = vrot.lane.b32.xlu0 %v10374_v0, %s7567_s28  ;;  %v4959_v7 = vshll.u32 %v10374_v0, 16  ;;  %v4964_v55 = vshll.u32 %v10360_v26, 16  ;;  %v4957_v13 = vshrl.u32 %v10374_v0, 16  ;;  %7059 = vmatpush3.bf16.msra.mxu0 %v7538_v29  ;;  %v4284_v10 = vadd.f32 %v10054_v43, %v10110_v19 }
 0x635   : > { %v4758_v16 = vshrl.u32 %v4699_v45, 16  ;;  %v4598_v22 = vadd.f32 %v10219_v34, %v4437_v4  ;;  %v4440_v57 = vadd.f32 %v6871_v54, %v4279_v3  ;;  %v4761_v23 = vshll.u32 %v4699_v45, 16  ;;  %v7539_v34 = vld [vmem:[%s11072_s7 + $0xf8] sm:$0xff]  }
 0x636   : > { %v4961_v24 = vrot.slane %v4959_v7, 1  ;;  %v4966_v14 = vrot.slane %v4964_v55, 1  ;;  %v7540_v3 = vld [vmem:[%s11072_s7 + $0xb8] sm:$0xff]   ;;  %v4287_v43 = vadd.f32 %v10056_v25, %v10110_v19  ;;  %7060 = vmatprep.subr.bf16.mxu0 %v7539_v34  ;;  %v4292_v34 = vadd.f32 %v10061_v9, %v10110_v19 }
 0x637   : > { %v4760_v49 = vrot.slane %v4758_v16, 7  ;;  %v4601_v17 = vadd.f32 %v10228_v59, %v4440_v57  ;;  %v6872_v62 = vpop.f32.mrb[96].mxu1  ;;  %v4676_v11 = vmax.f32 %v4598_v22, 0.0  ;;  %v5124_v9 = vrot.slane %v10147_v42, 1 }
 0x638   : > { %v6873_v56 = vpop.f32.mrb[97].mxu1  ;;  %v4962_v26 = vor.u32 %v4961_v24, %v4957_v13  ;;  %7061 = vmatpush3.bf16.msra.mxu0 %v7540_v3 }
 0x639   : > { %v4677_v45 = vmax.f32 %v4601_v17, 0.0  ;;  %v6874_v4 = vadd.f32 %v6873_v56, %v6872_v62  ;;  %v6875_v59 = vpop.f32.mrb[98].mxu1  ;;  %v4763_v54 = vor.u32 %v4761_v23, %v4760_v49  ;;  %v10396_v29 = vsel %vm7655_vm2, %v4760_v49, 0 }
 0x63a   : > { %v6876_v7 = vpop.f32.mrb[99].mxu1  ;;  %v10401_v55 = vsel %vm597_vm4, %v4962_v26, %v4966_v14  ;;  %v4976_v26 = vshll.u32 %v10396_v29, 16 }
 0x63b   : > { %11107 = vst [vmem:[#allocation14_spill] sm:$0xff] %v10401_v55  ;;  %v4700_v16 = vpack.c.bf16 %v4677_v45, %v4676_v11  ;;  %v4445_v22 = vadd.f32 %v6874_v4, %v4284_v10  ;;  %v6877_v57 = vadd.f32 %v6876_v7, %v6875_v59  ;;  %5076 = vrot.lane.b32.xlu1 %v10401_v55, %s7567_s28  ;;  %v10407_v56 = vsel %vm7655_vm2, 0, %v4763_v54 }
 0x63c   : > { %5184 = vrot.lane.b32.xlu0 %v10407_v56, %s7567_s28  ;;  %v4971_v25 = vshll.u32 %v10407_v56, 16  ;;  %v4969_v23 = vshrl.u32 %v10407_v56, 16  ;;  %v4978_v59 = vrot.slane %v4976_v26, 1 }
 0x63d   : > { %v4765_v13 = vshrl.u32 %v4700_v16, 16  ;;  %v4606_v24 = vadd.f32 %v10212_v46, %v4445_v22  ;;  %v4448_v49 = vadd.f32 %v6877_v57, %v4287_v43  ;;  %v4768_v10 = vshll.u32 %v4700_v16, 16 }
 0x63e   : > { %v4973_v17 = vrot.slane %v4971_v25, 1  ;;  %v4295_v16 = vadd.f32 %v10063_v8, %v10110_v19 }
 0x63f   : > { %v4767_v62 = vrot.slane %v4765_v13, 7  ;;  %v4609_v11 = vadd.f32 %v10224_v6, %v4448_v49  ;;  %v6878_v14 = vpop.f32.mrb[100].mxu1  ;;  %v4678_v3 = vmax.f32 %v4606_v24, 0.0 }
 0x640   : > { %v6879_v45 = vpop.f32.mrb[101].mxu1  ;;  %v4974_v4 = vor.u32 %v4973_v17, %v4969_v23 }
 0x641   : > { %v4679_v54 = vmax.f32 %v4609_v11, 0.0  ;;  %v6880_v7 = vadd.f32 %v6879_v45, %v6878_v14  ;;  %v6881_v55 = vpop.f32.mrb[102].mxu1  ;;  %v4770_v46 = vor.u32 %v4768_v10, %v4767_v62  ;;  %v10420_v43 = vsel %vm7655_vm2, %v4767_v62, 0 }
 0x642   : > { %v6882_v6 = vpop.f32.mrb[103].mxu1  ;;  %v10425_v22 = vsel %vm597_vm4, %v4974_v4, %v4978_v59  ;;  %v4988_v24 = vshll.u32 %v10420_v43, 16  ;;  %v4300_v4 = vadd.f32 %v10074_v28, %v10110_v19 }
 0x643   : > { %v4701_v57 = vpack.c.bf16 %v4679_v54, %v4678_v3  ;;  %v4453_v25 = vadd.f32 %v6880_v7, %v4292_v34  ;;  %v6883_v26 = vadd.f32 %v6882_v6, %v6881_v55  ;;  %5078 = vrot.lane.b32.xlu1 %v10425_v22, %s7567_s28  ;;  %v10432_v13 = vsel %vm7655_vm2, 0, %v4770_v46 }
 0x644   : > { %5186 = vrot.lane.b32.xlu0 %v10432_v13, %s7567_s28  ;;  %v4983_v8 = vshll.u32 %v10432_v13, 16  ;;  %v5125_v55 = vrot.slane %v10141_v5, 1  ;;  %v4981_v62 = vshrl.u32 %v10432_v13, 16  ;;  %v4990_v54 = vrot.slane %v4988_v24, 1 }
 0x645   : > { %v4772_v49 = vshrl.u32 %v4701_v57, 16  ;;  %v4614_v23 = vadd.f32 %v10257_v30, %v4453_v25  ;;  %v4456_v17 = vadd.f32 %v6883_v26, %v4295_v16  ;;  %v4775_v14 = vshll.u32 %v4701_v57, 16 }
 0x646   : > { %v4985_v10 = vrot.slane %v4983_v8, 1  ;;  %v10443_v45 = vsel %vm849_vm3, %v5124_v9, %v5125_v55  ;;  %v4303_v9 = vadd.f32 %v10076_v33, %v10110_v19  ;;  %v5127_v25 = vrot.slane %v10170_v20, 1 }
 0x647   : > { %v4774_v11 = vrot.slane %v4772_v49, 7  ;;  %v4617_v34 = vadd.f32 %v10266_v21, %v4456_v17  ;;  %v6884_v3 = vpop.f32.mrb[104].mxu1  ;;  %v4680_v59 = vmax.f32 %v4614_v23, 0.0 }
 0x648   : > { %5218 = vrot.lane.b32.xlu0 %v10443_v45, %s7567_s28  ;;  %v6885_v30 = vpop.f32.mrb[105].mxu1  ;;  %v4986_v5 = vor.u32 %v4985_v10, %v4981_v62  ;;  %v5128_v10 = vrot.slane %v10164_v44, 1 }
 0x649   : > { %v4681_v7 = vmax.f32 %v4617_v34, 0.0  ;;  %v6886_v46 = vadd.f32 %v6885_v30, %v6884_v3  ;;  %v6887_v16 = vpop.f32.mrb[106].mxu1  ;;  %v4777_v6 = vor.u32 %v4775_v14, %v4774_v11  ;;  %v10451_v21 = vsel %vm7655_vm2, %v4774_v11, 0 }
 0x64a   : > { %v6888_v57 = vpop.f32.mrb[107].mxu1  ;;  %v10456_v28 = vsel %vm597_vm4, %v4986_v5, %v4990_v54  ;;  %v5000_v23 = vshll.u32 %v10451_v21, 16  ;;  %v10474_v30 = vsel %vm849_vm3, %v5127_v25, %v5128_v10  ;;  %v4308_v5 = vadd.f32 %v10081_v61, %v10110_v19 }
 0x64b   : > { %v4702_v26 = vpack.c.bf16 %v4681_v7, %v4680_v59  ;;  %v4461_v8 = vadd.f32 %v6886_v46, %v4300_v4  ;;  %v6889_v24 = vadd.f32 %v6888_v57, %v6887_v16  ;;  %v10461_v49 = vsel %vm7655_vm2, 0, %v4777_v6 }
 0x64c   : > { %5080 = vrot.lane.b32.xlu0 %v10456_v28, %s7567_s28  ;;  %5188 = vrot.lane.b32.xlu1 %v10461_v49, %s7567_s28  ;;  %v4995_v33 = vshll.u32 %v10461_v49, 16  ;;  %v4993_v11 = vshrl.u32 %v10461_v49, 16  ;;  %v5002_v7 = vrot.slane %v5000_v23, 1  ;;  %v4311_v57 = vadd.f32 %v10083_v1, %v10110_v19 }
 0x64d   : > { %v4779_v17 = vshrl.u32 %v4702_v26, 16  ;;  %v4622_v55 = vadd.f32 %v10250_v12, %v4461_v8  ;;  %v4464_v62 = vadd.f32 %v6889_v24, %v4303_v9  ;;  %v4782_v3 = vshll.u32 %v4702_v26, 16 }
 0x64e   : > { %v4997_v14 = vrot.slane %v4995_v33, 1  ;;  %v5130_v26 = vrot.slane %v10210_v58, 1 }
 0x64f   : > { %v4781_v34 = vrot.slane %v4779_v17, 7  ;;  %v4625_v4 = vadd.f32 %v10262_v60, %v4464_v62  ;;  %v6890_v59 = vpop.f32.mrb[108].mxu1  ;;  %v4682_v54 = vmax.f32 %v4622_v55, 0.0 }
 0x650   : > { %5220 = vrot.lane.b32.xlu1 %v10474_v30, %s7567_s28  ;;  %v6891_v12 = vpop.f32.mrb[109].mxu1  ;;  %v4998_v44 = vor.u32 %v4997_v14, %v4993_v11  ;;  %v5131_v11 = vrot.slane %v10196_v38, 1 }
 0x651   : > { %v4683_v46 = vmax.f32 %v4625_v4, 0.0  ;;  %v6892_v16 = vadd.f32 %v6891_v12, %v6890_v59  ;;  %v6893_v6 = vpop.f32.mrb[110].mxu1  ;;  %v4784_v9 = vor.u32 %v4782_v3, %v4781_v34  ;;  %v10482_v60 = vsel %vm7655_vm2, %v4781_v34, 0 }
 0x652   : > { %v6894_v25 = vpop.f32.mrb[111].mxu1  ;;  %v10487_v61 = vsel %vm597_vm4, %v4998_v44, %v5002_v7  ;;  %v5012_v17 = vshll.u32 %v10482_v60, 16  ;;  %v4316_v12 = vadd.f32 %v10091_v36, %v10110_v19 }
 0x653   : > { %v4703_v8 = vpack.c.bf16 %v4683_v46, %v4682_v54  ;;  %v4469_v24 = vadd.f32 %v6892_v16, %v4308_v5  ;;  %v6895_v33 = vadd.f32 %v6894_v25, %v6893_v6  ;;  %v10492_v23 = vsel %vm7655_vm2, 0, %v4784_v9 }
 0x654   : > { %5190 = vrot.lane.b32.xlu0 %v10492_v23, %s7567_s28  ;;  %5082 = vrot.lane.b32.xlu1 %v10487_v61, %s7567_s28  ;;  %v5007_v1 = vshll.u32 %v10492_v23, 16  ;;  %v5005_v14 = vshrl.u32 %v10492_v23, 16  ;;  %v10505_v54 = vsel %vm849_vm3, %v5130_v26, %v5131_v11  ;;  %v5014_v7 = vrot.slane %v5012_v17, 1 }
 0x655   : > { %v4786_v55 = vshrl.u32 %v4703_v8, 16  ;;  %v4630_v62 = vadd.f32 %v10298_v51, %v4469_v24  ;;  %v4472_v10 = vadd.f32 %v6895_v33, %v4311_v57  ;;  %v4789_v4 = vshll.u32 %v4703_v8, 16 }
 0x656   : > { %v5009_v34 = vrot.slane %v5007_v1, 1  ;;  %v4319_v57 = vadd.f32 %v10096_v27, %v10110_v19  ;;  %v5133_v26 = vrot.slane %v10248_v40, 1  ;;  %v5134_v11 = vrot.slane %v10234_v31, 1 }
 0x657   : > { %v4788_v3 = vrot.slane %v4786_v55, 7  ;;  %v4633_v59 = vadd.f32 %v10304_v35, %v4472_v10  ;;  %v6896_v5 = vpop.f32.mrb[112].mxu1  ;;  %v4684_v44 = vmax.f32 %v4630_v62, 0.0 }
 0x658   : > { %5222 = vrot.lane.b32.xlu0 %v10505_v54, %s7567_s28  ;;  %v6897_v51 = vpop.f32.mrb[113].mxu1  ;;  %v5010_v38 = vor.u32 %v5009_v34, %v5005_v14 }
 0x659   : > { %v4685_v46 = vmax.f32 %v4633_v59, 0.0  ;;  %v6898_v16 = vadd.f32 %v6897_v51, %v6896_v5  ;;  %v6899_v6 = vpop.f32.mrb[114].mxu1  ;;  %v4791_v9 = vor.u32 %v4789_v4, %v4788_v3  ;;  %v10513_v35 = vsel %vm7655_vm2, %v4788_v3, 0 }
 0x65a   : > { %v6900_v25 = vpop.f32.mrb[115].mxu1  ;;  %v10518_v36 = vsel %vm597_vm4, %v5010_v38, %v5014_v7  ;;  %v5024_v17 = vshll.u32 %v10513_v35, 16 }
 0x65b   : > { %v4704_v8 = vpack.c.bf16 %v4685_v46, %v4684_v44  ;;  %v4477_v24 = vadd.f32 %v6898_v16, %v4316_v12  ;;  %v6901_v33 = vadd.f32 %v6900_v25, %v6899_v6  ;;  %v10523_v1 = vsel %vm7655_vm2, 0, %v4791_v9 }
 0x65c   : > { %5084 = vrot.lane.b32.xlu0 %v10518_v36, %s7567_s28  ;;  %5192 = vrot.lane.b32.xlu1 %v10523_v1, %s7567_s28  ;;  %v5019_v27 = vshll.u32 %v10523_v1, 16  ;;  %v5017_v14 = vshrl.u32 %v10523_v1, 16  ;;  %v10536_v12 = vsel %vm849_vm3, %v5133_v26, %v5134_v11  ;;  %v4324_v44 = vadd.f32 %v10098_v41, %v10110_v19 }
 0x65d   : > { %v4793_v55 = vshrl.u32 %v4704_v8, 16  ;;  %v4638_v62 = vadd.f32 %v10291_v52, %v4477_v24  ;;  %v4480_v10 = vadd.f32 %v6901_v33, %v4319_v57  ;;  %v4796_v4 = vshll.u32 %v4704_v8, 16 }
 0x65e   : > { %v5021_v34 = vrot.slane %v5019_v27, 1  ;;  %v5026_v38 = vrot.slane %v5024_v17, 1  ;;  %v4327_v9 = vadd.f32 %v10103_v53, %v10110_v19  ;;  %v5136_v25 = vrot.slane %v10289_v32, 1 }
 0x65f   : > { %v4795_v3 = vrot.slane %v4793_v55, 7  ;;  %v4641_v59 = vadd.f32 %v10300_v37, %v4480_v10  ;;  %v6902_v5 = vpop.f32.mrb[116].mxu1  ;;  %v4686_v51 = vmax.f32 %v4638_v62, 0.0  ;;  %v5137_v10 = vrot.slane %v10272_v39, 1 }
 0x660   : > { %5224 = vrot.lane.b32.xlu1 %v10536_v12, %s7567_s28  ;;  %v6903_v52 = vpop.f32.mrb[117].mxu1  ;;  %v5022_v31 = vor.u32 %v5021_v34, %v5017_v14 }
 0x661   : > { %v4687_v7 = vmax.f32 %v4641_v59, 0.0  ;;  %v6904_v46 = vadd.f32 %v6903_v52, %v6902_v5  ;;  %v6905_v16 = vpop.f32.mrb[118].mxu1  ;;  %v4798_v6 = vor.u32 %v4796_v4, %v4795_v3  ;;  %v10544_v37 = vsel %vm7655_vm2, %v4795_v3, 0 }
 0x662   : > { %v6906_v57 = vpop.f32.mrb[119].mxu1  ;;  %v10549_v41 = vsel %vm597_vm4, %v5022_v31, %v5026_v38  ;;  %v5036_v27 = vshll.u32 %v10544_v37, 16  ;;  %v10567_v5 = vsel %vm849_vm3, %v5136_v25, %v5137_v10  ;;  %v5140_v10 = vrot.slane %v10316_v50, 1 }
 0x663   : > { %v4705_v26 = vpack.c.bf16 %v4687_v7, %v4686_v51  ;;  %v6907_v8 = vadd.f32 %v6906_v57, %v6905_v16  ;;  %v4485_v24 = vadd.f32 %v6904_v46, %v4324_v44  ;;  %v10554_v33 = vsel %vm7655_vm2, 0, %v4798_v6  ;;  %v7545_v16 = vld [vmem:[%s11071_s6] ss:$0 sm:$0xff] }
 0x664   : > { %5194 = vrot.lane.b32.xlu0 %v10554_v33, %s7567_s28  ;;  %5086 = vrot.lane.b32.xlu1 %v10549_v41, %s7567_s28  ;;  %v5031_v53 = vshll.u32 %v10554_v33, 16  ;;  %v5029_v11 = vshrl.u32 %v10554_v33, 16  ;;  %v4332_v44 = vadd.f32 %v10105_v2, %v10110_v19  ;;  %v5038_v52 = vrot.slane %v5036_v27, 1  ;;  %v11108_v2 = vld [vmem:[#allocation5_spill] sm:$0xff] }
 0x665   : > { %v4800_v17 = vshrl.u32 %v4705_v26, 16  ;;  %v4646_v55 = vadd.f32 %v10342_v48, %v4485_v24  ;;  %v4488_v62 = vadd.f32 %v6907_v8, %v4327_v9  ;;  %v4803_v3 = vshll.u32 %v4705_v26, 16 }
 0x666   : > { %v5033_v14 = vrot.slane %v5031_v53, 1  ;;  %v4335_v19 = vadd.f32 %v7545_v16, %v11108_v2  ;;  %v5139_v57 = vrot.slane %v10330_v63, 1 }
 0x667   : > { %v4802_v34 = vrot.slane %v4800_v17, 7  ;;  %v4649_v4 = vadd.f32 %v10348_v47, %v4488_v62  ;;  %v6908_v59 = vpop.f32.mrb[120].mxu1  ;;  %v4688_v51 = vmax.f32 %v4646_v55, 0.0 }
 0x668   : > { %5226 = vrot.lane.b32.xlu0 %v10567_v5, %s7567_s28  ;;  %v6909_v48 = vpop.f32.mrb[121].mxu1  ;;  %v5034_v39 = vor.u32 %v5033_v14, %v5029_v11 }
 0x669   : > { %v4689_v31 = vmax.f32 %v4649_v4, 0.0  ;;  %v6910_v38 = vadd.f32 %v6909_v48, %v6908_v59  ;;  %v6911_v7 = vpop.f32.mrb[122].mxu1  ;;  %v4805_v46 = vor.u32 %v4803_v3, %v4802_v34  ;;  %v10575_v47 = vsel %vm7655_vm2, %v4802_v34, 0  ;;  %v11109_v4 = vld [vmem:[#allocation11_spill] sm:$0xff] }
 0x66a   : > { %v6912_v6 = vpop.f32.mrb[123].mxu1  ;;  %v10582_v9 = vsel %vm597_vm4, %v5034_v39, %v5038_v52  ;;  %v5048_v27 = vshll.u32 %v10575_v47, 16 }
 0x66b   : > { %v4706_v25 = vpack.c.bf16 %v4689_v31, %v4688_v51  ;;  %v4493_v26 = vadd.f32 %v6910_v38, %v4332_v44  ;;  %v6913_v8 = vadd.f32 %v6912_v6, %v6911_v7  ;;  %v10587_v24 = vsel %vm7655_vm2, 0, %v4805_v46  ;;  %v11110_v6 = vld [vmem:[#allocation12_spill] sm:$0xff] }
 0x66c   : > { %5088 = vrot.lane.b32.xlu0 %v10582_v9, %s7567_s28  ;;  %5196 = vrot.lane.b32.xlu1 %v10587_v24, %s7567_s28  ;;  %v5043_v53 = vshll.u32 %v10587_v24, 16  ;;  %v5041_v11 = vshrl.u32 %v10587_v24, 16  ;;  %v10600_v44 = vsel %vm849_vm3, %v5139_v57, %v5140_v10  ;;  %v5050_v48 = vrot.slane %v5048_v27, 1 }
 0x66d   : > { %v4807_v17 = vshrl.u32 %v4706_v25, 16  ;;  %v4654_v55 = vadd.f32 %v10339_v18, %v4493_v26  ;;  %v4496_v62 = vadd.f32 %v6913_v8, %v4335_v19  ;;  %v4810_v3 = vshll.u32 %v4706_v25, 16 }
 0x66e   : > { %v5045_v14 = vrot.slane %v5043_v53, 1  ;;  %v5142_v46 = vrot.slane %v10374_v0, 1  ;;  %v5143_v57 = vrot.slane %v11110_v6, 1 }
 0x66f   : > { %v4809_v34 = vrot.slane %v4807_v17, 7  ;;  %v4657_v59 = vadd.f32 %v11109_v4, %v4496_v62  ;;  %v4690_v50 = vmax.f32 %v4654_v55, 0.0  ;;  %v11111_v55 = vld [vmem:[#allocation2_spill] sm:$0xff] }
 0x670   : > { %5228 = vrot.lane.b32.xlu1 %v10600_v44, %s7567_s28  ;;  %v5046_v51 = vor.u32 %v5045_v14, %v5041_v11  ;;  %v10625_v17 = vsel %vm849_vm3, %v5142_v46, %v5143_v57  ;;  %v7541_v46 = vld [vmem:[%s11072_s7 + $0x110] sm:$0xff]  }
 0x671   : > { %v4812_v39 = vor.u32 %v4810_v3, %v4809_v34  ;;  %v10606_v18 = vsel %vm7655_vm2, %v4809_v34, 0  ;;  %v4691_v52 = vmax.f32 %v4657_v59, 0.0  ;;  %v7526_v34 = vld [vmem:[%s11072_s7 + $0x108] sm:$0xff]   ;;  %v11112_v3 = vld [vmem:[#allocation4_spill] sm:$0xff] }
 0x672   : > { %v10609_v31 = vsel %vm597_vm4, %v5046_v51, %v5050_v48  ;;  %v5060_v2 = vshll.u32 %v10606_v18, 16  ;;  %v5145_v51 = vrot.slane %v10407_v56, 1  ;;  %v5148_v48 = vrot.slane %v10432_v13, 1 }
 0x673   : > { %v4707_v38 = vpack.c.bf16 %v4691_v52, %v4690_v50  ;;  %v10613_v7 = vsel %vm7655_vm2, 0, %v4812_v39  ;;  %v7546_v39 = vld [vmem:[%s11072_s7 + $0x100] sm:$0xff]   ;;  %v5146_v52 = vrot.slane %v10396_v29, 1  ;;  %v5151_v29 = vrot.slane %v10461_v49, 1 }
 0x674   : > { %5090 = vrot.lane.b32.xlu1 %v10609_v31, %s7567_s28  ;;  %5198 = vrot.lane.b32.xlu0 %v10613_v7, %s7567_s28  ;;  %v5055_v16 = vshll.u32 %v10613_v7, 16  ;;  %v5053_v25 = vshrl.u32 %v10613_v7, 16  ;;  %v5062_v11 = vrot.slane %v5060_v2, 1 }
 0x675   : > { %v4814_v19 = vshrl.u32 %v4707_v38, 16  ;;  %v4817_v53 = vshll.u32 %v4707_v38, 16  ;;  %v5149_v38 = vrot.slane %v10420_v43, 1  ;;  %v10659_v2 = vsel %vm849_vm3, %v5145_v51, %v5146_v52 }
 0x676   : > { %v5057_v26 = vrot.slane %v5055_v16, 1  ;;  %v5154_v43 = vrot.slane %v10492_v23, 1 }
 0x677   : > { %v4816_v8 = vrot.slane %v4814_v19, 7  ;;  %v5171_v27 = vpop.permute.xlu1 %5170  ;;  %v10662_v19 = vsel %vm849_vm3, %v5148_v48, %v5149_v38 }
 0x678   : > { %5230 = vrot.lane.b32.xlu0 %v10625_v17, %s7567_s28  ;;  %v5298_v62 = vsel %vm2346_vm1, %v11111_v55, %v5171_v27  ;;  %v5058_v10 = vor.u32 %v5057_v26, %v5053_v25  ;;  %v7542_v27 = vld [vmem:[%s11072_s7 + $0x118] sm:$0xff]  }
 0x679   : > { %5785 = vmatprep.mubr.bf16.mxu1 %v5298_v62  ;;  %v4819_v14 = vor.u32 %v4817_v53, %v4816_v8  ;;  %v5152_v53 = vrot.slane %v10451_v21, 1  ;;  %v5157_v62 = vrot.slane %v10523_v1, 1  ;;  %v5160_v21 = vrot.slane %v10554_v33, 1 }
 0x67a   : > { %6519 = vmatmul.mubr.msk.bf16.vlgmr.msra.gmra.mrb[124].mxu1 %vm9444_vm6, %v11112_v3  ;;  %v10638_v59 = vsel %vm597_vm4, %v5058_v10, %v5062_v11  ;;  %v4883_v10 = vsel %vm7655_vm2, %v4816_v8, 0  ;;  %v5161_v8 = vrot.slane %v10544_v37, 1  ;;  %v5163_v37 = vrot.slane %v10587_v24, 1 }
 0x67b   : > { %7291 = vmatpush3.bf16.msra.mxu1 %v7546_v39  ;;  %v10647_v50 = vsel %vm7655_vm2, 0, %v4819_v14  ;;  %v10684_v11 = vsel %vm849_vm3, %v5151_v29, %v5152_v53  ;;  %v5158_v14 = vrot.slane %v10513_v35, 1  ;;  %v5210_v51 = vshll.u32 %v4883_v10, 16 }
 0x67c   : > { %5200 = vrot.lane.b32.xlu1 %v10647_v50, %s7567_s28  ;;  %5092 = vrot.lane.b32.xlu0 %v10638_v59, %s7567_s28  ;;  %v5205_v25 = vshll.u32 %v10647_v50, 16  ;;  %v10703_v38 = vsel %vm849_vm3, %v5160_v21, %v5161_v8  ;;  %v5166_v29 = vrot.slane %v10613_v7, 1 }
 0x67d   : > { %7292 = vmatprep.subr.bf16.mxu1 %v7526_v34  ;;  %v10700_v52 = vsel %vm849_vm3, %v5157_v62, %v5158_v14 }
 0x67e   : > { %v5173_v16 = vpop.permute.xlu0 %5172 }
 0x67f   : > { %v5065_v6 = vpop.permute.xlu1 %5064  ;;  %v5302_v57 = vsel %vm2346_vm1, %v10443_v45, %v5173_v16  ;;  %7293 = vmatpush3.bf16.msra.mxu1 %v7526_v34  ;;  %v5155_v45 = vrot.slane %v10482_v60, 1  ;;  %v5207_v60 = vrot.slane %v5205_v25, 1  ;;  %v5203_v34 = vshrl.u32 %v10647_v50, 16 }
 0x680   : > { %5232 = vrot.lane.b32.xlu1 %v10659_v2, %s7567_s28  ;;  %5234 = vrot.lane.b32.xlu0 %v10662_v19, %s7567_s28  ;;  %v5253_v26 = vsel %vm2346_vm1, %v10147_v42, %v5065_v6  ;;  %v5212_v16 = vrot.slane %v5210_v51, 1  ;;  %v5216_v25 = vrot.slane %v4883_v10, 1 }
 0x681   : > { %5793 = vmatprep.mubr.bf16.mxu1 %v5302_v57  ;;  %7294 = vmatprep.subr.bf16.mxu1 %v7541_v46  ;;  %v10687_v42 = vsel %vm849_vm3, %v5154_v43, %v5155_v45  ;;  %v5215_v43 = vrot.slane %v10647_v50, 1 }
 0x682   : > { %5794 = vmatmul.mubr.bf16.gmra.mrb[128].mxu1 %v5253_v26 }
 0x683   : > { %7295 = vmatpush3.bf16.msra.mxu1 %v7541_v46  ;;  %v5208_v46 = vor.u32 %v5207_v60, %v5203_v34 }
 0x684   : > { %5236 = vrot.lane.b32.xlu1 %v10684_v11, %s7567_s28  ;;  %5238 = vrot.lane.b32.xlu0 %v10687_v42, %s7567_s28 }
 0x685   : > { %v5067_v15 = vpop.permute.xlu1 %5066  ;;  %7296 = vmatprep.subr.bf16.mxu1 %v7542_v27  ;;  %v10717_v57 = vsel %vm597_vm4, %v5208_v46, %v5212_v16 }
 0x686   : > { %v5175_v48 = vpop.permute.xlu0 %5174  ;;  %v5256_v39 = vsel %vm2346_vm1, %v10170_v20, %v5067_v15  ;;  %v5164_v20 = vrot.slane %v10575_v47, 1  ;;  %v5167_v47 = vrot.slane %v10606_v18, 1 }
 0x687   : > { %5946 = vmatprep.mubr.bf16.mxu0 %v5256_v39  ;;  %v5306_v35 = vsel %vm2346_vm1, %v10474_v30, %v5175_v48  ;;  %7297 = vmatpush3.bf16.msra.mxu1 %v7542_v27  ;;  %v10730_v27 = vsel %vm849_vm3, %v5215_v43, %v5216_v25 }
 0x688   : > { %5240 = vrot.lane.b32.xlu1 %v10700_v52, %s7567_s28  ;;  %5242 = vrot.lane.b32.xlu0 %v10703_v38, %s7567_s28  ;;  %v10714_v6 = vsel %vm849_vm3, %v5163_v37, %v5164_v20  ;;  %v10727_v45 = vsel %vm849_vm3, %v5166_v29, %v5167_v47  ;;  %v11114_v47 = vld [vmem:[#allocation6_spill] sm:$0xff] }
 0x689   : > { %5801 = vmatprep.mubr.bf16.mxu1 %v5306_v35 }
 0x68a   : > { %5802 = vmatmul.mubr.bf16.gmra.mrb[132].mxu1 %v5256_v39 }
 0x68c   : > { %5244 = vrot.lane.b32.xlu1 %v10714_v6, %s7567_s28  ;;  %5250 = vrot.lane.b32.xlu0 %v10717_v57, %s7567_s28 }
 0x68d   : > { %v5069_v26 = vpop.permute.xlu1 %5068 }
 0x68e   : > { %v5177_v53 = vpop.permute.xlu0 %5176  ;;  %v5259_v18 = vsel %vm2346_vm1, %v10210_v58, %v5069_v26 }
 0x68f   : > { %v5310_v62 = vsel %vm2346_vm1, %v10505_v54, %v5177_v53 }
 0x690   : > { %5246 = vrot.lane.b32.xlu1 %v10727_v45, %s7567_s28  ;;  %5248 = vrot.lane.b32.xlu0 %v10730_v27, %s7567_s28 }
 0x691   : > { %5809 = vmatprep.mubr.bf16.mxu1 %v5310_v62 }
 0x692   : > { %5810 = vmatmul.mubr.bf16.gmra.mrb[136].mxu1 %v5259_v18 }
 0x695   : > { %v5071_v10 = vpop.permute.xlu1 %5070 }
 0x696   : > { %v5179_v21 = vpop.permute.xlu0 %5178  ;;  %v5262_v14 = vsel %vm2346_vm1, %v10248_v40, %v5071_v10 }
 0x697   : > { %v5314_v60 = vsel %vm2346_vm1, %v10536_v12, %v5179_v21  ;;  %v11115_v21 = vld [vmem:[#allocation7_spill] sm:$0xff] }
 0x698   : > { %5817 = vmatprep.mubr.bf16.mxu1 %v5314_v60 }
 0x69a   : > { %5818 = vmatmul.mubr.bf16.gmra.mrb[140].mxu1 %v5262_v14 }
 0x69d   : > { %v5073_v15 = vpop.permute.xlu1 %5072 }
 0x69e   : > { %v5181_v8 = vpop.permute.xlu0 %5180  ;;  %v5265_v58 = vsel %vm2346_vm1, %v10289_v32, %v5073_v15 }
 0x69f   : > { %v5318_v34 = vsel %vm2346_vm1, %v10567_v5, %v5181_v8 }
 0x6a0   : > { %5825 = vmatprep.mubr.bf16.mxu1 %v5318_v34 }
 0x6a2   : > { %5826 = vmatmul.mubr.bf16.gmra.mrb[144].mxu1 %v5265_v58 }
 0x6a5   : > { %v5075_v51 = vpop.permute.xlu1 %5074 }
 0x6a6   : > { %v5183_v48 = vpop.permute.xlu0 %5182  ;;  %v5268_v40 = vsel %vm2346_vm1, %v10330_v63, %v5075_v51  ;;  %v11116_v51 = vld [vmem:[#allocation8_spill] sm:$0xff] }
 0x6a7   : > { %v5322_v39 = vsel %vm2346_vm1, %v10600_v44, %v5183_v48 }
 0x6a8   : > { %5833 = vmatprep.mubr.bf16.mxu1 %v5322_v39 }
 0x6aa   : > { %5834 = vmatmul.mubr.bf16.gmra.mrb[148].mxu1 %v5268_v40 }
 0x6ad   : > { %v5077_v35 = vpop.permute.xlu1 %5076 }
 0x6ae   : > { %v5185_v37 = vpop.permute.xlu0 %5184  ;;  %v5271_v32 = vsel %vm2346_vm1, %v10374_v0, %v5077_v35 }
 0x6af   : > { %v5326_v46 = vsel %vm2346_vm1, %v10625_v17, %v5185_v37 }
 0x6b0   : > { %5841 = vmatprep.mubr.bf16.mxu1 %v5326_v46  ;;  %v11117_v46 = vld [vmem:[#allocation9_spill] sm:$0xff] }
 0x6b2   : > { %5842 = vmatmul.mubr.bf16.gmra.mrb[152].mxu1 %v5271_v32 }
 0x6b5   : > { %v5079_v20 = vpop.permute.xlu1 %5078 }
 0x6b6   : > { %v5187_v16 = vpop.permute.xlu0 %5186  ;;  %v5274_v63 = vsel %vm2346_vm1, %v10407_v56, %v5079_v20 }
 0x6b7   : > { %v5330_v29 = vsel %vm2346_vm1, %v10659_v2, %v5187_v16 }
 0x6b8   : > { %5849 = vmatprep.mubr.bf16.mxu1 %v5330_v29 }
 0x6ba   : > { %v5219_v43 = vpop.permute.xlu0 %5218  ;;  %5850 = vmatmul.mubr.bf16.gmra.mrb[156].mxu1 %v5274_v63 }
 0x6bb   : > { %v5362_v25 = vsel %vm2346_vm1, %v11114_v47, %v5219_v43  ;;  %v11118_v47 = vld [vmem:[#allocation10_spill] sm:$0xff] }
 0x6bc   : > { %5947 = vmatmul.mubr.bf16.vlgmr.msra.gmra.mrb[164].mxu0 %v5362_v25 }
 0x6bd   : > { %5954 = vmatprep.mubr.bf16.mxu0 %v5259_v18 }
 0x6be   : > { %v5081_v26 = vpop.permute.xlu0 %5080  ;;  %v5189_v53 = vpop.permute.xlu1 %5188 }
 0x6bf   : > { %v5334_v0 = vsel %vm2346_vm1, %v10662_v19, %v5189_v53  ;;  %v5277_v62 = vsel %vm2346_vm1, %v10432_v13, %v5081_v26 }
 0x6c0   : > { %5857 = vmatprep.mubr.bf16.mxu1 %v5334_v0 }
 0x6c2   : > { %5858 = vmatmul.mubr.bf16.gmra.mrb[160].mxu1 %v5277_v62  ;;  %v5221_v10 = vpop.permute.xlu1 %5220 }
 0x6c3   : > { %v5366_v56 = vsel %vm2346_vm1, %v11115_v21, %v5221_v10  ;;  %v11119_v10 = vld [vmem:[#allocation13_spill] sm:$0xff] }
 0x6c4   : > { %5955 = vmatmul.mubr.bf16.gmra.mrb[168].mxu0 %v5366_v56 }
 0x6c5   : > { %5962 = vmatprep.mubr.bf16.mxu0 %v5262_v14 }
 0x6c6   : > { %v5191_v60 = vpop.permute.xlu0 %5190  ;;  %v5083_v15 = vpop.permute.xlu1 %5082 }
 0x6c7   : > { %v5338_v18 = vsel %vm2346_vm1, %v10684_v11, %v5191_v60  ;;  %v5280_v8 = vsel %vm2346_vm1, %v10461_v49, %v5083_v15 }
 0x6c8   : > { %5865 = vmatprep.mubr.bf16.mxu1 %v5338_v18  ;;  %v11120_v18 = vld [vmem:[#allocation14_spill] sm:$0xff] }
 0x6ca   : > { %v5223_v34 = vpop.permute.xlu0 %5222  ;;  %5866 = vmatmul.mubr.bf16.gmra.mrb[164].mxu1 %v5280_v8 }
 0x6cb   : > { %v5370_v13 = vsel %vm2346_vm1, %v11116_v51, %v5223_v34 }
 0x6cc   : > { %5963 = vmatmul.mubr.bf16.gmra.mrb[172].mxu0 %v5370_v13 }
 0x6cd   : > { %5970 = vmatprep.mubr.bf16.mxu0 %v5265_v58 }
 0x6ce   : > { %v5085_v48 = vpop.permute.xlu0 %5084  ;;  %v5193_v39 = vpop.permute.xlu1 %5192 }
 0x6cf   : > { %v5342_v14 = vsel %vm2346_vm1, %v10687_v42, %v5193_v39  ;;  %v5283_v35 = vsel %vm2346_vm1, %v10492_v23, %v5085_v48 }
 0x6d0   : > { %5873 = vmatprep.mubr.bf16.mxu1 %v5342_v14 }
 0x6d2   : > { %5874 = vmatmul.mubr.bf16.gmra.mrb[168].mxu1 %v5283_v35  ;;  %v5225_v37 = vpop.permute.xlu1 %5224 }
 0x6d3   : > { %v5374_v49 = vsel %vm2346_vm1, %v11117_v46, %v5225_v37 }
 0x6d4   : > { %5971 = vmatmul.mubr.bf16.gmra.mrb[176].mxu0 %v5374_v49 }
 0x6d5   : > { %5978 = vmatprep.mubr.bf16.mxu0 %v5268_v40 }
 0x6d6   : > { %v5195_v20 = vpop.permute.xlu0 %5194  ;;  %v5087_v16 = vpop.permute.xlu1 %5086 }
 0x6d7   : > { %v5346_v58 = vsel %vm2346_vm1, %v10700_v52, %v5195_v20  ;;  %v5286_v29 = vsel %vm2346_vm1, %v10523_v1, %v5087_v16 }
 0x6d8   : > { %5881 = vmatprep.mubr.bf16.mxu1 %v5346_v58 }
 0x6da   : > { %v5227_v43 = vpop.permute.xlu0 %5226  ;;  %5882 = vmatmul.mubr.bf16.gmra.mrb[172].mxu1 %v5286_v29 }
 0x6db   : > { %v5378_v23 = vsel %vm2346_vm1, %v11118_v47, %v5227_v43 }
 0x6dc   : > { %5979 = vmatmul.mubr.bf16.gmra.mrb[180].mxu0 %v5378_v23 }
 0x6dd   : > { %5986 = vmatprep.mubr.bf16.mxu0 %v5271_v32 }
 0x6de   : > { %v5089_v25 = vpop.permute.xlu0 %5088  ;;  %v5197_v26 = vpop.permute.xlu1 %5196 }
 0x6df   : > { %v5350_v40 = vsel %vm2346_vm1, %v10703_v38, %v5197_v26  ;;  %v5289_v53 = vsel %vm2346_vm1, %v10554_v33, %v5089_v25 }
 0x6e0   : > { %5889 = vmatprep.mubr.bf16.mxu1 %v5350_v40 }
 0x6e2   : > { %5890 = vmatmul.mubr.bf16.gmra.mrb[176].mxu1 %v5289_v53  ;;  %v5229_v0 = vpop.permute.xlu1 %5228 }
 0x6e3   : > { %v5382_v1 = vsel %vm2346_vm1, %v11119_v10, %v5229_v0 }
 0x6e4   : > { %5987 = vmatmul.mubr.bf16.gmra.mrb[184].mxu0 %v5382_v1 }
 0x6e5   : > { %5994 = vmatprep.mubr.bf16.mxu0 %v5274_v63 }
 0x6e6   : > { %v5199_v21 = vpop.permute.xlu0 %5198  ;;  %v5091_v56 = vpop.permute.xlu1 %5090 }
 0x6e7   : > { %v5354_v32 = vsel %vm2346_vm1, %v10714_v6, %v5199_v21  ;;  %v5292_v60 = vsel %vm2346_vm1, %v10587_v24, %v5091_v56 }
 0x6e8   : > { %5897 = vmatprep.mubr.bf16.mxu1 %v5354_v32 }
 0x6ea   : > { %v5231_v15 = vpop.permute.xlu0 %5230  ;;  %5898 = vmatmul.mubr.bf16.gmra.mrb[180].mxu1 %v5292_v60 }
 0x6eb   : > { %v5386_v33 = vsel %vm2346_vm1, %v11120_v18, %v5231_v15 }
 0x6ec   : > { %5995 = vmatmul.mubr.bf16.gmra.mrb[188].mxu0 %v5386_v33 }
 0x6ed   : > { %6002 = vmatprep.mubr.bf16.mxu0 %v5277_v62 }
 0x6ee   : > { %v5093_v34 = vpop.permute.xlu0 %5092  ;;  %v5201_v51 = vpop.permute.xlu1 %5200 }
 0x6ef   : > { %v5358_v63 = vsel %vm2346_vm1, %v10727_v45, %v5201_v51  ;;  %v5295_v13 = vsel %vm2346_vm1, %v10613_v7, %v5093_v34 }
 0x6f0   : > { %5905 = vmatprep.mubr.bf16.mxu1 %v5358_v63 }
 0x6f2   : > { %5906 = vmatmul.mubr.bf16.gmra.mrb[184].mxu1 %v5295_v13  ;;  %v5233_v48 = vpop.permute.xlu1 %5232  ;;  %v5235_v62 = vpop.permute.xlu0 %5234 }
 0x6f3   : > { %7298 = vmatprep.mubr.msk.bf16.mxu1 %vm2346_vm1, %v10474_v30  ;;  %v5390_v24 = vsel %vm2346_vm1, %v10425_v22, %v5233_v48  ;;  %v5394_v7 = vsel %vm2346_vm1, %v10456_v28, %v5235_v62 }
 0x6f4   : > { %6003 = vmatmul.mubr.bf16.gmra.mrb[192].mxu0 %v5390_v24 }
 0x6f5   : > { %6010 = vmatprep.mubr.bf16.mxu0 %v5280_v8 }
 0x6f6   : > { %v5237_v39 = vpop.permute.xlu1 %5236  ;;  %v5239_v30 = vpop.permute.xlu0 %5238 }
 0x6f7   : > { %v5398_v22 = vsel %vm2346_vm1, %v10487_v61, %v5237_v39  ;;  %v5402_v28 = vsel %vm2346_vm1, %v10518_v36, %v5239_v30 }
 0x6fa   : > { %7299 = vmatmul.mubr.msk.bf16.vlgmr.msra.gmra.mrb[188].mxu1 %vm2346_vm1, %v10505_v54  ;;  %v5241_v54 = vpop.permute.xlu1 %5240 }
 0x6fb   : > { %7302 = vmatprep.mubr.msk.bf16.mxu1 %vm2346_vm1, %v10536_v12  ;;  %v5406_v61 = vsel %vm2346_vm1, %v10549_v41, %v5241_v54  ;;  %v5243_v12 = vpop.permute.xlu0 %5242 }
 0x6fc   : > { %6011 = vmatmul.mubr.bf16.gmra.mrb[196].mxu0 %v5394_v7  ;;  %v5410_v36 = vsel %vm2346_vm1, %v10582_v9, %v5243_v12 }
 0x6fd   : > { %6018 = vmatprep.mubr.bf16.mxu0 %v5283_v35 }
 0x702   : > { %7303 = vmatmul.mubr.msk.bf16.gmra.mrb[192].mxu1 %vm2346_vm1, %v10567_v5  ;;  %v5245_v5 = vpop.permute.xlu1 %5244 }
 0x703   : > { %7306 = vmatprep.mubr.msk.bf16.mxu1 %vm2346_vm1, %v10600_v44  ;;  %v5251_v44 = vpop.permute.xlu0 %5250  ;;  %v5414_v41 = vsel %vm2346_vm1, %v10609_v31, %v5245_v5 }
 0x704   : > { %6019 = vmatmul.mubr.bf16.gmra.mrb[200].mxu0 %v5398_v22  ;;  %v10888_v22 = vld [vmem:[%s11073_s8] ss:$0 sm:$0xff] }
 0x705   : > { %6026 = vmatprep.mubr.bf16.mxu0 %v5286_v29 }
 0x707   : > { %v5249_v31 = vpop.permute.xlu0 %5248 }
 0x70a   : > { %7307 = vmatmul.mubr.msk.bf16.gmra.mrb[196].mxu1 %vm2346_vm1, %v10625_v17  ;;  %v5425_v17 = vsel %vm2346_vm1, %v10647_v50, %v5251_v44  ;;  %v5422_v50 = vsel %vm2346_vm1, %v10717_v57, %v5249_v31 }
 0x70b   : > { %7310 = vmatprep.mubr.msk.bf16.mxu1 %vm2346_vm1, %v10659_v2  ;;  %v5247_v2 = vpop.permute.xlu1 %5246 }
 0x70c   : > { %6027 = vmatmul.mubr.bf16.gmra.mrb[204].mxu0 %v5402_v28  ;;  %v5418_v9 = vsel %vm2346_vm1, %v10638_v59, %v5247_v2 }
 0x70d   : > { %6034 = vmatprep.mubr.bf16.mxu0 %v5289_v53 }
 0x712   : > { %7311 = vmatmul.mubr.msk.bf16.gmra.mrb[200].mxu1 %vm2346_vm1, %v10662_v19 }
 0x713   : > { %7314 = vmatprep.mubr.msk.bf16.mxu1 %vm2346_vm1, %v10684_v11 }
 0x714   : > { %6035 = vmatmul.mubr.bf16.gmra.mrb[208].mxu0 %v5406_v61 }
 0x715   : > { %6042 = vmatprep.mubr.bf16.mxu0 %v5292_v60 }
 0x71a   : > { %7315 = vmatmul.mubr.msk.bf16.gmra.mrb[204].mxu1 %vm2346_vm1, %v10687_v42 }
 0x71b   : > { %7318 = vmatprep.mubr.msk.bf16.mxu1 %vm2346_vm1, %v10700_v52 }
 0x71c   : > { %6043 = vmatmul.mubr.bf16.gmra.mrb[212].mxu0 %v5410_v36 }
 0x71d   : > { %6050 = vmatprep.mubr.bf16.mxu0 %v5295_v13 }
 0x722   : > { %7319 = vmatmul.mubr.msk.bf16.gmra.mrb[208].mxu1 %vm2346_vm1, %v10703_v38 }
 0x723   : > { %7322 = vmatprep.mubr.msk.bf16.mxu1 %vm2346_vm1, %v10714_v6 }
 0x724   : > { %6051 = vmatmul.mubr.bf16.gmra.mrb[216].mxu0 %v5414_v41 }
 0x725   : > { %6058 = vmatprep.mubr.bf16.mxu0 %v5425_v17 }
 0x72a   : > { %7323 = vmatmul.mubr.msk.bf16.gmra.mrb[212].mxu1 %vm2346_vm1, %v10727_v45 }
 0x72b   : > { %7326 = vmatprep.mubr.msk.bf16.mxu1 %vm2346_vm1, %v10730_v27 }
 0x72c   : > { %6059 = vmatmul.mubr.bf16.gmra.mrb[220].mxu0 %v5418_v9 }
 0x72d   : > { %6521 = vmatprep.mubr.msk.bf16.mxu0 %vm9444_vm6, %v11112_v3 }
 0x732   : > { %7327 = vmatmul.mubr.msk.bf16.gmra.mrb[216].mxu1 %vm2346_vm1, %v11111_v55 }
 0x734   : > { %6067 = vmatmul.mubr.bf16.gmra.mrb[224].mxu0 %v5422_v50 }
 0x74d   : > { %v6950_v19 = vpop.f32.mrb[124].mxu1 }
 0x74e   : > { %v6951_v11 = vpop.f32.mrb[125].mxu1 }
 0x74f   : > { %v6952_v42 = vadd.f32 %v6951_v11, %v6950_v19  ;;  %v6953_v52 = vpop.f32.mrb[126].mxu1 }
 0x750   : > { %v6954_v38 = vpop.f32.mrb[127].mxu1 }
 0x751   : > { %v6955_v6 = vadd.f32 %v6954_v38, %v6953_v52  ;;  %v5788_v5 = vadd.f32 %v6952_v42, %v10888_v22 }
 0x753   : > { %v5791_v9 = vadd.f32 %v6955_v6, %v10888_v22 }
 0x755   : > { %v6956_v59 = vpop.f32.mrb[128].mxu1 }
 0x756   : > { %v6957_v45 = vpop.f32.mrb[129].mxu1 }
 0x757   : > { %v10857_v27 = vadd.f32 %v6957_v45, %v6956_v59  ;;  %v6959_v4 = vpop.f32.mrb[130].mxu1 }
 0x758   : > { %v6960_v3 = vpop.f32.mrb[131].mxu1 }
 0x759   : > { %v10859_v8 = vadd.f32 %v6960_v3, %v6959_v4  ;;  %v5796_v3 = vadd.f32 %v10857_v27, %v10888_v22 }
 0x75d   : > { %v6962_v14 = vpop.f32.mrb[132].mxu1 }
 0x75e   : > { %v6963_v55 = vpop.f32.mrb[133].mxu1 }
 0x75f   : > { %v10861_v35 = vadd.f32 %v6963_v55, %v6962_v14  ;;  %v6965_v57 = vpop.f32.mrb[134].mxu1 }
 0x760   : > { %v6966_v37 = vpop.f32.mrb[135].mxu1 }
 0x761   : > { %v10863_v46 = vadd.f32 %v6966_v37, %v6965_v57  ;;  %v5799_v37 = vadd.f32 %v10859_v8, %v10888_v22 }
 0x765   : > { %v6968_v49 = vpop.f32.mrb[136].mxu1 }
 0x766   : > { %v6969_v20 = vpop.f32.mrb[137].mxu1 }
 0x767   : > { %v10865_v16 = vadd.f32 %v6969_v20, %v6968_v49  ;;  %v6971_v58 = vpop.f32.mrb[138].mxu1 }
 0x768   : > { %v6972_v29 = vpop.f32.mrb[139].mxu1 }
 0x769   : > { %v10867_v43 = vadd.f32 %v6972_v29, %v6971_v58 }
 0x76d   : > { %v6974_v47 = vpop.f32.mrb[140].mxu1 }
 0x76e   : > { %v6975_v23 = vpop.f32.mrb[141].mxu1 }
 0x76f   : > { %v10869_v25 = vadd.f32 %v6975_v23, %v6974_v47  ;;  %v6977_v26 = vpop.f32.mrb[142].mxu1 }
 0x770   : > { %v6978_v40 = vpop.f32.mrb[143].mxu1 }
 0x771   : > { %v10871_v53 = vadd.f32 %v6978_v40, %v6977_v26 }
 0x775   : > { %v6980_v0 = vpop.f32.mrb[144].mxu1 }
 0x776   : > { %v6981_v10 = vpop.f32.mrb[145].mxu1 }
 0x777   : > { %v10873_v1 = vadd.f32 %v6981_v10, %v6980_v0  ;;  %v6983_v21 = vpop.f32.mrb[146].mxu1  ;;  %v5804_v10 = vadd.f32 %v10861_v35, %v10888_v22 }
 0x778   : > { %v6984_v56 = vpop.f32.mrb[147].mxu1 }
 0x779   : > { %v10875_v32 = vadd.f32 %v6984_v56, %v6983_v21 }
 0x77d   : > { %v6986_v60 = vpop.f32.mrb[148].mxu1 }
 0x77e   : > { %v6987_v15 = vpop.f32.mrb[149].mxu1 }
 0x77f   : > { %v10877_v18 = vadd.f32 %v6987_v15, %v6986_v60  ;;  %v6989_v33 = vpop.f32.mrb[150].mxu1  ;;  %v5807_v15 = vadd.f32 %v10863_v46, %v10888_v22 }
 0x780   : > { %v6990_v34 = vpop.f32.mrb[151].mxu1 }
 0x781   : > { %v10879_v51 = vadd.f32 %v6990_v34, %v6989_v33 }
 0x785   : > { %v6992_v63 = vpop.f32.mrb[152].mxu1 }
 0x786   : > { %v6993_v13 = vpop.f32.mrb[153].mxu1 }
 0x787   : > { %v10881_v48 = vadd.f32 %v6993_v13, %v6992_v63  ;;  %v6995_v24 = vpop.f32.mrb[154].mxu1 }
 0x788   : > { %v6996_v62 = vpop.f32.mrb[155].mxu1 }
 0x789   : > { %v10883_v7 = vadd.f32 %v6996_v62, %v6995_v24 }
 0x78d   : > { %v6998_v39 = vpop.f32.mrb[156].mxu1 }
 0x78e   : > { %v6999_v30 = vpop.f32.mrb[157].mxu1 }
 0x78f   : > { %v10890_v28 = vadd.f32 %v6999_v30, %v6998_v39  ;;  %v7001_v54 = vpop.f32.mrb[158].mxu1  ;;  %v7062_v61 = vpop.f32.mrb[164].mxu0 }
 0x790   : > { %v7002_v12 = vpop.f32.mrb[159].mxu1  ;;  %v7063_v36 = vpop.f32.mrb[165].mxu0 }
 0x791   : > { %v10893_v44 = vadd.f32 %v7002_v12, %v7001_v54  ;;  %v7064_v41 = vadd.f32 %v7063_v36, %v7062_v61  ;;  %v7065_v17 = vpop.f32.mrb[166].mxu0  ;;  %v5812_v61 = vadd.f32 %v10865_v16, %v10888_v22 }
 0x792   : > { %v7066_v2 = vpop.f32.mrb[167].mxu0 }
 0x793   : > { %v7067_v31 = vadd.f32 %v7066_v2, %v7065_v17  ;;  %v10896_v50 = vadd.f32 %v7064_v41, %v5788_v5  ;;  %v5815_v41 = vadd.f32 %v10867_v43, %v10888_v22 }
 0x795   : > { %v7004_v19 = vpop.f32.mrb[160].mxu1  ;;  %v10898_v11 = vadd.f32 %v7067_v31, %v5791_v9 }
 0x796   : > { %v7005_v52 = vpop.f32.mrb[161].mxu1 }
 0x797   : > { %v10900_v38 = vadd.f32 %v7005_v52, %v7004_v19  ;;  %v7007_v59 = vpop.f32.mrb[162].mxu1  ;;  %v7068_v45 = vpop.f32.mrb[168].mxu0 }
 0x798   : > { %v7008_v4 = vpop.f32.mrb[163].mxu1  ;;  %v7069_v42 = vpop.f32.mrb[169].mxu0 }
 0x799   : > { %v10904_v14 = vadd.f32 %v7008_v4, %v7007_v59  ;;  %v7070_v55 = vadd.f32 %v7069_v42, %v7068_v45  ;;  %v7071_v6 = vpop.f32.mrb[170].mxu0  ;;  %v5820_v42 = vadd.f32 %v10869_v25, %v10888_v22 }
 0x79a   : > { %v7072_v57 = vpop.f32.mrb[171].mxu0 }
 0x79b   : > { %v7073_v49 = vadd.f32 %v7072_v57, %v7071_v6  ;;  %v10908_v20 = vadd.f32 %v7070_v55, %v5796_v3  ;;  %v5823_v57 = vadd.f32 %v10871_v53, %v10888_v22 }
 0x79d   : > { %v7010_v58 = vpop.f32.mrb[164].mxu1  ;;  %v10910_v29 = vadd.f32 %v7073_v49, %v5799_v37 }
 0x79e   : > { %v7011_v47 = vpop.f32.mrb[165].mxu1 }
 0x79f   : > { %v10912_v23 = vadd.f32 %v7011_v47, %v7010_v58  ;;  %v7013_v26 = vpop.f32.mrb[166].mxu1  ;;  %v7074_v40 = vpop.f32.mrb[172].mxu0 }
 0x7a0   : > { %v7014_v27 = vpop.f32.mrb[167].mxu1  ;;  %v7075_v0 = vpop.f32.mrb[173].mxu0 }
 0x7a1   : > { %v10916_v21 = vadd.f32 %v7014_v27, %v7013_v26  ;;  %v7076_v56 = vadd.f32 %v7075_v0, %v7074_v40  ;;  %v7077_v8 = vpop.f32.mrb[174].mxu0 }
 0x7a2   : > { %v7078_v60 = vpop.f32.mrb[175].mxu0 }
 0x7a3   : > { %v7079_v33 = vadd.f32 %v7078_v60, %v7077_v8  ;;  %v10920_v34 = vadd.f32 %v7076_v56, %v5804_v10  ;;  %v5828_v56 = vadd.f32 %v10873_v1, %v10888_v22 }
 0x7a5   : > { %v7016_v63 = vpop.f32.mrb[168].mxu1  ;;  %v10922_v13 = vadd.f32 %v7079_v33, %v5807_v15  ;;  %v5831_v33 = vadd.f32 %v10875_v32, %v10888_v22 }
 0x7a6   : > { %v7017_v24 = vpop.f32.mrb[169].mxu1 }
 0x7a7   : > { %v10924_v62 = vadd.f32 %v7017_v24, %v7016_v63  ;;  %v7019_v39 = vpop.f32.mrb[170].mxu1  ;;  %v7080_v30 = vpop.f32.mrb[176].mxu0 }
 0x7a8   : > { %v7020_v35 = vpop.f32.mrb[171].mxu1  ;;  %v7081_v54 = vpop.f32.mrb[177].mxu0 }
 0x7a9   : > { %v10928_v12 = vadd.f32 %v7020_v35, %v7019_v39  ;;  %v7082_v36 = vadd.f32 %v7081_v54, %v7080_v30  ;;  %v7083_v46 = vpop.f32.mrb[178].mxu0 }
 0x7aa   : > { %v7084_v5 = vpop.f32.mrb[179].mxu0 }
 0x7ab   : > { %v7085_v17 = vadd.f32 %v7084_v5, %v7083_v46  ;;  %v10932_v2 = vadd.f32 %v7082_v36, %v5812_v61  ;;  %v5836_v5 = vadd.f32 %v10877_v18, %v10888_v22 }
 0x7ad   : > { %v7022_v9 = vpop.f32.mrb[172].mxu1  ;;  %v10934_v31 = vadd.f32 %v7085_v17, %v5815_v41 }
 0x7ae   : > { %v7023_v19 = vpop.f32.mrb[173].mxu1 }
 0x7af   : > { %v10936_v52 = vadd.f32 %v7023_v19, %v7022_v9  ;;  %v7025_v59 = vpop.f32.mrb[174].mxu1  ;;  %v7086_v45 = vpop.f32.mrb[180].mxu0  ;;  %v5839_v19 = vadd.f32 %v10879_v51, %v10888_v22 }
 0x7b0   : > { %v7026_v16 = vpop.f32.mrb[175].mxu1  ;;  %v7087_v4 = vpop.f32.mrb[181].mxu0 }
 0x7b1   : > { %v10940_v3 = vadd.f32 %v7026_v16, %v7025_v59  ;;  %v7088_v55 = vadd.f32 %v7087_v4, %v7086_v45  ;;  %v7089_v43 = vpop.f32.mrb[182].mxu0 }
 0x7b2   : > { %v7090_v6 = vpop.f32.mrb[183].mxu0 }
 0x7b3   : > { %v7091_v37 = vadd.f32 %v7090_v6, %v7089_v43  ;;  %v10944_v49 = vadd.f32 %v7088_v55, %v5820_v42 }
 0x7b5   : > { %v7028_v58 = vpop.f32.mrb[176].mxu1  ;;  %v10946_v47 = vadd.f32 %v7091_v37, %v5823_v57  ;;  %v5844_v37 = vadd.f32 %v10881_v48, %v10888_v22 }
 0x7b6   : > { %v7029_v26 = vpop.f32.mrb[177].mxu1 }
 0x7b7   : > { %v10948_v40 = vadd.f32 %v7029_v26, %v7028_v58  ;;  %v7031_v27 = vpop.f32.mrb[178].mxu1  ;;  %v7092_v0 = vpop.f32.mrb[184].mxu0 }
 0x7b8   : > { %v7032_v25 = vpop.f32.mrb[179].mxu1  ;;  %v7093_v10 = vpop.f32.mrb[185].mxu0 }
 0x7b9   : > { %v10952_v8 = vadd.f32 %v7032_v25, %v7031_v27  ;;  %v7094_v60 = vadd.f32 %v7093_v10, %v7092_v0  ;;  %v7095_v53 = vpop.f32.mrb[186].mxu0  ;;  %v5847_v0 = vadd.f32 %v10883_v7, %v10888_v22  ;;  %v5852_v7 = vadd.f32 %v10890_v28, %v10888_v22 }
 0x7ba   : > { %v7096_v15 = vpop.f32.mrb[187].mxu0 }
 0x7bb   : > { %v7097_v63 = vadd.f32 %v7096_v15, %v7095_v53  ;;  %v10956_v24 = vadd.f32 %v7094_v60, %v5828_v56 }
 0x7bd   : > { %v7034_v39 = vpop.f32.mrb[180].mxu1  ;;  %v10958_v30 = vadd.f32 %v7097_v63, %v5831_v33 }
 0x7be   : > { %v7035_v35 = vpop.f32.mrb[181].mxu1 }
 0x7bf   : > { %v10960_v54 = vadd.f32 %v7035_v35, %v7034_v39  ;;  %v7037_v61 = vpop.f32.mrb[182].mxu1  ;;  %v7098_v36 = vpop.f32.mrb[188].mxu0 }
 0x7c0   : > { %v7038_v1 = vpop.f32.mrb[183].mxu1  ;;  %v7099_v46 = vpop.f32.mrb[189].mxu0 }
 0x7c1   : > { %v10964_v41 = vadd.f32 %v7038_v1, %v7037_v61  ;;  %v7100_v17 = vadd.f32 %v7099_v46, %v7098_v36  ;;  %v7101_v32 = vpop.f32.mrb[190].mxu0 }
 0x7c2   : > { %v7102_v9 = vpop.f32.mrb[191].mxu0 }
 0x7c3   : > { %v7103_v59 = vadd.f32 %v7102_v9, %v7101_v32  ;;  %v10968_v45 = vadd.f32 %v7100_v17, %v5836_v5 }
 0x7c5   : > { %v7040_v16 = vpop.f32.mrb[184].mxu1  ;;  %v10970_v4 = vadd.f32 %v7103_v59, %v5839_v19 }
 0x7c6   : > { %v7041_v42 = vpop.f32.mrb[185].mxu1 }
 0x7c7   : > { %v10972_v55 = vadd.f32 %v7041_v42, %v7040_v16  ;;  %v7043_v43 = vpop.f32.mrb[186].mxu1  ;;  %v7104_v6 = vpop.f32.mrb[192].mxu0 }
 0x7c8   : > { %v7044_v18 = vpop.f32.mrb[187].mxu1  ;;  %v7105_v57 = vpop.f32.mrb[193].mxu0 }
 0x7c9   : > { %v10976_v58 = vadd.f32 %v7044_v18, %v7043_v43  ;;  %v7106_v26 = vadd.f32 %v7105_v57, %v7104_v6  ;;  %v7107_v51 = vpop.f32.mrb[194].mxu0 }
 0x7ca   : > { %v7108_v27 = vpop.f32.mrb[195].mxu0 }
 0x7cb   : > { %v7109_v25 = vadd.f32 %v7108_v27, %v7107_v51  ;;  %v10980_v10 = vadd.f32 %v7106_v26, %v5844_v37 }
 0x7cd   : > { %v7300_v56 = vpop.f32.mrb[188].mxu1  ;;  %v10982_v60 = vadd.f32 %v7109_v25, %v5847_v0 }
 0x7ce   : > { %v6118_v53 = vadd.f32 %v7300_v56, %v10908_v20  ;;  %v6109_v15 = vpop.f32.mrb[189].mxu1  ;;  %v5855_v20 = vadd.f32 %v10893_v44, %v10888_v22  ;;  %v5860_v44 = vadd.f32 %v10900_v38, %v10888_v22 }
 0x7cf   : > { %v6110_v33 = vadd.f32 %v6109_v15, %v10896_v50  ;;  %v7110_v48 = vpop.f32.mrb[196].mxu0  ;;  %v7301_v63 = vpop.f32.mrb[190].mxu1 }
 0x7d0   : > { %v6121_v39 = vadd.f32 %v7301_v63, %v10910_v29  ;;  %v7111_v35 = vpop.f32.mrb[197].mxu0  ;;  %v6112_v61 = vpop.f32.mrb[191].mxu1 }
 0x7d1   : > { %v7112_v36 = vadd.f32 %v7111_v35, %v7110_v48  ;;  %v6113_v1 = vadd.f32 %v6112_v61, %v10898_v11  ;;  %6236 = vxpose.xlu1.b32.start [1/16] (narrow) %v6110_v33, 8  ;;  %v7113_v46 = vpop.f32.mrb[198].mxu0 }
 0x7d2   : > { %v7114_v5 = vpop.f32.mrb[199].mxu0 }
 0x7d3   : > { %v7115_v17 = vadd.f32 %v7114_v5, %v7113_v46  ;;  %v10992_v50 = vadd.f32 %v7112_v36, %v5852_v7 }
 0x7d5   : > { %v7304_v32 = vpop.f32.mrb[192].mxu1  ;;  %6237 = vxpose.xlu1.b32.cont [2/16] (narrow) %v6113_v1, 8  ;;  %v10994_v29 = vadd.f32 %v7115_v17, %v5855_v20 }
 0x7d6   : > { %v6134_v9 = vadd.f32 %v7304_v32, %v10932_v2  ;;  %v6125_v19 = vpop.f32.mrb[193].mxu1  ;;  %v5863_v2 = vadd.f32 %v10904_v14, %v10888_v22  ;;  %v5868_v14 = vadd.f32 %v10912_v23, %v10888_v22 }
 0x7d7   : > { %v6126_v28 = vadd.f32 %v6125_v19, %v10920_v34  ;;  %v7116_v59 = vpop.f32.mrb[200].mxu0  ;;  %v7305_v11 = vpop.f32.mrb[194].mxu1 }
 0x7d8   : > { %v6137_v16 = vadd.f32 %v7305_v11, %v10934_v31  ;;  %v7117_v42 = vpop.f32.mrb[201].mxu0  ;;  %v6128_v43 = vpop.f32.mrb[195].mxu1 }
 0x7d9   : > { %v7118_v6 = vadd.f32 %v7117_v42, %v7116_v59  ;;  %v6129_v18 = vadd.f32 %v6128_v43, %v10922_v13  ;;  %6238 = vxpose.xlu1.b32.cont [3/16] (narrow) %v6118_v53, 8  ;;  %v7119_v57 = vpop.f32.mrb[202].mxu0 }
 0x7da   : > { %v7120_v37 = vpop.f32.mrb[203].mxu0 }
 0x7db   : > { %v7121_v26 = vadd.f32 %v7120_v37, %v7119_v57  ;;  %v6021_v34 = vadd.f32 %v7118_v6, %v5860_v44 }
 0x7dd   : > { %v7308_v51 = vpop.f32.mrb[196].mxu1  ;;  %6239 = vxpose.xlu1.b32.cont [4/16] (narrow) %v6121_v39, 8  ;;  %v6024_v27 = vadd.f32 %v7121_v26, %v5863_v2  ;;  %v5871_v39 = vadd.f32 %v10916_v21, %v10888_v22  ;;  %v5876_v21 = vadd.f32 %v10924_v62, %v10888_v22  ;;  %v5887_v26 = vadd.f32 %v10940_v3, %v10888_v22 }
 0x7de   : > { %v11005_v31 = vadd.f32 %v7308_v51, %v10956_v24  ;;  %v6141_v0 = vpop.f32.mrb[197].mxu1 }
 0x7df   : > { %v6142_v38 = vadd.f32 %v6141_v0, %v10944_v49  ;;  %v7122_v25 = vpop.f32.mrb[204].mxu0  ;;  %v7309_v56 = vpop.f32.mrb[198].mxu1 }
 0x7e0   : > { %v11009_v13 = vadd.f32 %v7309_v56, %v10958_v30  ;;  %v7123_v53 = vpop.f32.mrb[205].mxu0  ;;  %v6144_v15 = vpop.f32.mrb[199].mxu1 }
 0x7e1   : > { %v7124_v33 = vadd.f32 %v7123_v53, %v7122_v25  ;;  %v6145_v48 = vadd.f32 %v6144_v15, %v10946_v47  ;;  %6240 = vxpose.xlu1.b32.cont [5/16] (narrow) %v6126_v28, 8  ;;  %v7125_v63 = vpop.f32.mrb[206].mxu0 }
 0x7e2   : > { %v7126_v24 = vpop.f32.mrb[207].mxu0 }
 0x7e3   : > { %v7127_v49 = vadd.f32 %v7126_v24, %v7125_v63  ;;  %v6029_v35 = vadd.f32 %v7124_v33, %v5868_v14  ;;  %v5892_v14 = vadd.f32 %v10948_v40, %v10888_v22  ;;  %v5895_v24 = vadd.f32 %v10952_v8, %v10888_v22 }
 0x7e5   : > { %v7312_v61 = vpop.f32.mrb[200].mxu1  ;;  %6241 = vxpose.xlu1.b32.cont [6/16] (narrow) %v6129_v18, 8  ;;  %v6032_v30 = vadd.f32 %v7127_v49, %v5871_v39 }
 0x7e6   : > { %v11017_v7 = vadd.f32 %v7312_v61, %v10980_v10  ;;  %v6157_v36 = vpop.f32.mrb[201].mxu1 }
 0x7e7   : > { %v11020_v23 = vadd.f32 %v6157_v36, %v10968_v45  ;;  %v7128_v1 = vpop.f32.mrb[208].mxu0  ;;  %v7313_v47 = vpop.f32.mrb[202].mxu1  ;;  %v5879_v45 = vadd.f32 %v10928_v12, %v10888_v22 }
 0x7e8   : > { %v11023_v46 = vadd.f32 %v7313_v47, %v10982_v60  ;;  %v7129_v5 = vpop.f32.mrb[209].mxu0  ;;  %v6160_v20 = vpop.f32.mrb[203].mxu1 }
 0x7e9   : > { %v7130_v17 = vadd.f32 %v7129_v5, %v7128_v1  ;;  %v11028_v32 = vadd.f32 %v6160_v20, %v10970_v4  ;;  %6242 = vxpose.xlu1.b32.cont [7/16] (narrow) %v6134_v9, 8  ;;  %v7131_v10 = vpop.f32.mrb[210].mxu0  ;;  %v5884_v9 = vadd.f32 %v10936_v52, %v10888_v22 }
 0x7ea   : > { %v7132_v19 = vpop.f32.mrb[211].mxu0 }
 0x7eb   : > { %v7133_v28 = vadd.f32 %v7132_v19, %v7131_v10  ;;  %v6037_v59 = vadd.f32 %v7130_v17, %v5876_v21  ;;  %v5900_v21 = vadd.f32 %v10960_v54, %v10888_v22  ;;  %v5903_v19 = vadd.f32 %v10964_v41, %v10888_v22 }
 0x7ed   : > { %v7316_v11 = vpop.f32.mrb[204].mxu1  ;;  %6243 = vxpose.xlu1.b32.cont [8/16] (narrow) %v6137_v16, 8  ;;  %v6040_v60 = vadd.f32 %v7133_v28, %v5879_v45 }
 0x7ee   : > { %v6182_v42 = vadd.f32 %v7316_v11, %v6021_v34  ;;  %v6173_v43 = vpop.f32.mrb[205].mxu1 }
 0x7ef   : > { %v6174_v44 = vadd.f32 %v6173_v43, %v10992_v50  ;;  %v7134_v62 = vpop.f32.mrb[212].mxu0  ;;  %v7317_v6 = vpop.f32.mrb[206].mxu1 }
 0x7f0   : > { %v6185_v18 = vadd.f32 %v7317_v6, %v6024_v27  ;;  %v7135_v4 = vpop.f32.mrb[213].mxu0  ;;  %v6176_v57 = vpop.f32.mrb[207].mxu1 }
 0x7f1   : > { %v7136_v37 = vadd.f32 %v7135_v4, %v7134_v62  ;;  %v6177_v12 = vadd.f32 %v6176_v57, %v10994_v29  ;;  %6244 = vxpose.xlu1.b32.cont [9/16] (narrow) %v6142_v38, 8  ;;  %6268 = vxpose.xlu0.b32.start [1/16] (narrow) %v6174_v44, 8  ;;  %v7137_v2 = vpop.f32.mrb[214].mxu0 }
 0x7f2   : > { %v7138_v16 = vpop.f32.mrb[215].mxu0 }
 0x7f3   : > { %v7139_v34 = vadd.f32 %v7138_v16, %v7137_v2  ;;  %v6045_v50 = vadd.f32 %v7136_v37, %v5884_v9  ;;  %v7547_v2 = vld [vmem:[%s7635_s14] sm:$0x77] }
 0x7f5   : > { %v7320_v51 = vpop.f32.mrb[208].mxu1  ;;  %6245 = vxpose.xlu1.b32.cont [10/16] (narrow) %v6145_v48, 8  ;;  %6269 = vxpose.xlu0.b32.cont [2/16] (narrow) %v6177_v12, 8  ;;  %v6048_v27 = vadd.f32 %v7139_v34, %v5887_v26 }
 0x7f6   : > { %v6198_v0 = vadd.f32 %v7320_v51, %v6037_v59  ;;  %v6189_v25 = vpop.f32.mrb[209].mxu1 }
 0x7f7   : > { %v6190_v56 = vadd.f32 %v6189_v25, %v6029_v35  ;;  %v7140_v52 = vpop.f32.mrb[216].mxu0  ;;  %v7321_v53 = vpop.f32.mrb[210].mxu1 }
 0x7f8   : > { %v6201_v15 = vadd.f32 %v7321_v53, %v6040_v60  ;;  %v7141_v29 = vpop.f32.mrb[217].mxu0  ;;  %v6192_v38 = vpop.f32.mrb[211].mxu1 }
 0x7f9   : > { %v7142_v33 = vadd.f32 %v7141_v29, %v7140_v52  ;;  %v6193_v63 = vadd.f32 %v6192_v38, %v6032_v30  ;;  %6246 = vxpose.xlu1.b32.cont [11/16] (narrow) %v11005_v31, 8  ;;  %6270 = vxpose.xlu0.b32.cont [3/16] (narrow) %v6182_v42, 8  ;;  %v7143_v3 = vpop.f32.mrb[218].mxu0 }
 0x7fa   : > { %v7144_v48 = vpop.f32.mrb[219].mxu0 }
 0x7fb   : > { %v7145_v39 = vadd.f32 %v7144_v48, %v7143_v3  ;;  %v6053_v49 = vadd.f32 %v7142_v33, %v5892_v14 }
 0x7fd   : > { %v7324_v35 = vpop.f32.mrb[212].mxu1  ;;  %6247 = vxpose.xlu1.b32.cont [12/16] (narrow) %v11009_v13, 8  ;;  %6271 = vxpose.xlu0.b32.cont [4/16] (narrow) %v6185_v18, 8  ;;  %v6056_v61 = vadd.f32 %v7145_v39, %v5895_v24 }
 0x7fe   : > { %v6214_v36 = vadd.f32 %v7324_v35, %v6053_v49  ;;  %v6205_v1 = vpop.f32.mrb[213].mxu1 }
 0x7ff   : > { %v6206_v40 = vadd.f32 %v6205_v1, %v6045_v50  ;;  %v7146_v47 = vpop.f32.mrb[220].mxu0  ;;  %v7325_v30 = vpop.f32.mrb[214].mxu1 }
 0x800   : > { %v6217_v5 = vadd.f32 %v7325_v30, %v6056_v61  ;;  %v7147_v31 = vpop.f32.mrb[221].mxu0  ;;  %v6208_v20 = vpop.f32.mrb[215].mxu1 }
 0x801   : > { %v7148_v17 = vadd.f32 %v7147_v31, %v7146_v47  ;;  %v6209_v8 = vadd.f32 %v6208_v20, %v6048_v27  ;;  %6248 = vxpose.xlu1.b32.cont [13/16] (narrow) %v11020_v23, 8  ;;  %6272 = vxpose.xlu0.b32.cont [5/16] (narrow) %v6190_v56, 8  ;;  %v7149_v10 = vpop.f32.mrb[222].mxu0  ;;  %v5908_v23 = vadd.f32 %v10972_v55, %v10888_v22 }
 0x802   : > { %v7150_v13 = vpop.f32.mrb[223].mxu0 }
 0x803   : > { %v7151_v45 = vadd.f32 %v7150_v13, %v7149_v10  ;;  %v6061_v28 = vadd.f32 %v7148_v17, %v5900_v21 }
 0x805   : > { %v7328_v59 = vpop.f32.mrb[216].mxu1  ;;  %6249 = vxpose.xlu1.b32.cont [14/16] (narrow) %v11028_v32, 8  ;;  %6273 = vxpose.xlu0.b32.cont [6/16] (narrow) %v6193_v63, 8  ;;  %v6064_v11 = vadd.f32 %v7151_v45, %v5903_v19  ;;  %v5911_v32 = vadd.f32 %v10976_v58, %v10888_v22 }
 0x806   : > { %v6221_v60 = vpop.f32.mrb[217].mxu1 }
 0x807   : > { %v6222_v42 = vadd.f32 %v6221_v60, %v6061_v28  ;;  %v7152_v54 = vpop.f32.mrb[224].mxu0  ;;  %v7329_v43 = vpop.f32.mrb[218].mxu1 }
 0x808   : > { %v7153_v44 = vpop.f32.mrb[225].mxu0  ;;  %v6224_v62 = vpop.f32.mrb[219].mxu1 }
 0x809   : > { %v7154_v6 = vadd.f32 %v7153_v44, %v7152_v54  ;;  %v6225_v18 = vadd.f32 %v6224_v62, %v6064_v11  ;;  %6250 = vxpose.xlu1.b32.cont [15/16] (narrow) %v11017_v7, 8  ;;  %6274 = vxpose.xlu0.b32.cont [7/16] (narrow) %v6198_v0, 8  ;;  %v7155_v41 = vpop.f32.mrb[226].mxu0 }
 0x80a   : > { %v7156_v4 = vpop.f32.mrb[227].mxu0 }
 0x80b   : > { %v6069_v57 = vadd.f32 %v7154_v6, %v5908_v23  ;;  %v7157_v9 = vadd.f32 %v7156_v4, %v7155_v41 }
 0x80d   : > { %v6230_v37 = vadd.f32 %v7328_v59, %v6069_v57  ;;  %v6072_v12 = vadd.f32 %v7157_v9, %v5911_v32  ;;  %6251 = vxpose.xlu1.b32.end [16/16] (narrow) %v11023_v46, 8  ;;  %6275 = vxpose.xlu0.b32.cont [8/16] (narrow) %v6201_v15, 8 }
 0x80f   : > { %v6233_v55 = vadd.f32 %v7329_v43, %v6072_v12 }
 0x811   : > { %6276 = vxpose.xlu0.b32.cont [9/16] (narrow) %v6206_v40, 8 }
 0x815   : > { %6277 = vxpose.xlu0.b32.cont [10/16] (narrow) %v6209_v8, 8 }
 0x819   : > { %6278 = vxpose.xlu0.b32.cont [11/16] (narrow) %v6214_v36, 8 }
 0x81d   : > { %6279 = vxpose.xlu0.b32.cont [12/16] (narrow) %v6217_v5, 8 }
 0x821   : > { %6280 = vxpose.xlu0.b32.cont [13/16] (narrow) %v6222_v42, 8 }
 0x825   : > { %6281 = vxpose.xlu0.b32.cont [14/16] (narrow) %v6225_v18, 8 }
 0x829   : > { %6282 = vxpose.xlu0.b32.cont [15/16] (narrow) %v6230_v37, 8 }
 0x82d   : > { %6283 = vxpose.xlu0.b32.end [16/16] (narrow) %v6233_v55, 8 }
 0x851   : > { %v6252_v7 = vpop.trf.xlu1 }
 0x871   : > { %v6284_v22 = vpop.trf.xlu0 }
 0x872   : > { %v6302_v58 = vcombine.low %v6252_v7, %v6284_v22 }
 0x874   : > { %v6304_v46 = vadd.f32 %v7547_v2, %v6302_v58 }
 0x876   : > { %6305 = vst [vmem:[%s332_s21] sm:$0x77] %v6304_v46 }
 0x877 PF: > { %s19_s30 = sadd.s32 1, %s7554_s30  }
 0x878   : > { %p16_p4 = scmp.ge.s32.totalorder %s19_s30, 4  }
 0x87a   :  { %18 = sbr.rel (!%p16_p4) target bundleno = 1 (0x1), region = 86 }

</bundles_post_ra>
